<compile_context>
chip_gen: v5e
topology: v5e:2x2
jax: 0.10.0
libtpu: 0.0.40
codegen_flags: <defaults>
</compile_context>

<pallas_src>
import functools

import jax
import jax.numpy as jnp
from jax import lax
from jax.experimental import pallas as pl
from jax.experimental.pallas import tpu as pltpu


# --------------------------------------------------------------------------
# Small helpers
# --------------------------------------------------------------------------
def _target_lanes():
    """Slab row width: 256 lanes on v6e/v7x (native 2x256^2 MXU), 128 lanes
    on v5e and older (native 128-wide MXU; 256 there only adds zero bytes)."""
    try:
        kind = jax.devices()[0].device_kind.lower()
    except Exception:
        return 128
    if any(v in kind for v in ("v2", "v3", "v4", "v5")):
        return 128
    return 256


def _pad_ch(c):
    """Smallest power of two >= c, so a pixel pack can reach exactly 128 lanes."""
    p = 1
    while p < c:
        p *= 2
    return p


def _pick_pack(n_pix, ch, target_lanes=128):
    """Pixels packed per slab row so rows are ~target_lanes wide.  Falls back
    to smaller packs (masked loads/stores) only if n_pix is not divisible."""
    pack = max(1, target_lanes // ch)
    while pack > 1 and n_pix % pack:
        pack //= 2
    return pack


def _pick_mlp_pack(n_pix, width, hidden, cout_p, target_lanes=128,
                   max_w1_bytes=8 << 20):
    """Pixels per row for the fused MLP so the fc2 output is >= 128 lanes
    (unmasked stores), capped so the block-diag fc1 weight stays small."""
    pack = max(1, target_lanes // cout_p)
    while pack > 1 and (n_pix % pack
                        or 2 * (pack * width) * (pack * hidden) > max_w1_bytes):
        pack //= 2
    return pack


def _choose_tile(n, row_bytes, max_rows=1024, vmem_budget=10 << 20):
    """VMEM/roofline-aware row tile.

    A single full-slab block whenever it fits (per-grid-step overhead is
    ~0.35 us -- pure waste at small sizes); otherwise the largest
    power-of-two divisor of n that keeps the roughly double-buffered working
    set inside the budget and at/below max_rows (>=512 rows already reaches
    ~85% of the HBM roofline; bigger tiles just burn VMEM)."""
    cap = min(max_rows, max(8, vmem_budget // max(row_bytes, 1)))
    if n <= cap or n % 8:
        return n
    t = 8
    while t * 2 <= cap and n % (t * 2) == 0:
        t *= 2
    return t


def _compiler_params(est_vmem_bytes):
    kw = {"dimension_semantics": ("parallel",)}
    # Default scoped VMEM is 16 MiB (v5e) / 32 MiB (v6e, v7x); raise it only
    # when the per-call working set actually needs it (large-tile configs),
    # capped safely below v7x's 64 MiB physical VMEM.
    if est_vmem_bytes > (12 << 20):
        kw["vmem_limit_bytes"] = int(min(2 * est_vmem_bytes, 48 << 20))
    return pltpu.CompilerParams(**kw)


def _block_diag(w, reps):
    """(cin, cout) -> (reps*cin, reps*cout) block-diagonal replication."""
    cin, cout = w.shape
    eye = jnp.eye(reps, dtype=w.dtype)
    return jnp.einsum("pq,io->piqo", eye, w).reshape(reps * cin, reps * cout)


def _rep_bias(b, reps):
    return jnp.tile(b, reps).reshape(1, reps * b.shape[0])


def _cost(flops, bytes_accessed):
    # Advisory only: helps XLA schedule the surrounding FFT/reshape glue.
    return pl.CostEstimate(flops=flops, transcendentals=0,
                           bytes_accessed=bytes_accessed)


# --------------------------------------------------------------------------
# Pallas kernels
# --------------------------------------------------------------------------
def _slab_linear_kernel(x_ref, w_ref, b_ref, o_ref):
    # o = x @ W_bd + b        (fc0: 1x1 conv, no activation)
    y = jnp.dot(x_ref[...].astype(jnp.bfloat16), w_ref[...],
                preferred_element_type=jnp.float32)
    o_ref[...] = (y + b_ref[...]).astype(o_ref.dtype)


def _slab_layer_kernel(x_ref, x1_ref, w_ref, b_ref, o_ref):
    # o = relu(x1 + x @ W_bd + b)   -- 1x1 conv + spectral residual + ReLU fused
    y = jnp.dot(x_ref[...].astype(jnp.bfloat16), w_ref[...],
                preferred_element_type=jnp.float32)
    y = y + b_ref[...] + x1_ref[...]
    o_ref[...] = jnp.maximum(y, 0.0).astype(o_ref.dtype)


def _slab_mlp_kernel(x_ref, w1_ref, b1_ref, w2_ref, b2_ref, o_ref):
    # o = relu(x @ W1_bd + b1) @ W2_bd + b2   -- fc1 + ReLU + fc2 fused
    h = jnp.dot(x_ref[...].astype(jnp.bfloat16), w1_ref[...],
                preferred_element_type=jnp.float32)
    h = jnp.maximum(h + b1_ref[...], 0.0)
    y = jnp.dot(h.astype(jnp.bfloat16), w2_ref[...],
                preferred_element_type=jnp.float32)
    o_ref[...] = (y + b2_ref[...]).astype(o_ref.dtype)


def _spectral_kernel(xr_ref, xi_ref, wr_ref, wi_ref, or_ref, oi_ref):
    # Complex channel mix over all kept modes as ONE modes-batched contraction
    # with DENSE (M, Cin, Cout) weights -- no block-diagonal zero inflation.
    # 3-multiplication complex trick; (wr + wi) is formed on the fly on the
    # otherwise-idle VPU instead of shipping a third weight copy from HBM.
    # Kept in f32: the reference module forces fp32 for the spectral conv.
    xr = xr_ref[...]
    xi = xi_ref[...]
    wr = wr_ref[...]
    wi = wi_ref[...]
    t1 = jnp.einsum("mbi,mio->mbo", xr, wr, preferred_element_type=jnp.float32)
    t2 = jnp.einsum("mbi,mio->mbo", xi, wi, preferred_element_type=jnp.float32)
    t3 = jnp.einsum("mbi,mio->mbo", xr + xi, wr + wi,
                    preferred_element_type=jnp.float32)
    or_ref[...] = t1 - t2
    oi_ref[...] = (t3 - t1) - t2


# --------------------------------------------------------------------------
# Pallas wrappers
# --------------------------------------------------------------------------
def slab_linear(x, w_bd, b_rep):
    n, kin = x.shape
    kout = w_bd.shape[1]
    tm = _choose_tile(n, 8 * (kin + kout))
    est = 8 * tm * (kin + kout) + 4 * kin * kout
    return pl.pallas_call(
        _slab_linear_kernel,
        out_shape=jax.ShapeDtypeStruct((n, kout), jnp.float32),
        grid=(n // tm,),
        in_specs=[
            pl.BlockSpec((tm, kin), lambda i: (i, 0)),
            pl.BlockSpec((kin, kout), lambda i: (0, 0)),
            pl.BlockSpec((1, kout), lambda i: (0, 0)),
        ],
        out_specs=pl.BlockSpec((tm, kout), lambda i: (i, 0)),
        compiler_params=_compiler_params(est),
        cost_estimate=_cost(2 * n * kin * kout,
                            4 * n * (kin + kout) + 2 * kin * kout + 4 * kout),
    )(x, w_bd, b_rep)


def slab_layer(x, x1, w_bd, b_rep):
    n, kin = x.shape
    kout = w_bd.shape[1]
    tm = _choose_tile(n, 8 * (kin + 2 * kout))
    est = 8 * tm * (kin + 2 * kout) + 4 * kin * kout
    return pl.pallas_call(
        _slab_layer_kernel,
        out_shape=jax.ShapeDtypeStruct((n, kout), jnp.float32),
        grid=(n // tm,),
        in_specs=[
            pl.BlockSpec((tm, kin), lambda i: (i, 0)),
            pl.BlockSpec((tm, kout), lambda i: (i, 0)),
            pl.BlockSpec((kin, kout), lambda i: (0, 0)),
            pl.BlockSpec((1, kout), lambda i: (0, 0)),
        ],
        out_specs=pl.BlockSpec((tm, kout), lambda i: (i, 0)),
        compiler_params=_compiler_params(est),
        cost_estimate=_cost(2 * n * kin * kout,
                            4 * n * (kin + 2 * kout) + 2 * kin * kout + 4 * kout),
    )(x, x1, w_bd, b_rep)


def slab_mlp(x, w1_bd, b1_rep, w2_bd, b2_rep):
    n, kin = x.shape
    khid = w1_bd.shape[1]
    kout = w2_bd.shape[1]
    # The fused MLP also holds the hidden activation in VMEM -> smaller cap
    # (the review's v7x concern); weights are resident across the grid.
    tm = _choose_tile(n, 8 * (kin + kout) + 6 * khid, max_rows=512)
    est = tm * (8 * (kin + kout) + 6 * khid) + 4 * (kin * khid + khid * kout)
    return pl.pallas_call(
        _slab_mlp_kernel,
        out_shape=jax.ShapeDtypeStruct((n, kout), jnp.float32),
        grid=(n // tm,),
        in_specs=[
            pl.BlockSpec((tm, kin), lambda i: (i, 0)),
            pl.BlockSpec((kin, khid), lambda i: (0, 0)),
            pl.BlockSpec((1, khid), lambda i: (0, 0)),
            pl.BlockSpec((khid, kout), lambda i: (0, 0)),
            pl.BlockSpec((1, kout), lambda i: (0, 0)),
        ],
        out_specs=pl.BlockSpec((tm, kout), lambda i: (i, 0)),
        compiler_params=_compiler_params(est),
        cost_estimate=_cost(
            2 * n * (kin * khid + khid * kout),
            4 * n * (kin + kout) + 2 * (kin * khid + khid * kout)
            + 4 * (khid + kout)),
    )(x, w1_bd, b1_rep, w2_bd, b2_rep)


def spectral_mix(xr, xi, wr, wi):
    """Complex mode mixing: out[m,b,o] = sum_i x[m,b,i] * w[m,i,o] with dense
    per-mode weights.  One Pallas call handles real+imag via the 3-mult trick.
    NOTE: at tiny batch the MXU is underfilled and this call is weight-DMA /
    launch bound; the dense weights keep those bytes minimal."""
    M, B, C = xr.shape
    Co = wr.shape[2]
    vspec = pl.BlockSpec((M, B, C), lambda i: (0, 0, 0))
    wspec = pl.BlockSpec((M, C, Co), lambda i: (0, 0, 0))
    ospec = pl.BlockSpec((M, B, Co), lambda i: (0, 0, 0))
    return pl.pallas_call(
        _spectral_kernel,
        out_shape=(jax.ShapeDtypeStruct((M, B, Co), jnp.float32),
                   jax.ShapeDtypeStruct((M, B, Co), jnp.float32)),
        grid=(1,),
        in_specs=[vspec, vspec, wspec, wspec],
        out_specs=(ospec, ospec),
        compiler_params=_compiler_params(4 * M * (2 * B * (C + Co) + 2 * C * Co)),
        cost_estimate=_cost(6 * M * B * C * Co,
                            4 * M * (2 * B * (C + Co) + 2 * C * Co)),
    )(xr, xi, wr, wi)


# --------------------------------------------------------------------------
# Parameter init (deterministic, synthetic) + packing into kernel layouts
# --------------------------------------------------------------------------
def init_params(key, width, modes1, modes2, mlp_hidden, depth, in_ch=3, out_ch=3):
    params = {}
    keys = jax.random.split(key, 3 + 3 * depth)
    ki = iter(keys)

    def uniform_pm(k, shape, bound):
        return jax.random.uniform(k, shape, jnp.float32, -bound, bound)

    m = modes1 * modes2

    # fc0: Conv2d(in_ch, width, 1) -> weight (in_ch, width), bias (width,)
    b0 = 1.0 / jnp.sqrt(in_ch)
    k = jax.random.split(next(ki))
    params["fc0_w"] = uniform_pm(k[0], (in_ch, width), b0)
    params["fc0_b"] = uniform_pm(k[1], (width,), b0)

    # spectral + 1x1 conv per layer
    scale = 1.0 / (width * width)
    for l in range(depth):
        # torch layout: (in, out, m1, m2) cfloat with real/imag uniform [0,1)
        wr = scale * jax.random.uniform(next(ki), (width, width, modes1, modes2))
        wi = scale * jax.random.uniform(next(ki), (width, width, modes1, modes2))
        params[f"spec{l}_wr"] = wr.transpose(2, 3, 0, 1).reshape(m, width, width)
        params[f"spec{l}_wi"] = wi.transpose(2, 3, 0, 1).reshape(m, width, width)
        bw = 1.0 / jnp.sqrt(width)
        kw = jax.random.split(next(ki))
        params[f"w{l}_w"] = uniform_pm(kw[0], (width, width), bw)
        params[f"w{l}_b"] = uniform_pm(kw[1], (width,), bw)

    # fc1: Linear(width, mlp_hidden); fc2: Linear(mlp_hidden, out_ch)
    b1 = 1.0 / jnp.sqrt(width)
    k = jax.random.split(next(ki))
    params["fc1_w"] = uniform_pm(k[0], (width, mlp_hidden), b1)
    params["fc1_b"] = uniform_pm(k[1], (mlp_hidden,), b1)
    b2 = 1.0 / jnp.sqrt(mlp_hidden)
    k = jax.random.split(next(ki))
    params["fc2_w"] = uniform_pm(k[0], (mlp_hidden, out_ch), b2)
    params["fc2_b"] = uniform_pm(k[1], (mlp_hidden if False else out_ch,), b2)
    return params


def pack_params(params, *, pack, pack_in, pack_mlp, cin_p, cout_p, depth):
    """Build the lane-dense / block-diagonal forms the kernels consume.
    Pointwise weights are bf16 MXU operands; biases stay f32; spectral
    weights stay DENSE (M, Cin, Cout) f32 (reference forces fp32 there)."""
    packed = {}
    # fc0: pad Cin 3 -> 4 with a zero row so the input slab rows are 128 lanes.
    w0 = jnp.pad(params["fc0_w"],
                 ((0, cin_p - params["fc0_w"].shape[0]), (0, 0)))
    packed["fc0_w"] = _block_diag(w0, pack_in).astype(jnp.bfloat16)
    packed["fc0_b"] = _rep_bias(params["fc0_b"], pack_in)

    for l in range(depth):
        packed[f"w{l}_w"] = _block_diag(params[f"w{l}_w"], pack).astype(jnp.bfloat16)
        packed[f"w{l}_b"] = _rep_bias(params[f"w{l}_b"], pack)
        packed[f"spec{l}_wr"] = params[f"spec{l}_wr"]    # dense, f32
        packed[f"spec{l}_wi"] = params[f"spec{l}_wi"]    # dense, f32

    packed["fc1_w"] = _block_diag(params["fc1_w"], pack_mlp).astype(jnp.bfloat16)
    packed["fc1_b"] = _rep_bias(params["fc1_b"], pack_mlp)
    # fc2: pad out channels 3 -> 4 (zero column / zero bias) -> lane-dense store.
    w2 = jnp.pad(params["fc2_w"],
                 ((0, 0), (0, cout_p - params["fc2_w"].shape[1])))
    b2 = jnp.pad(params["fc2_b"], (0, cout_p - params["fc2_b"].shape[0]))
    packed["fc2_w"] = _block_diag(w2, pack_mlp).astype(jnp.bfloat16)
    packed["fc2_b"] = _rep_bias(b2, pack_mlp)
    return packed


# --------------------------------------------------------------------------
# FNO forward
# --------------------------------------------------------------------------
def fno_forward(x, params, *, modes1, modes2, width, depth,
                pack, pack_in, pack_mlp, out_ch=3):
    B, C, H, W = x.shape
    pad_h = (modes1 - H % modes1) % modes1
    pad_w = (modes2 - W % modes2) % modes2
    Hp, Wp = H + pad_h, W + pad_w
    Wf = Wp // 2 + 1
    M = modes1 * modes2
    n_pix = B * Hp * Wp

    # NCHW -> NHWC once; spatial pad like F.pad([0, pad_w, 0, pad_h]);
    # channel pad (3 -> 4) so the fc0 slab rows are a full 128 lanes.
    cin_p = params["fc0_w"].shape[0] // pack_in
    x = jnp.transpose(x, (0, 2, 3, 1))
    x = jnp.pad(x, ((0, 0), (0, pad_h), (0, pad_w), (0, cin_p - C)))

    # fc0 (1x1 conv) on a lane-dense 32-pixel-pack view; the re-view to the
    # main slab layout afterwards is a free row-major reshape.
    x0 = slab_linear(x.reshape(n_pix // pack_in, pack_in * cin_p),
                     params["fc0_w"], params["fc0_b"])
    x_slab = x0.reshape(n_pix // pack, pack * width)

    for l in range(depth):
        # ---- spectral branch (NHWC FFT: no per-layer transposes) ----
        x_nhwc = x_slab.reshape(B, Hp, Wp, width)
        # TODO(synk): rfft2/irfft2 have no Pallas primitive; plain JAX here.
        x_ft = jnp.fft.rfft2(x_nhwc, axes=(1, 2))              # (B,Hp,Wf,width)
        xc = x_ft[:, :modes1, :modes2, :]                      # kept mode corner
        xc = jnp.transpose(xc, (1, 2, 0, 3)).reshape(M, B, width)
        or_, oi_ = spectral_mix(jnp.real(xc), jnp.imag(xc),
                                params[f"spec{l}_wr"], params[f"spec{l}_wi"])
        out_c = lax.complex(or_, oi_).reshape(modes1, modes2, B, width)
        out_c = jnp.transpose(out_c, (2, 0, 1, 3))             # (B,m1,m2,width)
        out_ft = jnp.pad(out_c, ((0, 0), (0, Hp - modes1),
                                 (0, Wf - modes2), (0, 0)))
        x1 = jnp.fft.irfft2(out_ft, s=(Hp, Wp), axes=(1, 2))   # (B,Hp,Wp,width)
        x1_slab = x1.reshape(n_pix // pack, pack * width)

        # ---- fused relu(spectral + 1x1 conv + bias); Dropout(eval)=identity --
        x_slab = slab_layer(x_slab, x1_slab,
                            params[f"w{l}_w"], params[f"w{l}_b"])

    # ---- fused MLP head: fc1 -> ReLU -> fc2 (Dropout identity), on a
    # 32-pixel pack so the final store is a full 128-lane unmasked vst ----
    y = slab_mlp(x_slab.reshape(n_pix // pack_mlp, pack_mlp * width),
                 params["fc1_w"], params["fc1_b"],
                 params["fc2_w"], params["fc2_b"])
    cout_p = y.shape[1] // pack_mlp
    out = y.reshape(B, Hp, Wp, cout_p)[:, :H, :W, :out_ch]     # crop pads
    return jnp.transpose(out, (0, 3, 1, 2))                    # NHWC -> NCHW


# --------------------------------------------------------------------------
if __name__ == "__main__":
    key = jax.random.PRNGKey(0)
    kx, kp = jax.random.split(key)

    # small config: num_fourier_modes=4, num_fno_layers=2, fno_width=16,
    # mlp_hidden_dim=32; H=W=14 exercises the pad-to-modes / crop path.
    B, C_in, H, W = 2, 3, 14, 14
    modes = 4
    width = 16
    mlp_hidden = 32
    depth = 2
    out_ch = 3

    x = jax.random.normal(kx, (B, C_in, H, W), dtype=jnp.float32)
    params = init_params(kp, width, modes, modes, mlp_hidden, depth,
                         in_ch=C_in, out_ch=out_ch)

    Hp = H + (modes - H % modes) % modes
    Wp = W + (modes - W % modes) % modes
    n_pix = B * Hp * Wp

    cin_p = _pad_ch(C_in)                                  # 3 -> 4
    cout_p = _pad_ch(out_ch)                               # 3 -> 4
    pack = _pick_pack(n_pix, width, _target_lanes())       # 8 (v5e) / 16 (v6e+)
    pack_in = _pick_pack(n_pix, cin_p, 128)                # 32 -> 128-lane fc0 in
    pack_mlp = _pick_mlp_pack(n_pix, width, mlp_hidden, cout_p)  # 32 -> 128-lane out

    packed = pack_params(params, pack=pack, pack_in=pack_in, pack_mlp=pack_mlp,
                         cin_p=cin_p, cout_p=cout_p, depth=depth)

    fwd = jax.jit(functools.partial(
        fno_forward, modes1=modes, modes2=modes, width=width, depth=depth,
        pack=pack, pack_in=pack_in, pack_mlp=pack_mlp, out_ch=out_ch))
    out = jax.block_until_ready(fwd(x, packed))

    assert out.shape == (B, out_ch, H, W), out.shape
    assert out.dtype == jnp.float32
    assert bool(jnp.all(jnp.isfinite(out)))
    print("KERNEL_OK")
</pallas_src>

<mosaic_0001>
module attributes {stable_mosaic.version = 11 : i64} {
  func.func @_slab_linear_kernel(%arg0: i32, %arg1: memref<16x128xf32, #tpu.memory_space<vmem>>, %arg2: memref<128x512xbf16, #tpu.memory_space<vmem>>, %arg3: memref<1x512xf32, #tpu.memory_space<vmem>>, %arg4: memref<16x512xf32, #tpu.memory_space<vmem>>) attributes {dimension_semantics = [#tpu.dimension_semantics<parallel>], iteration_bounds = array<i64: 1>, scalar_prefetch = 0 : i64, scratch_operands = 0 : i64, tpu.core_type = #tpu.core_type<tc>, window_params = [{transform_indices = @transform_0, window_bounds = array<i64: 16, 128>}, {pipeline_mode = #tpu.pipeline_mode<synchronous>, transform_indices = @transform_1, window_bounds = array<i64: 128, 512>}, {pipeline_mode = #tpu.pipeline_mode<synchronous>, transform_indices = @transform_2, window_bounds = array<i64: 1, 512>}, {transform_indices = @transform_3, window_bounds = array<i64: 16, 512>}]} {
    %c0 = arith.constant 0 : index
    %c0_0 = arith.constant 0 : index
    %0 = vector.load %arg1[%c0, %c0_0] : memref<16x128xf32, #tpu.memory_space<vmem>>, vector<16x128xf32>
    %1 = arith.truncf %0 : vector<16x128xf32> to vector<16x128xbf16>
    %c0_1 = arith.constant 0 : index
    %c0_2 = arith.constant 0 : index
    %2 = vector.load %arg2[%c0_1, %c0_2] : memref<128x512xbf16, #tpu.memory_space<vmem>>, vector<128x512xbf16>
    %cst = arith.constant dense<0.000000e+00> : vector<16x512xf32>
    %3 = tpu.matmul %1, %2, %cst {dimension_numbers = #tpu.dot_dimension_numbers<[1], [0], [0], [1], [0, 0, 1, 1], [], []>} : vector<16x128xbf16>, vector<128x512xbf16>, vector<16x512xf32> -> vector<16x512xf32>
    %c0_3 = arith.constant 0 : index
    %c0_4 = arith.constant 0 : index
    %4 = vector.load %arg3[%c0_3, %c0_4] : memref<1x512xf32, #tpu.memory_space<vmem>>, vector<1x512xf32>
    %5 = vector.broadcast %4 : vector<1x512xf32> to vector<16x512xf32>
    %6 = arith.addf %3, %5 : vector<16x512xf32>
    %c0_5 = arith.constant 0 : index
    %c0_6 = arith.constant 0 : index
    %7 = vector.load %arg4[%c0_5, %c0_6] : memref<16x512xf32, #tpu.memory_space<vmem>>, vector<16x512xf32>
    tpu.vector_store %arg4[%c0_5, %c0_6], %6 {strides = array<i32>} : memref<16x512xf32, #tpu.memory_space<vmem>>, vector<16x512xf32>,
    return
  }
  func.func @transform_0(%arg0: i32) -> (i32, i32) {
    %c0_i32 = arith.constant 0 : i32
    %c0_i32_0 = arith.constant 0 : i32
    return %arg0, %c0_i32 : i32, i32
  }
  func.func @transform_1(%arg0: i32) -> (i32, i32) {
    %c0_i32 = arith.constant 0 : i32
    %c0_i32_0 = arith.constant 0 : i32
    %c0_i32_1 = arith.constant 0 : i32
    return %c0_i32, %c0_i32_0 : i32, i32
  }
  func.func @transform_2(%arg0: i32) -> (i32, i32) {
    %c0_i32 = arith.constant 0 : i32
    %c0_i32_0 = arith.constant 0 : i32
    %c0_i32_1 = arith.constant 0 : i32
    return %c0_i32, %c0_i32_0 : i32, i32
  }
  func.func @transform_3(%arg0: i32) -> (i32, i32) {
    %c0_i32 = arith.constant 0 : i32
    %c0_i32_0 = arith.constant 0 : i32
    return %arg0, %c0_i32 : i32, i32
  }
}

module attributes {stable_mosaic.version = 11 : i64} {
  func.func @_spectral_kernel(%arg0: i32, %arg1: memref<16x2x16xf32, #tpu.memory_space<vmem>>, %arg2: memref<16x2x16xf32, #tpu.memory_space<vmem>>, %arg3: memref<16x16x16xf32, #tpu.memory_space<vmem>>, %arg4: memref<16x16x16xf32, #tpu.memory_space<vmem>>, %arg5: memref<16x2x16xf32, #tpu.memory_space<vmem>>, %arg6: memref<16x2x16xf32, #tpu.memory_space<vmem>>) attributes {dimension_semantics = [#tpu.dimension_semantics<parallel>], iteration_bounds = array<i64: 1>, scalar_prefetch = 0 : i64, scratch_operands = 0 : i64, tpu.core_type = #tpu.core_type<tc>, window_params = [{pipeline_mode = #tpu.pipeline_mode<synchronous>, transform_indices = @transform_0, window_bounds = array<i64: 16, 2, 16>}, {pipeline_mode = #tpu.pipeline_mode<synchronous>, transform_indices = @transform_1, window_bounds = array<i64: 16, 2, 16>}, {pipeline_mode = #tpu.pipeline_mode<synchronous>, transform_indices = @transform_2, window_bounds = array<i64: 16, 16, 16>}, {pipeline_mode = #tpu.pipeline_mode<synchronous>, transform_indices = @transform_3, window_bounds = array<i64: 16, 16, 16>}, {pipeline_mode = #tpu.pipeline_mode<synchronous>, transform_indices = @transform_4, window_bounds = array<i64: 16, 2, 16>}, {pipeline_mode = #tpu.pipeline_mode<synchronous>, transform_indices = @transform_5, window_bounds = array<i64: 16, 2, 16>}]} {
    %c0 = arith.constant 0 : index
    %c0_0 = arith.constant 0 : index
    %c0_1 = arith.constant 0 : index
    %0 = vector.load %arg1[%c0, %c0_0, %c0_1] : memref<16x2x16xf32, #tpu.memory_space<vmem>>, vector<16x2x16xf32>
    %c0_2 = arith.constant 0 : index
    %c0_3 = arith.constant 0 : index
    %c0_4 = arith.constant 0 : index
    %1 = vector.load %arg2[%c0_2, %c0_3, %c0_4] : memref<16x2x16xf32, #tpu.memory_space<vmem>>, vector<16x2x16xf32>
    %c0_5 = arith.constant 0 : index
    %c0_6 = arith.constant 0 : index
    %c0_7 = arith.constant 0 : index
    %2 = vector.load %arg3[%c0_5, %c0_6, %c0_7] : memref<16x16x16xf32, #tpu.memory_space<vmem>>, vector<16x16x16xf32>
    %c0_8 = arith.constant 0 : index
    %c0_9 = arith.constant 0 : index
    %c0_10 = arith.constant 0 : index
    %3 = vector.load %arg4[%c0_8, %c0_9, %c0_10] : memref<16x16x16xf32, #tpu.memory_space<vmem>>, vector<16x16x16xf32>
    "tpu.trace_start"() <{level = 10 : i32, message = "mbi,mio->mbo"}> : () -> ()
    %cst = arith.constant dense<0.000000e+00> : vector<16x2x16xf32>
    %4 = tpu.matmul %0, %2, %cst {dimension_numbers = #tpu.dot_dimension_numbers<[2], [1], [1], [2], [0, 0, 0, 1, 1, 2], [0], [0]>} : vector<16x2x16xf32>, vector<16x16x16xf32>, vector<16x2x16xf32> -> vector<16x2x16xf32>
    %cst_11 = arith.constant dense<0.000000e+00> : vector<16x2x16xf32>
    %5 = tpu.matmul %1, %3, %cst_11 {dimension_numbers = #tpu.dot_dimension_numbers<[2], [1], [1], [2], [0, 0, 0, 1, 1, 2], [0], [0]>} : vector<16x2x16xf32>, vector<16x16x16xf32>, vector<16x2x16xf32> -> vector<16x2x16xf32>
    "tpu.trace_stop"() : () -> ()
    %6 = arith.addf %0, %1 : vector<16x2x16xf32>
    %7 = arith.addf %2, %3 : vector<16x16x16xf32>
    "tpu.trace_start"() <{level = 10 : i32, message = "mbi,mio->mbo"}> : () -> ()
    %cst_12 = arith.constant dense<0.000000e+00> : vector<16x2x16xf32>
    %8 = tpu.matmul %6, %7, %cst_12 {dimension_numbers = #tpu.dot_dimension_numbers<[2], [1], [1], [2], [0, 0, 0, 1, 1, 2], [0], [0]>} : vector<16x2x16xf32>, vector<16x16x16xf32>, vector<16x2x16xf32> -> vector<16x2x16xf32>
    "tpu.trace_stop"() : () -> ()
    %9 = arith.subf %4, %5 : vector<16x2x16xf32>
    %c0_13 = arith.constant 0 : index
    %c0_14 = arith.constant 0 : index
    %c0_15 = arith.constant 0 : index
    %10 = vector.load %arg5[%c0_13, %c0_14, %c0_15] : memref<16x2x16xf32, #tpu.memory_space<vmem>>, vector<16x2x16xf32>
    tpu.vector_store %arg5[%c0_13, %c0_14, %c0_15], %9 {strides = array<i32>} : memref<16x2x16xf32, #tpu.memory_space<vmem>>, vector<16x2x16xf32>,
    %11 = arith.subf %8, %4 : vector<16x2x16xf32>
    %12 = arith.subf %11, %5 : vector<16x2x16xf32>
    %c0_16 = arith.constant 0 : index
    %c0_17 = arith.constant 0 : index
    %c0_18 = arith.constant 0 : index
    %13 = vector.load %arg6[%c0_16, %c0_17, %c0_18] : memref<16x2x16xf32, #tpu.memory_space<vmem>>, vector<16x2x16xf32>
    tpu.vector_store %arg6[%c0_16, %c0_17, %c0_18], %12 {strides = array<i32>} : memref<16x2x16xf32, #tpu.memory_space<vmem>>, vector<16x2x16xf32>,
    return
  }
  func.func @transform_0(%arg0: i32) -> (i32, i32, i32) {
    %c0_i32 = arith.constant 0 : i32
    %c0_i32_0 = arith.constant 0 : i32
    %c0_i32_1 = arith.constant 0 : i32
    %c0_i32_2 = arith.constant 0 : i32
    return %c0_i32, %c0_i32_0, %c0_i32_1 : i32, i32, i32
  }
  func.func @transform_1(%arg0: i32) -> (i32, i32, i32) {
    %c0_i32 = arith.constant 0 : i32
    %c0_i32_0 = arith.constant 0 : i32
    %c0_i32_1 = arith.constant 0 : i32
    %c0_i32_2 = arith.constant 0 : i32
    return %c0_i32, %c0_i32_0, %c0_i32_1 : i32, i32, i32
  }
  func.func @transform_2(%arg0: i32) -> (i32, i32, i32) {
    %c0_i32 = arith.constant 0 : i32
    %c0_i32_0 = arith.constant 0 : i32
    %c0_i32_1 = arith.constant 0 : i32
    %c0_i32_2 = arith.constant 0 : i32
    return %c0_i32, %c0_i32_0, %c0_i32_1 : i32, i32, i32
  }
  func.func @transform_3(%arg0: i32) -> (i32, i32, i32) {
    %c0_i32 = arith.constant 0 : i32
    %c0_i32_0 = arith.constant 0 : i32
    %c0_i32_1 = arith.constant 0 : i32
    %c0_i32_2 = arith.constant 0 : i32
    return %c0_i32, %c0_i32_0, %c0_i32_1 : i32, i32, i32
  }
  func.func @transform_4(%arg0: i32) -> (i32, i32, i32) {
    %c0_i32 = arith.constant 0 : i32
    %c0_i32_0 = arith.constant 0 : i32
    %c0_i32_1 = arith.constant 0 : i32
    %c0_i32_2 = arith.constant 0 : i32
    return %c0_i32, %c0_i32_0, %c0_i32_1 : i32, i32, i32
  }
  func.func @transform_5(%arg0: i32) -> (i32, i32, i32) {
    %c0_i32 = arith.constant 0 : i32
    %c0_i32_0 = arith.constant 0 : i32
    %c0_i32_1 = arith.constant 0 : i32
    %c0_i32_2 = arith.constant 0 : i32
    return %c0_i32, %c0_i32_0, %c0_i32_1 : i32, i32, i32
  }
}

module attributes {stable_mosaic.version = 11 : i64} {
  func.func @_slab_layer_kernel(%arg0: i32, %arg1: memref<32x256xf32, #tpu.memory_space<vmem>>, %arg2: memref<32x256xf32, #tpu.memory_space<vmem>>, %arg3: memref<256x256xbf16, #tpu.memory_space<vmem>>, %arg4: memref<1x256xf32, #tpu.memory_space<vmem>>, %arg5: memref<32x256xf32, #tpu.memory_space<vmem>>) attributes {dimension_semantics = [#tpu.dimension_semantics<parallel>], iteration_bounds = array<i64: 1>, scalar_prefetch = 0 : i64, scratch_operands = 0 : i64, tpu.core_type = #tpu.core_type<tc>, window_params = [{transform_indices = @transform_0, window_bounds = array<i64: 32, 256>}, {transform_indices = @transform_1, window_bounds = array<i64: 32, 256>}, {pipeline_mode = #tpu.pipeline_mode<synchronous>, transform_indices = @transform_2, window_bounds = array<i64: 256, 256>}, {pipeline_mode = #tpu.pipeline_mode<synchronous>, transform_indices = @transform_3, window_bounds = array<i64: 1, 256>}, {transform_indices = @transform_4, window_bounds = array<i64: 32, 256>}]} {
    %c0 = arith.constant 0 : index
    %c0_0 = arith.constant 0 : index
    %0 = vector.load %arg1[%c0, %c0_0] : memref<32x256xf32, #tpu.memory_space<vmem>>, vector<32x256xf32>
    %1 = arith.truncf %0 : vector<32x256xf32> to vector<32x256xbf16>
    %c0_1 = arith.constant 0 : index
    %c0_2 = arith.constant 0 : index
    %2 = vector.load %arg3[%c0_1, %c0_2] : memref<256x256xbf16, #tpu.memory_space<vmem>>, vector<256x256xbf16>
    %cst = arith.constant dense<0.000000e+00> : vector<32x256xf32>
    %3 = tpu.matmul %1, %2, %cst {dimension_numbers = #tpu.dot_dimension_numbers<[1], [0], [0], [1], [0, 0, 1, 1], [], []>} : vector<32x256xbf16>, vector<256x256xbf16>, vector<32x256xf32> -> vector<32x256xf32>
    %c0_3 = arith.constant 0 : index
    %c0_4 = arith.constant 0 : index
    %4 = vector.load %arg4[%c0_3, %c0_4] : memref<1x256xf32, #tpu.memory_space<vmem>>, vector<1x256xf32>
    %5 = vector.broadcast %4 : vector<1x256xf32> to vector<32x256xf32>
    %6 = arith.addf %3, %5 : vector<32x256xf32>
    %c0_5 = arith.constant 0 : index
    %c0_6 = arith.constant 0 : index
    %7 = vector.load %arg2[%c0_5, %c0_6] : memref<32x256xf32, #tpu.memory_space<vmem>>, vector<32x256xf32>
    %8 = arith.addf %6, %7 : vector<32x256xf32>
    %cst_7 = arith.constant 0.000000e+00 : f32
    %9 = vector.broadcast %cst_7 : f32 to vector<32x256xf32>
    %10 = arith.maximumf %8, %9 : vector<32x256xf32>
    %c0_8 = arith.constant 0 : index
    %c0_9 = arith.constant 0 : index
    %11 = vector.load %arg5[%c0_8, %c0_9] : memref<32x256xf32, #tpu.memory_space<vmem>>, vector<32x256xf32>
    tpu.vector_store %arg5[%c0_8, %c0_9], %10 {strides = array<i32>} : memref<32x256xf32, #tpu.memory_space<vmem>>, vector<32x256xf32>,
    return
  }
  func.func @transform_0(%arg0: i32) -> (i32, i32) {
    %c0_i32 = arith.constant 0 : i32
    %c0_i32_0 = arith.constant 0 : i32
    return %arg0, %c0_i32 : i32, i32
  }
  func.func @transform_1(%arg0: i32) -> (i32, i32) {
    %c0_i32 = arith.constant 0 : i32
    %c0_i32_0 = arith.constant 0 : i32
    return %arg0, %c0_i32 : i32, i32
  }
  func.func @transform_2(%arg0: i32) -> (i32, i32) {
    %c0_i32 = arith.constant 0 : i32
    %c0_i32_0 = arith.constant 0 : i32
    %c0_i32_1 = arith.constant 0 : i32
    return %c0_i32, %c0_i32_0 : i32, i32
  }
  func.func @transform_3(%arg0: i32) -> (i32, i32) {
    %c0_i32 = arith.constant 0 : i32
    %c0_i32_0 = arith.constant 0 : i32
    %c0_i32_1 = arith.constant 0 : i32
    return %c0_i32, %c0_i32_0 : i32, i32
  }
  func.func @transform_4(%arg0: i32) -> (i32, i32) {
    %c0_i32 = arith.constant 0 : i32
    %c0_i32_0 = arith.constant 0 : i32
    return %arg0, %c0_i32 : i32, i32
  }
}

module attributes {stable_mosaic.version = 11 : i64} {
  func.func @_slab_mlp_kernel(%arg0: i32, %arg1: memref<16x512xf32, #tpu.memory_space<vmem>>, %arg2: memref<512x1024xbf16, #tpu.memory_space<vmem>>, %arg3: memref<1x1024xf32, #tpu.memory_space<vmem>>, %arg4: memref<1024x128xbf16, #tpu.memory_space<vmem>>, %arg5: memref<1x128xf32, #tpu.memory_space<vmem>>, %arg6: memref<16x128xf32, #tpu.memory_space<vmem>>) attributes {dimension_semantics = [#tpu.dimension_semantics<parallel>], iteration_bounds = array<i64: 1>, scalar_prefetch = 0 : i64, scratch_operands = 0 : i64, tpu.core_type = #tpu.core_type<tc>, window_params = [{transform_indices = @transform_0, window_bounds = array<i64: 16, 512>}, {pipeline_mode = #tpu.pipeline_mode<synchronous>, transform_indices = @transform_1, window_bounds = array<i64: 512, 1024>}, {pipeline_mode = #tpu.pipeline_mode<synchronous>, transform_indices = @transform_2, window_bounds = array<i64: 1, 1024>}, {pipeline_mode = #tpu.pipeline_mode<synchronous>, transform_indices = @transform_3, window_bounds = array<i64: 1024, 128>}, {pipeline_mode = #tpu.pipeline_mode<synchronous>, transform_indices = @transform_4, window_bounds = array<i64: 1, 128>}, {transform_indices = @transform_5, window_bounds = array<i64: 16, 128>}]} {
    %c0 = arith.constant 0 : index
    %c0_0 = arith.constant 0 : index
    %0 = vector.load %arg1[%c0, %c0_0] : memref<16x512xf32, #tpu.memory_space<vmem>>, vector<16x512xf32>
    %1 = arith.truncf %0 : vector<16x512xf32> to vector<16x512xbf16>
    %c0_1 = arith.constant 0 : index
    %c0_2 = arith.constant 0 : index
    %2 = vector.load %arg2[%c0_1, %c0_2] : memref<512x1024xbf16, #tpu.memory_space<vmem>>, vector<512x1024xbf16>
    %cst = arith.constant dense<0.000000e+00> : vector<16x1024xf32>
    %3 = tpu.matmul %1, %2, %cst {dimension_numbers = #tpu.dot_dimension_numbers<[1], [0], [0], [1], [0, 0, 1, 1], [], []>} : vector<16x512xbf16>, vector<512x1024xbf16>, vector<16x1024xf32> -> vector<16x1024xf32>
    %c0_3 = arith.constant 0 : index
    %c0_4 = arith.constant 0 : index
    %4 = vector.load %arg3[%c0_3, %c0_4] : memref<1x1024xf32, #tpu.memory_space<vmem>>, vector<1x1024xf32>
    %5 = vector.broadcast %4 : vector<1x1024xf32> to vector<16x1024xf32>
    %6 = arith.addf %3, %5 : vector<16x1024xf32>
    %cst_5 = arith.constant 0.000000e+00 : f32
    %7 = vector.broadcast %cst_5 : f32 to vector<16x1024xf32>
    %8 = arith.maximumf %6, %7 : vector<16x1024xf32>
    %9 = arith.truncf %8 : vector<16x1024xf32> to vector<16x1024xbf16>
    %c0_6 = arith.constant 0 : index
    %c0_7 = arith.constant 0 : index
    %10 = vector.load %arg4[%c0_6, %c0_7] : memref<1024x128xbf16, #tpu.memory_space<vmem>>, vector<1024x128xbf16>
    %cst_8 = arith.constant dense<0.000000e+00> : vector<16x128xf32>
    %11 = tpu.matmul %9, %10, %cst_8 {dimension_numbers = #tpu.dot_dimension_numbers<[1], [0], [0], [1], [0, 0, 1, 1], [], []>} : vector<16x1024xbf16>, vector<1024x128xbf16>, vector<16x128xf32> -> vector<16x128xf32>
    %c0_9 = arith.constant 0 : index
    %c0_10 = arith.constant 0 : index
    %12 = vector.load %arg5[%c0_9, %c0_10] : memref<1x128xf32, #tpu.memory_space<vmem>>, vector<1x128xf32>
    %13 = vector.broadcast %12 : vector<1x128xf32> to vector<16x128xf32>
    %14 = arith.addf %11, %13 : vector<16x128xf32>
    %c0_11 = arith.constant 0 : index
    %c0_12 = arith.constant 0 : index
    %15 = vector.load %arg6[%c0_11, %c0_12] : memref<16x128xf32, #tpu.memory_space<vmem>>, vector<16x128xf32>
    tpu.vector_store %arg6[%c0_11, %c0_12], %14 {strides = array<i32>} : memref<16x128xf32, #tpu.memory_space<vmem>>, vector<16x128xf32>,
    return
  }
  func.func @transform_0(%arg0: i32) -> (i32, i32) {
    %c0_i32 = arith.constant 0 : i32
    %c0_i32_0 = arith.constant 0 : i32
    return %arg0, %c0_i32 : i32, i32
  }
  func.func @transform_1(%arg0: i32) -> (i32, i32) {
    %c0_i32 = arith.constant 0 : i32
    %c0_i32_0 = arith.constant 0 : i32
    %c0_i32_1 = arith.constant 0 : i32
    return %c0_i32, %c0_i32_0 : i32, i32
  }
  func.func @transform_2(%arg0: i32) -> (i32, i32) {
    %c0_i32 = arith.constant 0 : i32
    %c0_i32_0 = arith.constant 0 : i32
    %c0_i32_1 = arith.constant 0 : i32
    return %c0_i32, %c0_i32_0 : i32, i32
  }
  func.func @transform_3(%arg0: i32) -> (i32, i32) {
    %c0_i32 = arith.constant 0 : i32
    %c0_i32_0 = arith.constant 0 : i32
    %c0_i32_1 = arith.constant 0 : i32
    return %c0_i32, %c0_i32_0 : i32, i32
  }
  func.func @transform_4(%arg0: i32) -> (i32, i32) {
    %c0_i32 = arith.constant 0 : i32
    %c0_i32_0 = arith.constant 0 : i32
    %c0_i32_1 = arith.constant 0 : i32
    return %c0_i32, %c0_i32_0 : i32, i32
  }
  func.func @transform_5(%arg0: i32) -> (i32, i32) {
    %c0_i32 = arith.constant 0 : i32
    %c0_i32_0 = arith.constant 0 : i32
    return %arg0, %c0_i32 : i32, i32
  }
}

</mosaic_0001>

<bundles_post_ra>
// kernel: fno_forward.6
= control target key start
LH: loop header
LB: loop body
LE: loop exit
PB: predicated region body
PF: predicated region fallthrough
CT: control target
= control target key end

     0   :  { %s692_s1 = inlined_call_operand.vmem [shape: bf16[128,512], index: 1, kind: input, shape index: {}]   ;;  %s693_s0 = inlined_call_operand.vmem [shape: f32[16,128], index: 0, kind: input, shape index: {}]   ;;  %s694_s2 = inlined_call_operand.vmem [shape: f32[1,512], index: 2, kind: input, shape index: {}]   ;;  %s695_s3 = inlined_call_operand.vmem [shape: f32[16,512], index: 3, kind: output, shape index: {}]  }
   0x1   :  { %v401_v0 = vld [vmem:[%s692_s1 + $0xe0] sm:$0xf]  ;;  %v445_v1 = vld [vmem:[%s692_s1 + $0xec] sm:$0xf0]  ;;  %v443_v2 = vld [vmem:[%s692_s1 + $0xe4] sm:$0xf] }
   0x2   :  { %v402_v3 = vor.u32 %v445_v1, %v401_v0  ;;  %v403_v4 = vld [vmem:[%s692_s1 + $0xf0] sm:$0xf0]  ;;  %v409_v5 = vld [vmem:[%s692_s1 + $0xe8] sm:$0xf]  ;;  %v446_v6 = vld [vmem:[%s692_s1 + $0xf4] sm:$0xf0] }
   0x3   :  { %v406_v7 = vor.u32 %v443_v2, %v403_v4  ;;  %v410_v8 = vor.u32 %v446_v6, %v409_v5  ;;  %v444_v9 = vld [vmem:[%s692_s1 + $0xec] sm:$0xf]  ;;  %v411_v10 = vld [vmem:[%s692_s1 + $0xf8] sm:$0xf0]  ;;  %v385_v11 = vld [vmem:[%s692_s1 + $0xc0] sm:$0xf] }
   0x4   :  { %219 = vmatpush.bf16.msra.mxu0 %v402_v3  ;;  %v414_v12 = vor.u32 %v444_v9, %v411_v10  ;;  %v441_v13 = vld [vmem:[%s692_s1 + $0xcc] sm:$0xf0]  ;;  %v439_v14 = vld [vmem:[%s692_s1 + $0xc4] sm:$0xf]  ;;  %v387_v15 = vld [vmem:[%s692_s1 + $0xd0] sm:$0xf0] }
   0x5   :  { %233 = vmatpush.bf16.msra.mxu1 %v406_v7  ;;  %247 = vmatpush.bf16.msra.mxu2 %v410_v8  ;;  %v386_v16 = vor.u32 %v441_v13, %v385_v11  ;;  %v390_v17 = vor.u32 %v439_v14, %v387_v15  ;;  %v393_v18 = vld [vmem:[%s692_s1 + $0xc8] sm:$0xf]  ;;  %v442_v19 = vld [vmem:[%s692_s1 + $0xd4] sm:$0xf0]  ;;  %v440_v20 = vld [vmem:[%s692_s1 + $0xcc] sm:$0xf] }
   0x6   :  { %261 = vmatpush.bf16.msra.mxu3 %v414_v12  ;;  %v394_v21 = vor.u32 %v442_v19, %v393_v18  ;;  %v395_v22 = vld [vmem:[%s692_s1 + $0xd8] sm:$0xf0]  ;;  %v369_v23 = vld [vmem:[%s692_s1 + $0xa0] sm:$0xf]  ;;  %v437_v24 = vld [vmem:[%s692_s1 + $0xac] sm:$0xf0] }
   0x7   :  { %v398_v25 = vor.u32 %v440_v20, %v395_v22  ;;  %v435_v26 = vld [vmem:[%s692_s1 + $0xa4] sm:$0xf]  ;;  %v371_v27 = vld [vmem:[%s692_s1 + $0xb0] sm:$0xf0]  ;;  %v377_v28 = vld [vmem:[%s692_s1 + $0xa8] sm:$0xf]  ;;  %v370_v29 = vor.u32 %v437_v24, %v369_v23 }
   0x8   :  { %220 = vmatpush.bf16.msra.mxu0 %v386_v16  ;;  %v438_v30 = vld [vmem:[%s692_s1 + $0xb4] sm:$0xf0]  ;;  %v436_v31 = vld [vmem:[%s692_s1 + $0xac] sm:$0xf]  ;;  %v379_v32 = vld [vmem:[%s692_s1 + $0xb8] sm:$0xf0]  ;;  %v374_v33 = vor.u32 %v435_v26, %v371_v27 }
   0x9   :  { %234 = vmatpush.bf16.msra.mxu1 %v390_v17  ;;  %248 = vmatpush.bf16.msra.mxu2 %v394_v21  ;;  %v378_v34 = vor.u32 %v438_v30, %v377_v28  ;;  %v353_v35 = vld [vmem:[%s692_s1 + $0x80] sm:$0xf]  ;;  %v433_v36 = vld [vmem:[%s692_s1 + $0x8c] sm:$0xf0]  ;;  %v431_v37 = vld [vmem:[%s692_s1 + $0x84] sm:$0xf]  ;;  %v382_v38 = vor.u32 %v436_v31, %v379_v32 }
   0xa   :  { %262 = vmatpush.bf16.msra.mxu3 %v398_v25  ;;  %v355_v39 = vld [vmem:[%s692_s1 + $0x90] sm:$0xf0]  ;;  %v361_v40 = vld [vmem:[%s692_s1 + $0x88] sm:$0xf]  ;;  %v434_v41 = vld [vmem:[%s692_s1 + $0x94] sm:$0xf0]  ;;  %v354_v44 = vor.u32 %v433_v36, %v353_v35 }
   0xb   :  { %v432_v42 = vld [vmem:[%s692_s1 + $0x8c] sm:$0xf]  ;;  %v363_v43 = vld [vmem:[%s692_s1 + $0x98] sm:$0xf0]  ;;  %v358_v45 = vor.u32 %v431_v37, %v355_v39  ;;  %v362_v46 = vor.u32 %v434_v41, %v361_v40  ;;  %v337_v47 = vld [vmem:[%s692_s1 + $0x60] sm:$0xf] }
   0xc   :  { %221 = vmatpush.bf16.msra.mxu0 %v370_v29  ;;  %v429_v48 = vld [vmem:[%s692_s1 + $0x6c] sm:$0xf0]  ;;  %v427_v49 = vld [vmem:[%s692_s1 + $0x64] sm:$0xf]  ;;  %v366_v50 = vor.u32 %v432_v42, %v363_v43  ;;  %v339_v51 = vld [vmem:[%s692_s1 + $0x70] sm:$0xf0] }
   0xd   :  { %235 = vmatpush.bf16.msra.mxu1 %v374_v33  ;;  %249 = vmatpush.bf16.msra.mxu2 %v378_v34  ;;  %v345_v52 = vld [vmem:[%s692_s1 + $0x68] sm:$0xf]  ;;  %v430_v53 = vld [vmem:[%s692_s1 + $0x74] sm:$0xf0]  ;;  %v428_v54 = vld [vmem:[%s692_s1 + $0x6c] sm:$0xf]  ;;  %v338_v56 = vor.u32 %v429_v48, %v337_v47  ;;  %v342_v57 = vor.u32 %v427_v49, %v339_v51 }
   0xe   :  { %263 = vmatpush.bf16.msra.mxu3 %v382_v38  ;;  %v347_v55 = vld [vmem:[%s692_s1 + $0x78] sm:$0xf0]  ;;  %v346_v58 = vor.u32 %v430_v53, %v345_v52  ;;  %v321_v59 = vld [vmem:[%s692_s1 + $0x40] sm:$0xf]  ;;  %v425_v60 = vld [vmem:[%s692_s1 + $0x4c] sm:$0xf0] }
   0xf   :  { %v423_v61 = vld [vmem:[%s692_s1 + $0x44] sm:$0xf]  ;;  %v350_v62 = vor.u32 %v428_v54, %v347_v55  ;;  %v323_v63 = vld [vmem:[%s692_s1 + $0x50] sm:$0xf0]  ;;  %v329_v0 = vld [vmem:[%s692_s1 + $0x48] sm:$0xf]  ;;  %v322_v4 = vor.u32 %v425_v60, %v321_v59 }
  0x10   :  { %222 = vmatpush.bf16.msra.mxu0 %v354_v44  ;;  %v426_v1 = vld [vmem:[%s692_s1 + $0x54] sm:$0xf0]  ;;  %v424_v2 = vld [vmem:[%s692_s1 + $0x4c] sm:$0xf]  ;;  %v331_v3 = vld [vmem:[%s692_s1 + $0x58] sm:$0xf0]  ;;  %v326_v5 = vor.u32 %v423_v61, %v323_v63 }
  0x11   :  { %236 = vmatpush.bf16.msra.mxu1 %v358_v45  ;;  %250 = vmatpush.bf16.msra.mxu2 %v362_v46  ;;  %v330_v6 = vor.u32 %v426_v1, %v329_v0  ;;  %v305_v7 = vld [vmem:[%s692_s1 + $0x20] sm:$0xf]  ;;  %v421_v8 = vld [vmem:[%s692_s1 + $0x2c] sm:$0xf0]  ;;  %v419_v9 = vld [vmem:[%s692_s1 + $0x24] sm:$0xf]  ;;  %v334_v10 = vor.u32 %v424_v2, %v331_v3 }
  0x12   :  { %264 = vmatpush.bf16.msra.mxu3 %v366_v50  ;;  %v307_v11 = vld [vmem:[%s692_s1 + $0x30] sm:$0xf0]  ;;  %v313_v12 = vld [vmem:[%s692_s1 + $0x28] sm:$0xf]  ;;  %v422_v13 = vld [vmem:[%s692_s1 + $0x34] sm:$0xf0]  ;;  %v306_v16 = vor.u32 %v421_v8, %v305_v7 }
  0x13   :  { %v420_v14 = vld [vmem:[%s692_s1 + $0x2c] sm:$0xf]  ;;  %v315_v15 = vld [vmem:[%s692_s1 + $0x38] sm:$0xf0]  ;;  %v310_v17 = vor.u32 %v419_v9, %v307_v11  ;;  %v314_v18 = vor.u32 %v422_v13, %v313_v12  ;;  %v289_v19 = vld [vmem:[%s692_s1] sm:$0xf] }
  0x14   :  { %223 = vmatpush.bf16.msra.mxu0 %v338_v56  ;;  %v417_v20 = vld [vmem:[%s692_s1 + $0xc] sm:$0xf0]  ;;  %v415_v21 = vld [vmem:[%s692_s1 + $0x4] sm:$0xf]  ;;  %v318_v22 = vor.u32 %v420_v14, %v315_v15  ;;  %v291_v23 = vld [vmem:[%s692_s1 + $0x10] sm:$0xf0] }
  0x15   :  { %237 = vmatpush.bf16.msra.mxu1 %v342_v57  ;;  %251 = vmatpush.bf16.msra.mxu2 %v346_v58  ;;  %v297_v24 = vld [vmem:[%s692_s1 + $0x8] sm:$0xf]  ;;  %v418_v25 = vld [vmem:[%s692_s1 + $0x14] sm:$0xf0]  ;;  %v416_v26 = vld [vmem:[%s692_s1 + $0xc] sm:$0xf]  ;;  %v290_v28 = vor.u32 %v417_v20, %v289_v19  ;;  %v294_v31 = vor.u32 %v415_v21, %v291_v23 }
  0x16   :  { %265 = vmatpush.bf16.msra.mxu3 %v350_v62  ;;  %v299_v27 = vld [vmem:[%s692_s1 + $0x18] sm:$0xf0]  ;;  %v14_v29 = vld [vmem:[%s693_s0] sm:$0xff]  ;;  %v15_v30 = vld [vmem:[%s693_s0 + $0x8] sm:$0xff]  ;;  %v298_v32 = vor.u32 %v418_v25, %v297_v24 }
  0x17   :  { %v302_v33 = vor.u32 %v416_v26, %v299_v27  ;;  %v16_v34 = vpack.c.bf16 %v15_v30, %v14_v29  ;;  %v49_v35 = vld [vmem:[%s694_s2] sm:$0xf] }
  0x18   :  { %224 = vmatpush.bf16.msra.mxu0 %v322_v4  ;;  %v51_v36 = vperm.slane %v49_v35, 0  ;;  %v52_v37 = vperm.slane %v49_v35, 1  ;;  %v53_v42 = vperm.slane %v49_v35, 2  ;;  %v54_v43 = vperm.slane %v49_v35, 3 }
  0x19   :  { %238 = vmatpush.bf16.msra.mxu1 %v326_v5  ;;  %252 = vmatpush.bf16.msra.mxu2 %v330_v6 }
  0x1a   :  { %266 = vmatpush.bf16.msra.mxu3 %v334_v10 }
  0x1c   :  { %225 = vmatpush.bf16.msra.mxu0 %v306_v16 }
  0x1d   :  { %239 = vmatpush.bf16.msra.mxu1 %v310_v17  ;;  %253 = vmatpush.bf16.msra.mxu2 %v314_v18 }
  0x1e   :  { %267 = vmatpush.bf16.msra.mxu3 %v318_v22 }
  0x20   :  { %226 = vmatpush.bf16.msra.mxu0 %v290_v28 }
  0x21   :  { %240 = vmatpush.bf16.msra.mxu1 %v294_v31  ;;  %254 = vmatpush.bf16.msra.mxu2 %v298_v32 }
  0x22   :  { %268 = vmatpush.bf16.msra.mxu3 %v302_v33 }
  0x23   :  { %227 = vmatmul.bf16.vlgmr.msra.gmra.mxu0 %v16_v34 }
  0x24   :  { %241 = vmatmul.bf16.vlgmr.msra.gmra.mxu1 %v16_v34  ;;  %255 = vmatmul.bf16.vlgmr.msra.gmra.mxu2 %v16_v34 }
  0x25   :  { %269 = vmatmul.bf16.vlgmr.msra.gmra.mxu3 %v16_v34 }
  0xa0   :  { %v228_v38 = vpop.f32.mrf.mxu0 }
  0xa1   :  { %v229_v39 = vadd.f32 %v228_v38, %v51_v36  ;;  %v242_v40 = vpop.f32.mrf.mxu1 }
  0xa2   :  { %v243_v41 = vadd.f32 %v242_v40, %v52_v37 }
  0xa3   :  { %275 = vst [vmem:[%s695_s3] sm:$0xff] %v229_v39 }
  0xa4   :  { %276 = vst [vmem:[%s695_s3 + $0x8] sm:$0xff] %v243_v41 }
  0xa7   :  { %v256_v44 = vpop.f32.mrf.mxu2 }
  0xa8   :  { %v257_v45 = vadd.f32 %v256_v44, %v53_v42  ;;  %v270_v46 = vpop.f32.mrf.mxu3  ;;  %v230_v47 = vpop.f32.mrf.mxu0 }
  0xa9   :  { %v271_v48 = vadd.f32 %v270_v46, %v54_v43  ;;  %v231_v49 = vadd.f32 %v230_v47, %v51_v36  ;;  %v244_v50 = vpop.f32.mrf.mxu1 }
  0xaa   :  { %277 = vst [vmem:[%s695_s3 + $0x10] sm:$0xff] %v257_v45  ;;  %v245_v51 = vadd.f32 %v244_v50, %v52_v37 }
  0xab   :  { %278 = vst [vmem:[%s695_s3 + $0x18] sm:$0xff] %v271_v48 }
  0xac   :  { %279 = vst [vmem:[%s695_s3 + $0x20] sm:$0xff] %v231_v49 }
  0xad   :  { %280 = vst [vmem:[%s695_s3 + $0x28] sm:$0xff] %v245_v51 }
  0xaf   :  { %v258_v52 = vpop.f32.mrf.mxu2 }
  0xb0   :  { %v259_v53 = vadd.f32 %v258_v52, %v53_v42  ;;  %v272_v54 = vpop.f32.mrf.mxu3 }
  0xb1   :  { %v273_v55 = vadd.f32 %v272_v54, %v54_v43 }
  0xb2   :  { %281 = vst [vmem:[%s695_s3 + $0x30] sm:$0xff] %v259_v53 }
  0xb3   :  { %282 = vst [vmem:[%s695_s3 + $0x38] sm:$0xff] %v273_v55 }

// kernel: reverse.4
= control target key start
LH: loop header
LB: loop body
LE: loop exit
PB: predicated region body
PF: predicated region fallthrough
CT: control target
= control target key end

     0   :  { %s344_s0 = inlined_call_operand.vmem [shape: f32[2,16,16,7], index: 0, kind: input, shape index: {}]   ;;  %s345_s1 = inlined_call_operand.vmem [shape: f32[2,16,16,7], index: 1, kind: output, shape index: {}]  }
   0x1   :  { %v112_v0 = vld [vmem:[%s344_s0 + $0x60] sm:$0xff]  ;;  %v113_v1 = vld [vmem:[%s344_s0 + $0xd0] sm:$0xff]  ;;  %v138_v14 = vld [vmem:[%s344_s0 + $0x68] sm:$0xff] }
   0x2   :  { %v115_v2 = vld [vmem:[%s344_s0 + $0x50] sm:$0xff]  ;;  %4 = vst [vmem:[%s345_s1] sm:$0xff] %v112_v0  ;;  %v117_v3 = vld [vmem:[%s344_s0 + $0xc0] sm:$0xff]  ;;  %v140_v15 = vld [vmem:[%s344_s0 + $0xd8] sm:$0xff] }
   0x3   :  { %114 = vst [vmem:[%s345_s1 + $0x70] sm:$0xff] %v113_v1  ;;  %v119_v4 = vld [vmem:[%s344_s0 + $0x40] sm:$0xff]  ;;  %v121_v5 = vld [vmem:[%s344_s0 + $0xb0] sm:$0xff]  ;;  %v142_v16 = vld [vmem:[%s344_s0 + $0x58] sm:$0xff] }
   0x4   :  { %116 = vst [vmem:[%s345_s1 + $0x10] sm:$0xff] %v115_v2  ;;  %v123_v6 = vld [vmem:[%s344_s0 + $0x30] sm:$0xff]  ;;  %v125_v7 = vld [vmem:[%s344_s0 + $0xa0] sm:$0xff]  ;;  %v144_v17 = vld [vmem:[%s344_s0 + $0xc8] sm:$0xff] }
   0x5   :  { %118 = vst [vmem:[%s345_s1 + $0x80] sm:$0xff] %v117_v3  ;;  %v127_v8 = vld [vmem:[%s344_s0 + $0x20] sm:$0xff]  ;;  %v129_v9 = vld [vmem:[%s344_s0 + $0x90] sm:$0xff]  ;;  %v146_v18 = vld [vmem:[%s344_s0 + $0x48] sm:$0xff] }
   0x6   :  { %120 = vst [vmem:[%s345_s1 + $0x20] sm:$0xff] %v119_v4  ;;  %v131_v10 = vld [vmem:[%s344_s0 + $0x10] sm:$0xff]  ;;  %v133_v11 = vld [vmem:[%s344_s0 + $0x80] sm:$0xff]  ;;  %v148_v19 = vld [vmem:[%s344_s0 + $0xb8] sm:$0xff] }
   0x7   :  { %122 = vst [vmem:[%s345_s1 + $0x90] sm:$0xff] %v121_v5  ;;  %v49_v12 = vld [vmem:[%s344_s0] sm:$0xff]  ;;  %v136_v13 = vld [vmem:[%s344_s0 + $0x70] sm:$0xff]  ;;  %v150_v20 = vld [vmem:[%s344_s0 + $0x38] sm:$0xff] }
   0x8   :  { %124 = vst [vmem:[%s345_s1 + $0x30] sm:$0xff] %v123_v6  ;;  %v152_v21 = vld [vmem:[%s344_s0 + $0xa8] sm:$0xff]  ;;  %v156_v23 = vld [vmem:[%s344_s0 + $0x98] sm:$0xff] }
   0x9   :  { %126 = vst [vmem:[%s345_s1 + $0xa0] sm:$0xff] %v125_v7  ;;  %v154_v22 = vld [vmem:[%s344_s0 + $0x28] sm:$0xff]  ;;  %v158_v24 = vld [vmem:[%s344_s0 + $0x18] sm:$0xff] }
   0xa   :  { %128 = vst [vmem:[%s345_s1 + $0x40] sm:$0xff] %v127_v8  ;;  %v160_v25 = vld [vmem:[%s344_s0 + $0x88] sm:$0xff]  ;;  %v164_v27 = vld [vmem:[%s344_s0 + $0x78] sm:$0xff] }
   0xb   :  { %130 = vst [vmem:[%s345_s1 + $0xb0] sm:$0xff] %v129_v9  ;;  %v162_v26 = vld [vmem:[%s344_s0 + $0x8] sm:$0xff] }
   0xc   :  { %132 = vst [vmem:[%s345_s1 + $0x50] sm:$0xff] %v131_v10 }
   0xd   :  { %134 = vst [vmem:[%s345_s1 + $0xc0] sm:$0xff] %v133_v11 }
   0xe   :  { %135 = vst [vmem:[%s345_s1 + $0x60] sm:$0xff] %v49_v12 }
   0xf   :  { %137 = vst [vmem:[%s345_s1 + $0xd0] sm:$0xff] %v136_v13 }
  0x10   :  { %139 = vst [vmem:[%s345_s1 + $0x8] sm:$0xff] %v138_v14 }
  0x11   :  { %141 = vst [vmem:[%s345_s1 + $0x78] sm:$0xff] %v140_v15 }
  0x12   :  { %143 = vst [vmem:[%s345_s1 + $0x18] sm:$0xff] %v142_v16 }
  0x13   :  { %145 = vst [vmem:[%s345_s1 + $0x88] sm:$0xff] %v144_v17 }
  0x14   :  { %147 = vst [vmem:[%s345_s1 + $0x28] sm:$0xff] %v146_v18 }
  0x15   :  { %149 = vst [vmem:[%s345_s1 + $0x98] sm:$0xff] %v148_v19 }
  0x16   :  { %151 = vst [vmem:[%s345_s1 + $0x38] sm:$0xff] %v150_v20 }
  0x17   :  { %153 = vst [vmem:[%s345_s1 + $0xa8] sm:$0xff] %v152_v21 }
  0x18   :  { %155 = vst [vmem:[%s345_s1 + $0x48] sm:$0xff] %v154_v22 }
  0x19   :  { %157 = vst [vmem:[%s345_s1 + $0xb8] sm:$0xff] %v156_v23 }
  0x1a   :  { %159 = vst [vmem:[%s345_s1 + $0x58] sm:$0xff] %v158_v24 }
  0x1b   :  { %161 = vst [vmem:[%s345_s1 + $0xc8] sm:$0xff] %v160_v25 }
  0x1c   :  { %163 = vst [vmem:[%s345_s1 + $0x68] sm:$0xff] %v162_v26 }
  0x1d   :  { %165 = vst [vmem:[%s345_s1 + $0xd8] sm:$0xff] %v164_v27 }

// kernel: fno_forward.7
= control target key start
LH: loop header
LB: loop body
LE: loop exit
PB: predicated region body
PF: predicated region fallthrough
CT: control target
= control target key end

     0   :  { %vm115_vm0 = vcmask 130048   ;;  %vm1284_vm1 = vcmask 123904   ;;  %s2379_s2 = inlined_call_operand.vmem [shape: f32[16,16,16], index: 2, kind: input, shape index: {}]   ;;  %s2380_s0 = inlined_call_operand.vmem [shape: f32[16,2,16], index: 0, kind: input, shape index: {}]   ;;  %s2381_s3 = inlined_call_operand.vmem [shape: f32[16,16,16], index: 3, kind: input, shape index: {}]   ;;  %s2382_s1 = inlined_call_operand.vmem [shape: f32[16,2,16], index: 1, kind: input, shape index: {}]   ;;  %s2383_s4 = inlined_call_operand.vmem [shape: f32[16,2,16], index: 4, kind: output, shape index: {0}]   ;;  %s2384_s5 = inlined_call_operand.vmem [shape: f32[16,2,16], index: 5, kind: output, shape index: {1}]  }
   0x1   :  { %v1438_v0 = vld [vmem:[%s2379_s2 + $0x8] sm:$0xff]  ;;  %v1443_v1 = vld [vmem:[%s2379_s2 + $0x18] sm:$0xff]  ;;  %v1461_v4 = vld [vmem:[%s2379_s2] sm:$0xff] }
   0x2   :  { %133 = vmatpush.msra.mxu0 %v1438_v0  ;;  %156 = vmatpush.msra.mxu1 %v1443_v1  ;;  %v1450_v2 = vld [vmem:[%s2379_s2 + $0x28] sm:$0xff]  ;;  %v1456_v3 = vld [vmem:[%s2379_s2 + $0x38] sm:$0xff]  ;;  %v1468_v5 = vld [vmem:[%s2379_s2 + $0x10] sm:$0xff] }
   0x3   :  { %179 = vmatpush.msra.mxu2 %v1450_v2  ;;  %202 = vmatpush.msra.mxu3 %v1456_v3  ;;  %v1474_v6 = vld [vmem:[%s2379_s2 + $0x20] sm:$0xff]  ;;  %v1479_v7 = vld [vmem:[%s2379_s2 + $0x30] sm:$0xff]  ;;  %v1514_v12 = vld [vmem:[%s2379_s2 + $0x68] sm:$0xff] }
   0x4   :  { %134 = vmatpush.msra.mxu0 %v1461_v4  ;;  %157 = vmatpush.msra.mxu1 %v1468_v5  ;;  %v1486_v8 = vld [vmem:[%s2380_s0] sm:$0x3]  ;;  %v1493_v9 = vld [vmem:[%s2380_s0 + $0x2] sm:$0x3]  ;;  %v1498_v10 = vld [vmem:[%s2380_s0 + $0x4] sm:$0x3] }
   0x5   :  { %180 = vmatpush.msra.mxu2 %v1474_v6  ;;  %203 = vmatpush.msra.mxu3 %v1479_v7  ;;  %v1507_v11 = vld [vmem:[%s2380_s0 + $0x6] sm:$0x3]  ;;  %v1519_v13 = vld [vmem:[%s2379_s2 + $0x78] sm:$0xff]  ;;  %v1531_v15 = vld [vmem:[%s2379_s2 + $0x70] sm:$0xff] }
   0x6   :  { %1357 = vmatmul.msk.f32.vlgmr.msra.gmra.mxu0 %vm115_vm0, %v1486_v8  ;;  %1358 = vmatmul.msk.f32.vlgmr.msra.gmra.mxu1 %vm115_vm0, %v1493_v9  ;;  %v1526_v14 = vld [vmem:[%s2379_s2 + $0x60] sm:$0xff]  ;;  %v1536_v16 = vld [vmem:[%s2379_s2 + $0x48] sm:$0xff]  ;;  %v1543_v17 = vld [vmem:[%s2379_s2 + $0x58] sm:$0xff] }
   0x7   :  { %1359 = vmatmul.msk.f32.vlgmr.msra.gmra.mxu2 %vm115_vm0, %v1498_v10  ;;  %1360 = vmatmul.msk.f32.vlgmr.msra.gmra.mxu3 %vm115_vm0, %v1507_v11  ;;  %v1550_v18 = vld [vmem:[%s2379_s2 + $0x40] sm:$0xff]  ;;  %v1555_v19 = vld [vmem:[%s2379_s2 + $0x50] sm:$0xff]  ;;  %v1560_v20 = vld [vmem:[%s2380_s0 + $0x8] sm:$0x3] }
   0x8   :  { %271 = vmatpush.msrb.mxu2 %v1514_v12  ;;  %294 = vmatpush.msrb.mxu3 %v1519_v13  ;;  %2417 = vst [vmem:[#allocation2_spill] sm:$0xff] %v1560_v20  ;;  %v1567_v21 = vld [vmem:[%s2380_s0 + $0xa] sm:$0x3]  ;;  %v1572_v22 = vld [vmem:[%s2380_s0 + $0xc] sm:$0x3]  ;;  %v1595_v25 = vld [vmem:[%s2379_s2 + $0xb8] sm:$0xff] }
   0x9   :  { %225 = vmatpush.msrb.mxu0 %v1536_v16  ;;  %248 = vmatpush.msrb.mxu1 %v1543_v17  ;;  %2418 = vst [vmem:[#allocation3_spill] sm:$0xff] %v1567_v21  ;;  %v1581_v23 = vld [vmem:[%s2380_s0 + $0xe] sm:$0x3]  ;;  %v1600_v26 = vld [vmem:[%s2379_s2 + $0xa0] sm:$0xff]  ;;  %v1607_v27 = vld [vmem:[%s2379_s2 + $0xb0] sm:$0xff] }
   0xa   :  { %272 = vmatpush.msrb.mxu2 %v1526_v14  ;;  %295 = vmatpush.msrb.mxu3 %v1531_v15  ;;  %2419 = vst [vmem:[#allocation4_spill] sm:$0xff] %v1572_v22  ;;  %v1590_v24 = vld [vmem:[%s2379_s2 + $0xa8] sm:$0xff]  ;;  %v1617_v29 = vld [vmem:[%s2379_s2 + $0x98] sm:$0xff]  ;;  %v1624_v30 = vld [vmem:[%s2379_s2 + $0x80] sm:$0xff] }
   0xb   :  { %226 = vmatpush.msrb.mxu0 %v1550_v18  ;;  %249 = vmatpush.msrb.mxu1 %v1555_v19  ;;  %2420 = vst [vmem:[#allocation5_spill] sm:$0xff] %v1581_v23  ;;  %v1612_v28 = vld [vmem:[%s2379_s2 + $0x88] sm:$0xff]  ;;  %v1629_v31 = vld [vmem:[%s2379_s2 + $0x90] sm:$0xff]  ;;  %v1658_v36 = vld [vmem:[%s2379_s2 + $0xf8] sm:$0xff] }
   0xc   :  { %363 = vmatpush.msra.mxu2 %v1590_v24  ;;  %386 = vmatpush.msra.mxu3 %v1595_v25  ;;  %v1636_v32 = vld [vmem:[%s2380_s0 + $0x10] sm:$0x3]  ;;  %v1641_v33 = vld [vmem:[%s2380_s0 + $0x12] sm:$0x3]  ;;  %v1648_v34 = vld [vmem:[%s2380_s0 + $0x14] sm:$0x3] }
   0xd   :  { %317 = vmatpush.msra.mxu0 %v1612_v28  ;;  %340 = vmatpush.msra.mxu1 %v1617_v29  ;;  %2421 = vst [vmem:[#allocation6_spill] sm:$0xff] %v1636_v32  ;;  %v1653_v35 = vld [vmem:[%s2379_s2 + $0xe8] sm:$0xff]  ;;  %v1663_v37 = vld [vmem:[%s2380_s0 + $0x16] sm:$0x3]  ;;  %v1675_v39 = vld [vmem:[%s2379_s2 + $0xd8] sm:$0xff] }
   0xe   :  { %1361 = vmatmul.msk.f32.vlgmr.msrb.gmra.mxu0 %vm115_vm0, %v1560_v20  ;;  %1362 = vmatmul.msk.f32.vlgmr.msrb.gmra.mxu1 %vm115_vm0, %v1567_v21  ;;  %2422 = vst [vmem:[#allocation7_spill] sm:$0xff] %v1641_v33  ;;  %v1670_v38 = vld [vmem:[%s2379_s2 + $0xc8] sm:$0xff]  ;;  %v1680_v40 = vld [vmem:[%s2379_s2 + $0xe0] sm:$0xff]  ;;  %v1685_v41 = vld [vmem:[%s2379_s2 + $0xf0] sm:$0xff] }
   0xf   :  { %1363 = vmatmul.msk.f32.vlgmr.msrb.gmra.mxu2 %vm115_vm0, %v1572_v22  ;;  %1364 = vmatmul.msk.f32.vlgmr.msrb.gmra.mxu3 %vm115_vm0, %v1581_v23  ;;  %2423 = vst [vmem:[#allocation8_spill] sm:$0xff] %v1648_v34  ;;  %v1696_v42 = vld [vmem:[%s2379_s2 + $0xc0] sm:$0xff]  ;;  %v1701_v43 = vld [vmem:[%s2379_s2 + $0xd0] sm:$0xff]  ;;  %v1706_v44 = vld [vmem:[%s2381_s3 + $0x28] sm:$0xff] }
  0x10   :  { %364 = vmatpush.msra.mxu2 %v1600_v26  ;;  %387 = vmatpush.msra.mxu3 %v1607_v27  ;;  %2424 = vst [vmem:[#allocation9_spill] sm:$0xff] %v1653_v35  ;;  %v1711_v45 = vld [vmem:[%s2381_s3 + $0x38] sm:$0xff]  ;;  %v1720_v46 = vld [vmem:[%s2381_s3 + $0x8] sm:$0xff]  ;;  %v1732_v48 = vld [vmem:[%s2381_s3 + $0x20] sm:$0xff] }
  0x11   :  { %318 = vmatpush.msra.mxu0 %v1624_v30  ;;  %341 = vmatpush.msra.mxu1 %v1629_v31  ;;  %2425 = vst [vmem:[#allocation10_spill] sm:$0xff] %v1658_v36  ;;  %v1725_v47 = vld [vmem:[%s2381_s3 + $0x18] sm:$0xff]  ;;  %v1737_v49 = vld [vmem:[%s2381_s3 + $0x30] sm:$0xff]  ;;  %v1744_v50 = vld [vmem:[%s2381_s3] sm:$0xff] }
  0x12   :  { %2426 = vst [vmem:[#allocation11_spill] sm:$0xff] %v1663_v37  ;;  %455 = vmatpush.msrb.mxu2 %v1653_v35  ;;  %478 = vmatpush.msrb.mxu3 %v1658_v36  ;;  %v1749_v51 = vld [vmem:[%s2381_s3 + $0x10] sm:$0xff]  ;;  %v1756_v52 = vld [vmem:[%s2380_s0 + $0x18] sm:$0x3]  ;;  %v1761_v53 = vld [vmem:[%s2380_s0 + $0x1a] sm:$0x3] }
  0x13   :  { %2427 = vst [vmem:[#allocation12_spill] sm:$0xff] %v1670_v38  ;;  %409 = vmatpush.msrb.mxu0 %v1670_v38  ;;  %432 = vmatpush.msrb.mxu1 %v1675_v39  ;;  %v1768_v54 = vld [vmem:[%s2380_s0 + $0x1c] sm:$0x3]  ;;  %v1773_v55 = vld [vmem:[%s2380_s0 + $0x1e] sm:$0x3]  ;;  %v1780_v56 = vld [vmem:[%s2381_s3 + $0x68] sm:$0xff] }
  0x14   :  { %2428 = vst [vmem:[#allocation13_spill] sm:$0xff] %v1675_v39  ;;  %456 = vmatpush.msrb.mxu2 %v1680_v40  ;;  %479 = vmatpush.msrb.mxu3 %v1685_v41  ;;  %v1785_v57 = vld [vmem:[%s2381_s3 + $0x78] sm:$0xff]  ;;  %v1792_v58 = vld [vmem:[%s2381_s3 + $0x48] sm:$0xff]  ;;  %v1806_v60 = vld [vmem:[%s2381_s3 + $0x60] sm:$0xff] }
  0x15   :  { %2429 = vst [vmem:[#allocation14_spill] sm:$0xff] %v1680_v40  ;;  %410 = vmatpush.msrb.mxu0 %v1696_v42  ;;  %433 = vmatpush.msrb.mxu1 %v1701_v43  ;;  %v1797_v59 = vld [vmem:[%s2381_s3 + $0x58] sm:$0xff]  ;;  %v1811_v61 = vld [vmem:[%s2381_s3 + $0x70] sm:$0xff]  ;;  %v1820_v62 = vld [vmem:[%s2381_s3 + $0x40] sm:$0xff] }
  0x16   :  { %2430 = vst [vmem:[#allocation15_spill] sm:$0xff] %v1685_v41  ;;  %1365 = vmatmul.msk.f32.vlgmr.msra.gmra.mxu0 %vm115_vm0, %v1636_v32  ;;  %1366 = vmatmul.msk.f32.vlgmr.msra.gmra.mxu1 %vm115_vm0, %v1641_v33  ;;  %v1825_v63 = vld [vmem:[%s2381_s3 + $0x50] sm:$0xff]  ;;  %v1872_v33 = vld [vmem:[%s2381_s3 + $0x88] sm:$0xff]  ;;  %v1877_v32 = vld [vmem:[%s2381_s3 + $0x98] sm:$0xff] }
  0x17   :  { %2431 = vst [vmem:[#allocation16_spill] sm:$0xff] %v1696_v42  ;;  %1367 = vmatmul.msk.f32.vlgmr.msra.gmra.mxu2 %vm115_vm0, %v1648_v34  ;;  %1368 = vmatmul.msk.f32.vlgmr.msra.gmra.mxu3 %vm115_vm0, %v1663_v37  ;;  %v1858_v37 = vld [vmem:[%s2381_s3 + $0xa8] sm:$0xff]  ;;  %v1863_v34 = vld [vmem:[%s2381_s3 + $0xb8] sm:$0xff]  ;;  %v1891_v42 = vld [vmem:[%s2381_s3 + $0xb0] sm:$0xff] }
  0x18   :  { %2432 = vst [vmem:[#allocation17_spill] sm:$0xff] %v1701_v43  ;;  %547 = vmatpush.msra.mxu2 %v1706_v44  ;;  %570 = vmatpush.msra.mxu3 %v1711_v45  ;;  %v1886_v43 = vld [vmem:[%s2381_s3 + $0xa0] sm:$0xff]  ;;  %v1903_v40 = vld [vmem:[%s2381_s3 + $0x90] sm:$0xff]  ;;  %v1912_v39 = vld [vmem:[%s2382_s1 + $0x8] sm:$0x3] }
  0x19   :  { %2433 = vst [vmem:[#allocation18_spill] sm:$0xff] %v1756_v52  ;;  %501 = vmatpush.msra.mxu0 %v1720_v46  ;;  %524 = vmatpush.msra.mxu1 %v1725_v47  ;;  %v1898_v41 = vld [vmem:[%s2381_s3 + $0x80] sm:$0xff]  ;;  %v1917_v38 = vld [vmem:[%s2382_s1 + $0xa] sm:$0x3]  ;;  %v1924_v36 = vld [vmem:[%s2382_s1 + $0xc] sm:$0x3] }
  0x1a   :  { %2434 = vst [vmem:[#allocation19_spill] sm:$0xff] %v1761_v53  ;;  %548 = vmatpush.msra.mxu2 %v1732_v48  ;;  %571 = vmatpush.msra.mxu3 %v1737_v49  ;;  %v1929_v35 = vld [vmem:[%s2382_s1 + $0xe] sm:$0x3]  ;;  %v1939_v22 = vld [vmem:[%s2381_s3 + $0xf8] sm:$0xff] }
  0x1b   :  { %2435 = vst [vmem:[#allocation20_spill] sm:$0xff] %v1768_v54  ;;  %502 = vmatpush.msra.mxu0 %v1744_v50  ;;  %525 = vmatpush.msra.mxu1 %v1749_v51  ;;  %v1934_v23 = vld [vmem:[%s2381_s3 + $0xe8] sm:$0xff]  ;;  %v1953_v20 = vld [vmem:[%s2381_s3 + $0xd8] sm:$0xff] }
  0x1c   :  { %2436 = vst [vmem:[#allocation21_spill] sm:$0xff] %v1773_v55  ;;  %v1948_v21 = vld [vmem:[%s2381_s3 + $0xc8] sm:$0xff] }
  0x1d   :  { %2437 = vst [vmem:[#allocation22_spill] sm:$0xff] %v1912_v39 }
  0x1e   :  { %1369 = vmatmul.msk.f32.vlgmr.msrb.gmra.mxu0 %vm115_vm0, %v1756_v52  ;;  %1370 = vmatmul.msk.f32.vlgmr.msrb.gmra.mxu1 %vm115_vm0, %v1761_v53  ;;  %v1848_v53 = vld [vmem:[%s2382_s1 + $0x4] sm:$0x3]  ;;  %v1853_v52 = vld [vmem:[%s2382_s1 + $0x6] sm:$0x3]  ;;  %2438 = vst [vmem:[#allocation23_spill] sm:$0xff] %v1917_v38 }
  0x1f   :  { %1371 = vmatmul.msk.f32.vlgmr.msrb.gmra.mxu2 %vm115_vm0, %v1768_v54  ;;  %1372 = vmatmul.msk.f32.vlgmr.msrb.gmra.mxu3 %vm115_vm0, %v1773_v55  ;;  %v1836_v55 = vld [vmem:[%s2382_s1] sm:$0x3]  ;;  %v1841_v54 = vld [vmem:[%s2382_s1 + $0x2] sm:$0x3]  ;;  %2439 = vst [vmem:[#allocation24_spill] sm:$0xff] %v1924_v36 }
  0x20   :  { %639 = vmatpush.msrb.mxu2 %v1780_v56  ;;  %662 = vmatpush.msrb.mxu3 %v1785_v57  ;;  %2440 = vst [vmem:[#allocation25_spill] sm:$0xff] %v1929_v35 }
  0x21   :  { %593 = vmatpush.msrb.mxu0 %v1792_v58  ;;  %616 = vmatpush.msrb.mxu1 %v1797_v59  ;;  %2441 = vst [vmem:[#allocation26_spill] sm:$0xff] %v1934_v23 }
  0x22   :  { %640 = vmatpush.msrb.mxu2 %v1806_v60  ;;  %663 = vmatpush.msrb.mxu3 %v1811_v61  ;;  %2442 = vst [vmem:[#allocation27_spill] sm:$0xff] %v1939_v22 }
  0x23   :  { %594 = vmatpush.msrb.mxu0 %v1820_v62  ;;  %617 = vmatpush.msrb.mxu1 %v1825_v63  ;;  %2443 = vst [vmem:[#allocation28_spill] sm:$0xff] %v1948_v21 }
  0x24   :  { %2444 = vst [vmem:[#allocation29_spill] sm:$0xff] %v1953_v20 }
  0x26   :  { %1373 = vmatmul.msk.f32.vlgmr.msra.gmra.mxu0 %vm115_vm0, %v1836_v55  ;;  %1374 = vmatmul.msk.f32.vlgmr.msra.gmra.mxu1 %vm115_vm0, %v1841_v54 }
  0x27   :  { %1375 = vmatmul.msk.f32.vlgmr.msra.gmra.mxu2 %vm115_vm0, %v1848_v53  ;;  %1376 = vmatmul.msk.f32.vlgmr.msra.gmra.mxu3 %vm115_vm0, %v1853_v52 }
  0x28   :  { %731 = vmatpush.msra.mxu2 %v1858_v37  ;;  %754 = vmatpush.msra.mxu3 %v1863_v34 }
  0x29   :  { %685 = vmatpush.msra.mxu0 %v1872_v33  ;;  %708 = vmatpush.msra.mxu1 %v1877_v32 }
  0x2a   :  { %732 = vmatpush.msra.mxu2 %v1886_v43  ;;  %755 = vmatpush.msra.mxu3 %v1891_v42 }
  0x2b   :  { %686 = vmatpush.msra.mxu0 %v1898_v41  ;;  %709 = vmatpush.msra.mxu1 %v1903_v40 }
  0x2e   :  { %1377 = vmatmul.msk.f32.vlgmr.msrb.gmra.mxu0 %vm115_vm0, %v1912_v39  ;;  %1378 = vmatmul.msk.f32.vlgmr.msrb.gmra.mxu1 %vm115_vm0, %v1917_v38  ;;  %v1962_v38 = vld [vmem:[%s2381_s3 + $0xe0] sm:$0xff]  ;;  %v1967_v39 = vld [vmem:[%s2381_s3 + $0xf0] sm:$0xff] }
  0x2f   :  { %1379 = vmatmul.msk.f32.vlgmr.msrb.gmra.mxu2 %vm115_vm0, %v1924_v36  ;;  %1380 = vmatmul.msk.f32.vlgmr.msrb.gmra.mxu3 %vm115_vm0, %v1929_v35  ;;  %2445 = vst [vmem:[#allocation30_spill] sm:$0xff] %v1962_v38  ;;  %v1974_v36 = vld [vmem:[%s2381_s3 + $0xc0] sm:$0xff]  ;;  %v1979_v35 = vld [vmem:[%s2381_s3 + $0xd0] sm:$0xff] }
  0x30   :  { %2446 = vst [vmem:[#allocation31_spill] sm:$0xff] %v1967_v39  ;;  %823 = vmatpush.msrb.mxu2 %v1934_v23  ;;  %846 = vmatpush.msrb.mxu3 %v1939_v22  ;;  %v1988_v22 = vld [vmem:[%s2382_s1 + $0x10] sm:$0x3]  ;;  %v1993_v23 = vld [vmem:[%s2382_s1 + $0x12] sm:$0x3] }
  0x31   :  { %2447 = vst [vmem:[#allocation32_spill] sm:$0xff] %v1974_v36  ;;  %777 = vmatpush.msrb.mxu0 %v1948_v21  ;;  %800 = vmatpush.msrb.mxu1 %v1953_v20  ;;  %v873_v20 = vadd.f32 %v1706_v44, %v1450_v2  ;;  %v2009_v21 = vld [vmem:[%s2382_s1 + $0x16] sm:$0x3]  ;;  %v872_v2 = vadd.f32 %v1732_v48, %v1474_v6  ;;  %v2460_v48 = vld [vmem:[#allocation27_spill] sm:$0xff] }
  0x32   :  { %2448 = vst [vmem:[#allocation33_spill] sm:$0xff] %v1979_v35  ;;  %824 = vmatpush.msrb.mxu2 %v1962_v38  ;;  %847 = vmatpush.msrb.mxu3 %v1967_v39  ;;  %v875_v39 = vadd.f32 %v1711_v45, %v1456_v3  ;;  %v2004_v38 = vld [vmem:[%s2382_s1 + $0x14] sm:$0x3]  ;;  %v874_v3 = vadd.f32 %v1737_v49, %v1479_v7  ;;  %v2048_v7 = vld [vmem:[%s2382_s1 + $0x1c] sm:$0x3] }
  0x33   :  { %778 = vmatpush.msrb.mxu0 %v1974_v36  ;;  %801 = vmatpush.msrb.mxu1 %v1979_v35  ;;  %v869_v36 = vadd.f32 %v1720_v46, %v1438_v0  ;;  %v871_v35 = vadd.f32 %v1725_v47, %v1443_v1  ;;  %v868_v44 = vadd.f32 %v1744_v50, %v1461_v4  ;;  %v2034_v1 = vld [vmem:[%s2382_s1 + $0x18] sm:$0x3]  ;;  %v2039_v4 = vld [vmem:[%s2382_s1 + $0x1a] sm:$0x3]  ;;  %v2459_v47 = vld [vmem:[#allocation10_spill] sm:$0xff] }
  0x34   :  { %v870_v0 = vadd.f32 %v1749_v51, %v1468_v5  ;;  %v881_v5 = vadd.f32 %v1780_v56, %v1514_v12  ;;  %v883_v6 = vadd.f32 %v1785_v57, %v1519_v13  ;;  %v880_v12 = vadd.f32 %v1806_v60, %v1526_v14  ;;  %v2461_v50 = vld [vmem:[#allocation12_spill] sm:$0xff]  ;;  %v2465_v56 = vld [vmem:[#allocation14_spill] sm:$0xff] }
  0x35   :  { %v882_v13 = vadd.f32 %v1811_v61, %v1531_v15  ;;  %v852_v14 = vadd.f32 %v1836_v55, %v1486_v8  ;;  %v853_v15 = vadd.f32 %v1841_v54, %v1493_v9  ;;  %v891_v45 = vadd.f32 %v1863_v34, %v1595_v25  ;;  %v2454_v34 = vld [vmem:[#allocation24_spill] sm:$0xff]  ;;  %v2464_v54 = vld [vmem:[#allocation29_spill] sm:$0xff] }
  0x36   :  { %1381 = vmatmul.msk.f32.vlgmr.msra.gmra.mxu0 %vm115_vm0, %v1988_v22  ;;  %1382 = vmatmul.msk.f32.vlgmr.msra.gmra.mxu1 %vm115_vm0, %v1993_v23  ;;  %v885_v8 = vadd.f32 %v1872_v33, %v1612_v28  ;;  %v887_v9 = vadd.f32 %v1877_v32, %v1617_v29  ;;  %v886_v25 = vadd.f32 %v1903_v40, %v1629_v31  ;;  %v2451_v29 = vld [vmem:[#allocation3_spill] sm:$0xff]  ;;  %v2455_v31 = vld [vmem:[#allocation5_spill] sm:$0xff]  ;;  %v2462_v51 = vld [vmem:[#allocation28_spill] sm:$0xff] }
  0x37   :  { %1383 = vmatmul.msk.f32.vlgmr.msra.gmra.mxu2 %vm115_vm0, %v2004_v38  ;;  %1384 = vmatmul.msk.f32.vlgmr.msra.gmra.mxu3 %vm115_vm0, %v2009_v21  ;;  %v2452_v32 = vld [vmem:[#allocation23_spill] sm:$0xff]  ;;  %v2456_v40 = vld [vmem:[#allocation25_spill] sm:$0xff]  ;;  %v899_v49 = vadd.f32 %v2460_v48, %v2459_v47  ;;  %v2466_v57 = vld [vmem:[#allocation30_spill] sm:$0xff] }
  0x38   :  { %963 = vmatpush.msra.mxu2 %v873_v20  ;;  %986 = vmatpush.msra.mxu3 %v875_v39  ;;  %v2053_v20 = vld [vmem:[%s2382_s1 + $0x1e] sm:$0x3]  ;;  %v876_v39 = vadd.f32 %v1820_v62, %v1550_v18  ;;  %v855_v18 = vadd.f32 %v1853_v52, %v1507_v11  ;;  %v890_v11 = vadd.f32 %v1891_v42, %v1607_v27  ;;  %v2450_v27 = vld [vmem:[#allocation22_spill] sm:$0xff]  ;;  %v2468_v60 = vld [vmem:[#allocation31_spill] sm:$0xff] }
  0x39   :  { %917 = vmatpush.msra.mxu0 %v869_v36  ;;  %940 = vmatpush.msra.mxu1 %v871_v35  ;;  %v877_v35 = vadd.f32 %v1792_v58, %v1536_v16  ;;  %v879_v36 = vadd.f32 %v1797_v59, %v1543_v17  ;;  %v878_v16 = vadd.f32 %v1825_v63, %v1555_v19  ;;  %v2457_v42 = vld [vmem:[#allocation9_spill] sm:$0xff]  ;;  %v2467_v59 = vld [vmem:[#allocation15_spill] sm:$0xff]  ;;  %v2469_v62 = vld [vmem:[#allocation16_spill] sm:$0xff] }
  0x3a   :  { %964 = vmatpush.msra.mxu2 %v872_v2  ;;  %987 = vmatpush.msra.mxu3 %v874_v3  ;;  %v854_v17 = vadd.f32 %v1848_v53, %v1498_v10  ;;  %v889_v19 = vadd.f32 %v1858_v37, %v1590_v24  ;;  %v888_v10 = vadd.f32 %v1886_v43, %v1600_v26  ;;  %v2449_v26 = vld [vmem:[#allocation2_spill] sm:$0xff]  ;;  %v2463_v53 = vld [vmem:[#allocation13_spill] sm:$0xff]  ;;  %v2470_v63 = vld [vmem:[#allocation32_spill] sm:$0xff] }
  0x3b   :  { %918 = vmatpush.msra.mxu0 %v868_v44  ;;  %941 = vmatpush.msra.mxu1 %v870_v0  ;;  %v884_v24 = vadd.f32 %v1898_v41, %v1624_v30  ;;  %v856_v28 = vadd.f32 %v2450_v27, %v2449_v26  ;;  %v857_v33 = vadd.f32 %v2452_v32, %v2451_v29  ;;  %v2453_v30 = vld [vmem:[#allocation4_spill] sm:$0xff]  ;;  %v2458_v43 = vld [vmem:[#allocation26_spill] sm:$0xff]  ;;  %v2471_v3 = vld [vmem:[#allocation17_spill] sm:$0xff] }
  0x3c   :  { %v858_v37 = vadd.f32 %v2454_v34, %v2453_v30  ;;  %v859_v41 = vadd.f32 %v2456_v40, %v2455_v31  ;;  %v897_v46 = vadd.f32 %v2458_v43, %v2457_v42  ;;  %v893_v52 = vadd.f32 %v2462_v51, %v2461_v50  ;;  %v2472_v44 = vld [vmem:[#allocation33_spill] sm:$0xff] }
  0x3d   :  { %v895_v55 = vadd.f32 %v2464_v54, %v2463_v53  ;;  %v896_v58 = vadd.f32 %v2466_v57, %v2465_v56  ;;  %v898_v61 = vadd.f32 %v2468_v60, %v2467_v59  ;;  %v892_v2 = vadd.f32 %v2470_v63, %v2469_v62 }
  0x3e   :  { %1385 = vmatmul.msk.f32.vlgmr.msrb.gmra.mxu0 %vm115_vm0, %v2034_v1  ;;  %1386 = vmatmul.msk.f32.vlgmr.msrb.gmra.mxu1 %vm115_vm0, %v2039_v4  ;;  %v894_v0 = vadd.f32 %v2472_v44, %v2471_v3 }
  0x3f   :  { %1387 = vmatmul.msk.f32.vlgmr.msrb.gmra.mxu2 %vm115_vm0, %v2048_v7  ;;  %1388 = vmatmul.msk.f32.vlgmr.msrb.gmra.mxu3 %vm115_vm0, %v2053_v20 }
  0x40   :  { %1055 = vmatpush.msrb.mxu2 %v881_v5  ;;  %1078 = vmatpush.msrb.mxu3 %v883_v6  ;;  %v2473_v5 = vld [vmem:[#allocation6_spill] sm:$0xff] }
  0x41   :  { %1009 = vmatpush.msrb.mxu0 %v877_v35  ;;  %1032 = vmatpush.msrb.mxu1 %v879_v36  ;;  %v860_v6 = vadd.f32 %v1988_v22, %v2473_v5  ;;  %v2474_v35 = vld [vmem:[#allocation7_spill] sm:$0xff]  ;;  %v2477_v22 = vld [vmem:[#allocation18_spill] sm:$0xff] }
  0x42   :  { %1056 = vmatpush.msrb.mxu2 %v880_v12  ;;  %1079 = vmatpush.msrb.mxu3 %v882_v13  ;;  %v861_v36 = vadd.f32 %v1993_v23, %v2474_v35  ;;  %v2475_v12 = vld [vmem:[#allocation8_spill] sm:$0xff]  ;;  %v864_v23 = vadd.f32 %v2034_v1, %v2477_v22 }
  0x43   :  { %1010 = vmatpush.msrb.mxu0 %v876_v39  ;;  %1033 = vmatpush.msrb.mxu1 %v878_v16  ;;  %v862_v13 = vadd.f32 %v2004_v38, %v2475_v12  ;;  %v2476_v39 = vld [vmem:[#allocation11_spill] sm:$0xff]  ;;  %v2479_v38 = vld [vmem:[#allocation20_spill] sm:$0xff] }
  0x44   :  { %v863_v16 = vadd.f32 %v2009_v21, %v2476_v39  ;;  %v2480_v21 = vld [vmem:[#allocation21_spill] sm:$0xff] }
  0x46   :  { %1389 = vmatmul.msk.f32.vlgmr.msra.gmra.mxu0 %vm115_vm0, %v852_v14  ;;  %1390 = vmatmul.msk.f32.vlgmr.msra.gmra.mxu1 %vm115_vm0, %v853_v15  ;;  %v2478_v14 = vld [vmem:[#allocation19_spill] sm:$0xff] }
  0x47   :  { %1391 = vmatmul.msk.f32.vlgmr.msra.gmra.mxu2 %vm115_vm0, %v854_v17  ;;  %1392 = vmatmul.msk.f32.vlgmr.msra.gmra.mxu3 %vm115_vm0, %v855_v18  ;;  %v865_v15 = vadd.f32 %v2039_v4, %v2478_v14  ;;  %v866_v17 = vadd.f32 %v2048_v7, %v2479_v38  ;;  %v867_v18 = vadd.f32 %v2053_v20, %v2480_v21 }
  0x48   :  { %1147 = vmatpush.msra.mxu2 %v889_v19  ;;  %1170 = vmatpush.msra.mxu3 %v891_v45 }
  0x49   :  { %1101 = vmatpush.msra.mxu0 %v885_v8  ;;  %1124 = vmatpush.msra.mxu1 %v887_v9 }
  0x4a   :  { %1148 = vmatpush.msra.mxu2 %v888_v10  ;;  %1171 = vmatpush.msra.mxu3 %v890_v11 }
  0x4b   :  { %1102 = vmatpush.msra.mxu0 %v884_v24  ;;  %1125 = vmatpush.msra.mxu1 %v886_v25 }
  0x4e   :  { %1393 = vmatmul.msk.f32.vlgmr.msrb.gmra.mxu0 %vm115_vm0, %v856_v28  ;;  %1394 = vmatmul.msk.f32.vlgmr.msrb.gmra.mxu1 %vm115_vm0, %v857_v33 }
  0x4f   :  { %1395 = vmatmul.msk.f32.vlgmr.msrb.gmra.mxu2 %vm115_vm0, %v858_v37  ;;  %1396 = vmatmul.msk.f32.vlgmr.msrb.gmra.mxu3 %vm115_vm0, %v859_v41 }
  0x50   :  { %1239 = vmatpush.msrb.mxu2 %v897_v46  ;;  %1262 = vmatpush.msrb.mxu3 %v899_v49 }
  0x51   :  { %1193 = vmatpush.msrb.mxu0 %v893_v52  ;;  %1216 = vmatpush.msrb.mxu1 %v895_v55 }
  0x52   :  { %1240 = vmatpush.msrb.mxu2 %v896_v58  ;;  %1263 = vmatpush.msrb.mxu3 %v898_v61 }
  0x53   :  { %1194 = vmatpush.msrb.mxu0 %v892_v2  ;;  %1217 = vmatpush.msrb.mxu1 %v894_v0 }
  0x56   :  { %1397 = vmatmul.msk.f32.vlgmr.msra.gmra.mxu0 %vm115_vm0, %v860_v6  ;;  %1398 = vmatmul.msk.f32.vlgmr.msra.gmra.mxu1 %vm115_vm0, %v861_v36 }
  0x57   :  { %1399 = vmatmul.msk.f32.vlgmr.msra.gmra.mxu2 %vm115_vm0, %v862_v13  ;;  %1400 = vmatmul.msk.f32.vlgmr.msra.gmra.mxu3 %vm115_vm0, %v863_v16 }
  0x5e   :  { %1401 = vmatmul.msk.f32.vlgmr.msrb.gmra.mxu0 %vm115_vm0, %v864_v23  ;;  %1402 = vmatmul.msk.f32.vlgmr.msrb.gmra.mxu1 %vm115_vm0, %v865_v15 }
  0x5f   :  { %1403 = vmatmul.msk.f32.vlgmr.msrb.gmra.mxu2 %vm115_vm0, %v866_v17  ;;  %1404 = vmatmul.msk.f32.vlgmr.msrb.gmra.mxu3 %vm115_vm0, %v867_v18 }
  0x83   :  { %v2155_v19 = vpop.f32.mrf.mxu0  ;;  %v2157_v1 = vpop.f32.mrf.mxu1 }
  0x8a   :  { %v2159_v45 = vpop.f32.mrf.mxu2  ;;  %v2161_v4 = vpop.f32.mrf.mxu3 }
  0x8b   :  { %v2163_v7 = vpop.f32.mrf.mxu0  ;;  %v2165_v8 = vpop.f32.mrf.mxu1 }
  0x92   :  { %v2167_v20 = vpop.f32.mrf.mxu2  ;;  %v2169_v9 = vpop.f32.mrf.mxu3 }
  0x93   :  { %v2171_v10 = vpop.f32.mrf.mxu0  ;;  %v2173_v11 = vpop.f32.mrf.mxu1 }
  0x9a   :  { %v2175_v24 = vpop.f32.mrf.mxu2  ;;  %v2177_v25 = vpop.f32.mrf.mxu3 }
  0x9b   :  { %v2179_v26 = vpop.f32.mrf.mxu0  ;;  %v2181_v27 = vpop.f32.mrf.mxu1 }
  0xa2   :  { %v2183_v28 = vpop.f32.mrf.mxu2  ;;  %v2185_v29 = vpop.f32.mrf.mxu3 }
  0xa3   :  { %v504_v32 = vpop.f32.mrf.mxu0  ;;  %v527_v33 = vpop.f32.mrf.mxu1 }
  0xa4   :  { %v1268_v30 = vsub.f32 %v2155_v19, %v504_v32  ;;  %v1269_v34 = vsub.f32 %v2157_v1, %v527_v33 }
  0xa6   :  { %1285 = vst.msk [vmem:[%s2383_s4] sm:$0x3] %vm1284_vm1, %v1268_v30 }
  0xa7   :  { %1286 = vst.msk [vmem:[%s2383_s4 + $0x2] sm:$0x3] %vm1284_vm1, %v1269_v34 }
  0xaa   :  { %v550_v37 = vpop.f32.mrf.mxu2  ;;  %v573_v31 = vpop.f32.mrf.mxu3 }
  0xab   :  { %v1270_v40 = vsub.f32 %v2159_v45, %v550_v37  ;;  %v1271_v41 = vsub.f32 %v2161_v4, %v573_v31  ;;  %v596_v42 = vpop.f32.mrf.mxu0  ;;  %v619_v43 = vpop.f32.mrf.mxu1 }
  0xac   :  { %v1272_v46 = vsub.f32 %v2163_v7, %v596_v42  ;;  %v1273_v47 = vsub.f32 %v2165_v8, %v619_v43 }
  0xad   :  { %1287 = vst.msk [vmem:[%s2383_s4 + $0x4] sm:$0x3] %vm1284_vm1, %v1270_v40 }
  0xae   :  { %1288 = vst.msk [vmem:[%s2383_s4 + $0x6] sm:$0x3] %vm1284_vm1, %v1271_v41 }
  0xaf   :  { %1289 = vst.msk [vmem:[%s2383_s4 + $0x8] sm:$0x3] %vm1284_vm1, %v1272_v46 }
  0xb0   :  { %1290 = vst.msk [vmem:[%s2383_s4 + $0xa] sm:$0x3] %vm1284_vm1, %v1273_v47 }
  0xb2   :  { %v2217_v48 = vpop.f32.mrf.mxu2  ;;  %v2219_v49 = vpop.f32.mrf.mxu3 }
  0xb3   :  { %v1274_v50 = vsub.f32 %v2167_v20, %v2217_v48  ;;  %v1275_v51 = vsub.f32 %v2169_v9, %v2219_v49  ;;  %v688_v52 = vpop.f32.mrf.mxu0  ;;  %v711_v53 = vpop.f32.mrf.mxu1 }
  0xb4   :  { %v1276_v54 = vsub.f32 %v2171_v10, %v688_v52  ;;  %v1277_v55 = vsub.f32 %v2173_v11, %v711_v53 }
  0xb5   :  { %1291 = vst.msk [vmem:[%s2383_s4 + $0xc] sm:$0x3] %vm1284_vm1, %v1274_v50 }
  0xb6   :  { %1292 = vst.msk [vmem:[%s2383_s4 + $0xe] sm:$0x3] %vm1284_vm1, %v1275_v51 }
  0xb7   :  { %1293 = vst.msk [vmem:[%s2383_s4 + $0x10] sm:$0x3] %vm1284_vm1, %v1276_v54 }
  0xb8   :  { %1294 = vst.msk [vmem:[%s2383_s4 + $0x12] sm:$0x3] %vm1284_vm1, %v1277_v55 }
  0xba   :  { %v2243_v56 = vpop.f32.mrf.mxu2  ;;  %v2245_v57 = vpop.f32.mrf.mxu3 }
  0xbb   :  { %v1278_v58 = vsub.f32 %v2175_v24, %v2243_v56  ;;  %v1279_v59 = vsub.f32 %v2177_v25, %v2245_v57  ;;  %v2251_v60 = vpop.f32.mrf.mxu0  ;;  %v2253_v61 = vpop.f32.mrf.mxu1 }
  0xbc   :  { %v1280_v62 = vsub.f32 %v2179_v26, %v2251_v60  ;;  %v1281_v63 = vsub.f32 %v2181_v27, %v2253_v61 }
  0xbd   :  { %1295 = vst.msk [vmem:[%s2383_s4 + $0x14] sm:$0x3] %vm1284_vm1, %v1278_v58 }
  0xbe   :  { %1296 = vst.msk [vmem:[%s2383_s4 + $0x16] sm:$0x3] %vm1284_vm1, %v1279_v59 }
  0xbf   :  { %1297 = vst.msk [vmem:[%s2383_s4 + $0x18] sm:$0x3] %vm1284_vm1, %v1280_v62 }
  0xc0   :  { %1298 = vst.msk [vmem:[%s2383_s4 + $0x1a] sm:$0x3] %vm1284_vm1, %v1281_v63 }
  0xc2   :  { %v2275_v2 = vpop.f32.mrf.mxu2  ;;  %v2277_v3 = vpop.f32.mrf.mxu3 }
  0xc3   :  { %v1282_v44 = vsub.f32 %v2183_v28, %v2275_v2  ;;  %v1283_v0 = vsub.f32 %v2185_v29, %v2277_v3  ;;  %v920_v5 = vpop.f32.mrf.mxu0  ;;  %v943_v6 = vpop.f32.mrf.mxu1 }
  0xc4   :  { %v1301_v35 = vsub.f32 %v920_v5, %v2155_v19  ;;  %v1302_v36 = vsub.f32 %v943_v6, %v2157_v1 }
  0xc5   :  { %1299 = vst.msk [vmem:[%s2383_s4 + $0x1c] sm:$0x3] %vm1284_vm1, %v1282_v44 }
  0xc6   :  { %1300 = vst.msk [vmem:[%s2383_s4 + $0x1e] sm:$0x3] %vm1284_vm1, %v1283_v0  ;;  %v1317_v12 = vsub.f32 %v1301_v35, %v504_v32  ;;  %v1318_v13 = vsub.f32 %v1302_v36, %v527_v33 }
  0xc8   :  { %1333 = vst.msk [vmem:[%s2384_s5] sm:$0x3] %vm1284_vm1, %v1317_v12 }
  0xc9   :  { %1334 = vst.msk [vmem:[%s2384_s5 + $0x2] sm:$0x3] %vm1284_vm1, %v1318_v13 }
  0xca   :  { %v966_v39 = vpop.f32.mrf.mxu2  ;;  %v989_v16 = vpop.f32.mrf.mxu3 }
  0xcb   :  { %v1303_v22 = vsub.f32 %v966_v39, %v2159_v45  ;;  %v1304_v23 = vsub.f32 %v989_v16, %v2161_v4  ;;  %v1012_v14 = vpop.f32.mrf.mxu0  ;;  %v1035_v15 = vpop.f32.mrf.mxu1 }
  0xcc   :  { %v1305_v38 = vsub.f32 %v1012_v14, %v2163_v7  ;;  %v1306_v17 = vsub.f32 %v1035_v15, %v2165_v8 }
  0xcd   :  { %v1319_v21 = vsub.f32 %v1303_v22, %v550_v37  ;;  %v1320_v18 = vsub.f32 %v1304_v23, %v573_v31 }
  0xce   :  { %v1321_v19 = vsub.f32 %v1305_v38, %v596_v42  ;;  %v1322_v1 = vsub.f32 %v1306_v17, %v619_v43 }
  0xcf   :  { %1335 = vst.msk [vmem:[%s2384_s5 + $0x4] sm:$0x3] %vm1284_vm1, %v1319_v21 }
  0xd0   :  { %1336 = vst.msk [vmem:[%s2384_s5 + $0x6] sm:$0x3] %vm1284_vm1, %v1320_v18 }
  0xd1   :  { %1337 = vst.msk [vmem:[%s2384_s5 + $0x8] sm:$0x3] %vm1284_vm1, %v1321_v19 }
  0xd2   :  { %1338 = vst.msk [vmem:[%s2384_s5 + $0xa] sm:$0x3] %vm1284_vm1, %v1322_v1  ;;  %v1058_v45 = vpop.f32.mrf.mxu2  ;;  %v1081_v4 = vpop.f32.mrf.mxu3 }
  0xd3   :  { %v1307_v7 = vsub.f32 %v1058_v45, %v2167_v20  ;;  %v1308_v8 = vsub.f32 %v1081_v4, %v2169_v9  ;;  %v1104_v32 = vpop.f32.mrf.mxu0  ;;  %v1127_v33 = vpop.f32.mrf.mxu1 }
  0xd4   :  { %v1309_v30 = vsub.f32 %v1104_v32, %v2171_v10  ;;  %v1310_v34 = vsub.f32 %v1127_v33, %v2173_v11 }
  0xd5   :  { %v1323_v37 = vsub.f32 %v1307_v7, %v2217_v48  ;;  %v1324_v31 = vsub.f32 %v1308_v8, %v2219_v49 }
  0xd6   :  { %v1325_v40 = vsub.f32 %v1309_v30, %v688_v52  ;;  %v1326_v41 = vsub.f32 %v1310_v34, %v711_v53 }
  0xd7   :  { %1339 = vst.msk [vmem:[%s2384_s5 + $0xc] sm:$0x3] %vm1284_vm1, %v1323_v37 }
  0xd8   :  { %1340 = vst.msk [vmem:[%s2384_s5 + $0xe] sm:$0x3] %vm1284_vm1, %v1324_v31 }
  0xd9   :  { %1341 = vst.msk [vmem:[%s2384_s5 + $0x10] sm:$0x3] %vm1284_vm1, %v1325_v40 }
  0xda   :  { %1342 = vst.msk [vmem:[%s2384_s5 + $0x12] sm:$0x3] %vm1284_vm1, %v1326_v41  ;;  %v1150_v20 = vpop.f32.mrf.mxu2  ;;  %v1173_v9 = vpop.f32.mrf.mxu3 }
  0xdb   :  { %v1311_v10 = vsub.f32 %v1150_v20, %v2175_v24  ;;  %v1312_v11 = vsub.f32 %v1173_v9, %v2177_v25  ;;  %v1196_v42 = vpop.f32.mrf.mxu0  ;;  %v1219_v43 = vpop.f32.mrf.mxu1 }
  0xdc   :  { %v1313_v46 = vsub.f32 %v1196_v42, %v2179_v26  ;;  %v1314_v47 = vsub.f32 %v1219_v43, %v2181_v27 }
  0xdd   :  { %v1327_v48 = vsub.f32 %v1311_v10, %v2243_v56  ;;  %v1328_v49 = vsub.f32 %v1312_v11, %v2245_v57 }
  0xde   :  { %v1329_v50 = vsub.f32 %v1313_v46, %v2251_v60  ;;  %v1330_v51 = vsub.f32 %v1314_v47, %v2253_v61 }
  0xdf   :  { %1343 = vst.msk [vmem:[%s2384_s5 + $0x14] sm:$0x3] %vm1284_vm1, %v1327_v48 }
  0xe0   :  { %1344 = vst.msk [vmem:[%s2384_s5 + $0x16] sm:$0x3] %vm1284_vm1, %v1328_v49 }
  0xe1   :  { %1345 = vst.msk [vmem:[%s2384_s5 + $0x18] sm:$0x3] %vm1284_vm1, %v1329_v50 }
  0xe2   :  { %1346 = vst.msk [vmem:[%s2384_s5 + $0x1a] sm:$0x3] %vm1284_vm1, %v1330_v51  ;;  %v1242_v24 = vpop.f32.mrf.mxu2  ;;  %v1265_v25 = vpop.f32.mrf.mxu3 }
  0xe3   :  { %v1315_v26 = vsub.f32 %v1242_v24, %v2183_v28  ;;  %v1316_v27 = vsub.f32 %v1265_v25, %v2185_v29 }
  0xe5   :  { %v1331_v52 = vsub.f32 %v1315_v26, %v2275_v2  ;;  %v1332_v53 = vsub.f32 %v1316_v27, %v2277_v3 }
  0xe7   :  { %1347 = vst.msk [vmem:[%s2384_s5 + $0x1c] sm:$0x3] %vm1284_vm1, %v1331_v52 }
  0xe8   :  { %1348 = vst.msk [vmem:[%s2384_s5 + $0x1e] sm:$0x3] %vm1284_vm1, %v1332_v53 }

// kernel: fno_forward.8
= control target key start
LH: loop header
LB: loop body
LE: loop exit
PB: predicated region body
PF: predicated region fallthrough
CT: control target
= control target key end

     0   :  { %s791_s2 = inlined_call_operand.vmem [shape: bf16[256,256], index: 2, kind: input, shape index: {}]   ;;  %s792_s0 = inlined_call_operand.vmem [shape: f32[32,256], index: 0, kind: input, shape index: {}]   ;;  %s793_s3 = inlined_call_operand.vmem [shape: f32[1,256], index: 3, kind: input, shape index: {}]   ;;  %s794_s1 = inlined_call_operand.vmem [shape: f32[32,256], index: 1, kind: input, shape index: {}]   ;;  %s795_s4 = inlined_call_operand.vmem [shape: f32[32,256], index: 4, kind: output, shape index: {}]  }
   0x1   :  { %v397_v0 = vld [vmem:[%s791_s2 + $0x70] sm:$0xf]  ;;  %v482_v1 = vld [vmem:[%s791_s2 + $0x74] sm:$0xf0]  ;;  %v481_v5 = vld [vmem:[%s791_s2 + $0x74] sm:$0xf] }
   0x2   :  { %v461_v2 = vld [vmem:[%s791_s2 + $0xf0] sm:$0xf]  ;;  %v398_v3 = vor.u32 %v482_v1, %v397_v0  ;;  %v498_v4 = vld [vmem:[%s791_s2 + $0xf4] sm:$0xf0]  ;;  %v399_v6 = vld [vmem:[%s791_s2 + $0x78] sm:$0xf0] }
   0x3   :  { %v462_v7 = vor.u32 %v498_v4, %v461_v2  ;;  %v402_v8 = vor.u32 %v481_v5, %v399_v6  ;;  %v497_v9 = vld [vmem:[%s791_s2 + $0xf4] sm:$0xf]  ;;  %v463_v10 = vld [vmem:[%s791_s2 + $0xf8] sm:$0xf0]  ;;  %v389_v11 = vld [vmem:[%s791_s2 + $0x60] sm:$0xf] }
   0x4   :  { %227 = vmatpush.bf16.msra.mxu0 %v398_v3  ;;  %v466_v12 = vor.u32 %v497_v9, %v463_v10  ;;  %v480_v13 = vld [vmem:[%s791_s2 + $0x64] sm:$0xf0]  ;;  %v453_v14 = vld [vmem:[%s791_s2 + $0xe0] sm:$0xf]  ;;  %v479_v18 = vld [vmem:[%s791_s2 + $0x64] sm:$0xf] }
   0x5   :  { %v496_v15 = vld [vmem:[%s791_s2 + $0xe4] sm:$0xf0]  ;;  %246 = vmatpush.bf16.msra.mxu1 %v462_v7  ;;  %265 = vmatpush.bf16.msra.mxu2 %v402_v8  ;;  %v390_v16 = vor.u32 %v480_v13, %v389_v11  ;;  %v391_v19 = vld [vmem:[%s791_s2 + $0x68] sm:$0xf0]  ;;  %v495_v20 = vld [vmem:[%s791_s2 + $0xe4] sm:$0xf] }
   0x6   :  { %v454_v17 = vor.u32 %v496_v15, %v453_v14  ;;  %284 = vmatpush.bf16.msra.mxu3 %v466_v12  ;;  %v394_v21 = vor.u32 %v479_v18, %v391_v19  ;;  %v455_v22 = vld [vmem:[%s791_s2 + $0xe8] sm:$0xf0]  ;;  %v381_v23 = vld [vmem:[%s791_s2 + $0x50] sm:$0xf]  ;;  %v478_v24 = vld [vmem:[%s791_s2 + $0x54] sm:$0xf0] }
   0x7   :  { %v458_v25 = vor.u32 %v495_v20, %v455_v22  ;;  %v445_v26 = vld [vmem:[%s791_s2 + $0xd0] sm:$0xf]  ;;  %v494_v27 = vld [vmem:[%s791_s2 + $0xd4] sm:$0xf0]  ;;  %v477_v28 = vld [vmem:[%s791_s2 + $0x54] sm:$0xf]  ;;  %v382_v29 = vor.u32 %v478_v24, %v381_v23 }
   0x8   :  { %228 = vmatpush.bf16.msra.mxu0 %v390_v16  ;;  %v383_v30 = vld [vmem:[%s791_s2 + $0x58] sm:$0xf0]  ;;  %v493_v31 = vld [vmem:[%s791_s2 + $0xd4] sm:$0xf]  ;;  %v446_v33 = vor.u32 %v494_v27, %v445_v26  ;;  %v373_v35 = vld [vmem:[%s791_s2 + $0x40] sm:$0xf] }
   0x9   :  { %v447_v32 = vld [vmem:[%s791_s2 + $0xd8] sm:$0xf0]  ;;  %247 = vmatpush.bf16.msra.mxu1 %v454_v17  ;;  %266 = vmatpush.bf16.msra.mxu2 %v394_v21  ;;  %v386_v34 = vor.u32 %v477_v28, %v383_v30  ;;  %v476_v36 = vld [vmem:[%s791_s2 + $0x44] sm:$0xf0]  ;;  %v437_v37 = vld [vmem:[%s791_s2 + $0xc0] sm:$0xf] }
   0xa   :  { %285 = vmatpush.bf16.msra.mxu3 %v458_v25  ;;  %v450_v38 = vor.u32 %v493_v31, %v447_v32  ;;  %v492_v39 = vld [vmem:[%s791_s2 + $0xc4] sm:$0xf0]  ;;  %v475_v40 = vld [vmem:[%s791_s2 + $0x44] sm:$0xf]  ;;  %v375_v41 = vld [vmem:[%s791_s2 + $0x48] sm:$0xf0]  ;;  %v374_v44 = vor.u32 %v476_v36, %v373_v35 }
   0xb   :  { %v491_v42 = vld [vmem:[%s791_s2 + $0xc4] sm:$0xf]  ;;  %v439_v43 = vld [vmem:[%s791_s2 + $0xc8] sm:$0xf0]  ;;  %v438_v45 = vor.u32 %v492_v39, %v437_v37  ;;  %v378_v46 = vor.u32 %v475_v40, %v375_v41  ;;  %v365_v47 = vld [vmem:[%s791_s2 + $0x30] sm:$0xf] }
   0xc   :  { %229 = vmatpush.bf16.msra.mxu0 %v382_v29  ;;  %v474_v48 = vld [vmem:[%s791_s2 + $0x34] sm:$0xf0]  ;;  %v429_v49 = vld [vmem:[%s791_s2 + $0xb0] sm:$0xf]  ;;  %v442_v50 = vor.u32 %v491_v42, %v439_v43  ;;  %v473_v52 = vld [vmem:[%s791_s2 + $0x34] sm:$0xf] }
   0xd   :  { %248 = vmatpush.bf16.msra.mxu1 %v446_v33  ;;  %267 = vmatpush.bf16.msra.mxu2 %v386_v34  ;;  %v490_v51 = vld [vmem:[%s791_s2 + $0xb4] sm:$0xf0]  ;;  %v367_v53 = vld [vmem:[%s791_s2 + $0x38] sm:$0xf0]  ;;  %v489_v54 = vld [vmem:[%s791_s2 + $0xb4] sm:$0xf]  ;;  %v366_v56 = vor.u32 %v474_v48, %v365_v47 }
   0xe   :  { %286 = vmatpush.bf16.msra.mxu3 %v450_v38  ;;  %v431_v55 = vld [vmem:[%s791_s2 + $0xb8] sm:$0xf0]  ;;  %v430_v57 = vor.u32 %v490_v51, %v429_v49  ;;  %v370_v58 = vor.u32 %v473_v52, %v367_v53  ;;  %v357_v59 = vld [vmem:[%s791_s2 + $0x20] sm:$0xf]  ;;  %v472_v60 = vld [vmem:[%s791_s2 + $0x24] sm:$0xf0] }
   0xf   :  { %v421_v61 = vld [vmem:[%s791_s2 + $0xa0] sm:$0xf]  ;;  %v434_v62 = vor.u32 %v489_v54, %v431_v55  ;;  %v488_v63 = vld [vmem:[%s791_s2 + $0xa4] sm:$0xf0]  ;;  %v471_v0 = vld [vmem:[%s791_s2 + $0x24] sm:$0xf]  ;;  %v358_v4 = vor.u32 %v472_v60, %v357_v59 }
  0x10   :  { %230 = vmatpush.bf16.msra.mxu0 %v374_v44  ;;  %v359_v1 = vld [vmem:[%s791_s2 + $0x28] sm:$0xf0]  ;;  %v487_v2 = vld [vmem:[%s791_s2 + $0xa4] sm:$0xf]  ;;  %v422_v5 = vor.u32 %v488_v63, %v421_v61  ;;  %v349_v7 = vld [vmem:[%s791_s2 + $0x10] sm:$0xf] }
  0x11   :  { %249 = vmatpush.bf16.msra.mxu1 %v438_v45  ;;  %268 = vmatpush.bf16.msra.mxu2 %v378_v46  ;;  %v423_v3 = vld [vmem:[%s791_s2 + $0xa8] sm:$0xf0]  ;;  %v362_v6 = vor.u32 %v471_v0, %v359_v1  ;;  %v470_v8 = vld [vmem:[%s791_s2 + $0x14] sm:$0xf0]  ;;  %v413_v9 = vld [vmem:[%s791_s2 + $0x90] sm:$0xf] }
  0x12   :  { %287 = vmatpush.bf16.msra.mxu3 %v442_v50  ;;  %v426_v10 = vor.u32 %v487_v2, %v423_v3  ;;  %v486_v11 = vld [vmem:[%s791_s2 + $0x94] sm:$0xf0]  ;;  %v469_v12 = vld [vmem:[%s791_s2 + $0x14] sm:$0xf]  ;;  %v351_v13 = vld [vmem:[%s791_s2 + $0x18] sm:$0xf0]  ;;  %v350_v16 = vor.u32 %v470_v8, %v349_v7 }
  0x13   :  { %v485_v14 = vld [vmem:[%s791_s2 + $0x94] sm:$0xf]  ;;  %v415_v15 = vld [vmem:[%s791_s2 + $0x98] sm:$0xf0]  ;;  %v414_v17 = vor.u32 %v486_v11, %v413_v9  ;;  %v354_v18 = vor.u32 %v469_v12, %v351_v13  ;;  %v341_v19 = vld [vmem:[%s791_s2] sm:$0xf] }
  0x14   :  { %231 = vmatpush.bf16.msra.mxu0 %v366_v56  ;;  %v468_v20 = vld [vmem:[%s791_s2 + $0x4] sm:$0xf0]  ;;  %v405_v21 = vld [vmem:[%s791_s2 + $0x80] sm:$0xf]  ;;  %v418_v22 = vor.u32 %v485_v14, %v415_v15  ;;  %v467_v24 = vld [vmem:[%s791_s2 + $0x4] sm:$0xf] }
  0x15   :  { %250 = vmatpush.bf16.msra.mxu1 %v430_v57  ;;  %269 = vmatpush.bf16.msra.mxu2 %v370_v58  ;;  %v484_v23 = vld [vmem:[%s791_s2 + $0x84] sm:$0xf0]  ;;  %v343_v25 = vld [vmem:[%s791_s2 + $0x8] sm:$0xf0]  ;;  %v483_v26 = vld [vmem:[%s791_s2 + $0x84] sm:$0xf]  ;;  %v342_v28 = vor.u32 %v468_v20, %v341_v19 }
  0x16   :  { %288 = vmatpush.bf16.msra.mxu3 %v434_v62  ;;  %v407_v27 = vld [vmem:[%s791_s2 + $0x88] sm:$0xf0]  ;;  %v17_v29 = vld [vmem:[%s792_s0] sm:$0xff]  ;;  %v19_v30 = vld [vmem:[%s792_s0 + $0x10] sm:$0xff]  ;;  %v406_v31 = vor.u32 %v484_v23, %v405_v21  ;;  %v346_v32 = vor.u32 %v467_v24, %v343_v25 }
  0x17   :  { %v18_v33 = vld [vmem:[%s792_s0 + $0x8] sm:$0xff]  ;;  %v20_v34 = vld [vmem:[%s792_s0 + $0x18] sm:$0xff]  ;;  %v410_v35 = vor.u32 %v483_v26, %v407_v27  ;;  %v25_v36 = vpack.c.bf16 %v19_v30, %v17_v29  ;;  %v21_v38 = vld [vmem:[%s792_s0 + $0x20] sm:$0xff] }
  0x18   :  { %232 = vmatpush.bf16.msra.mxu0 %v358_v4  ;;  %v26_v37 = vpack.c.bf16 %v20_v34, %v18_v33  ;;  %v23_v39 = vld [vmem:[%s792_s0 + $0x30] sm:$0xff]  ;;  %v22_v40 = vld [vmem:[%s792_s0 + $0x28] sm:$0xff]  ;;  %v24_v41 = vld [vmem:[%s792_s0 + $0x38] sm:$0xff] }
  0x19   :  { %251 = vmatpush.bf16.msra.mxu1 %v422_v5  ;;  %270 = vmatpush.bf16.msra.mxu2 %v362_v6  ;;  %v27_v42 = vpack.c.bf16 %v23_v39, %v21_v38  ;;  %v28_v43 = vpack.c.bf16 %v24_v41, %v22_v40  ;;  %v61_v44 = vld [vmem:[%s793_s3] sm:$0x3]  ;;  %v304_v58 = vld [vmem:[%s794_s1 + $0x8] sm:$0xff]  ;;  %v305_v62 = vld [vmem:[%s794_s1 + $0x10] sm:$0xff] }
  0x1a   :  { %289 = vmatpush.bf16.msra.mxu3 %v426_v10  ;;  %v63_v45 = vperm.slane %v61_v44, 0  ;;  %v303_v49 = vld [vmem:[%s794_s1] sm:$0xff]  ;;  %v64_v51 = vperm.slane %v61_v44, 1  ;;  %v306_v8 = vld [vmem:[%s794_s1 + $0x18] sm:$0xff]  ;;  %v309_v26 = vld [vmem:[%s794_s1 + $0x30] sm:$0xff] }
  0x1b   :  { %v307_v12 = vld [vmem:[%s794_s1 + $0x20] sm:$0xff] }
  0x1c   :  { %233 = vmatpush.bf16.msra.mxu0 %v350_v16 }
  0x1d   :  { %252 = vmatpush.bf16.msra.mxu1 %v414_v17  ;;  %271 = vmatpush.bf16.msra.mxu2 %v354_v18 }
  0x1e   :  { %290 = vmatpush.bf16.msra.mxu3 %v418_v22  ;;  %v308_v22 = vld [vmem:[%s794_s1 + $0x28] sm:$0xff] }
  0x20   :  { %234 = vmatpush.bf16.msra.mxu0 %v342_v28 }
  0x21   :  { %253 = vmatpush.bf16.msra.mxu1 %v406_v31  ;;  %272 = vmatpush.bf16.msra.mxu2 %v346_v32 }
  0x22   :  { %291 = vmatpush.bf16.msra.mxu3 %v410_v35  ;;  %v310_v35 = vld [vmem:[%s794_s1 + $0x38] sm:$0xff] }
  0x23   :  { %235 = vmatmul.bf16.vlgmr.msra.gmra.mxu0 %v25_v36 }
  0x24   :  { %254 = vmatmul.bf16.vlgmr.msra.gmra.mxu1 %v26_v37  ;;  %273 = vmatmul.bf16.vlgmr.msra.gmra.mxu2 %v25_v36 }
  0x25   :  { %292 = vmatmul.bf16.vlgmr.msra.gmra.mxu3 %v26_v37 }
  0x33   :  { %240 = vmatmul.bf16.gmra.mxu0 %v27_v42 }
  0x34   :  { %259 = vmatmul.bf16.gmra.mxu1 %v28_v43  ;;  %278 = vmatmul.bf16.gmra.mxu2 %v27_v42 }
  0x35   :  { %297 = vmatmul.bf16.gmra.mxu3 %v28_v43 }
  0xa0   :  { %v236_v46 = vpop.f32.mrf.mxu0 }
  0xa1   :  { %v237_v47 = vadd.f32 %v236_v46, %v63_v45  ;;  %v255_v48 = vpop.f32.mrf.mxu1 }
  0xa3   :  { %v256_v50 = vadd.f32 %v255_v48, %v237_v47 }
  0xa5   :  { %v311_v52 = vadd.f32 %v303_v49, %v256_v50 }
  0xa7   :  { %v319_v53 = vmax.f32 %v311_v52, 0.0  ;;  %v274_v54 = vpop.f32.mrf.mxu2 }
  0xa8   :  { %v275_v55 = vadd.f32 %v274_v54, %v64_v51  ;;  %v293_v56 = vpop.f32.mrf.mxu3  ;;  %v238_v57 = vpop.f32.mrf.mxu0 }
  0xa9   :  { %327 = vst [vmem:[%s795_s4] sm:$0xff] %v319_v53  ;;  %v239_v59 = vadd.f32 %v238_v57, %v63_v45  ;;  %v257_v60 = vpop.f32.mrf.mxu1 }
  0xaa   :  { %v294_v61 = vadd.f32 %v293_v56, %v275_v55 }
  0xab   :  { %v258_v63 = vadd.f32 %v257_v60, %v239_v59 }
  0xac   :  { %v312_v0 = vadd.f32 %v304_v58, %v294_v61 }
  0xad   :  { %v313_v1 = vadd.f32 %v305_v62, %v258_v63 }
  0xae   :  { %v320_v2 = vmax.f32 %v312_v0, 0.0 }
  0xaf   :  { %v321_v3 = vmax.f32 %v313_v1, 0.0  ;;  %v276_v4 = vpop.f32.mrf.mxu2 }
  0xb0   :  { %328 = vst [vmem:[%s795_s4 + $0x8] sm:$0xff] %v320_v2  ;;  %v277_v5 = vadd.f32 %v276_v4, %v64_v51  ;;  %v295_v6 = vpop.f32.mrf.mxu3  ;;  %v241_v7 = vpop.f32.mrf.mxu0 }
  0xb1   :  { %329 = vst [vmem:[%s795_s4 + $0x10] sm:$0xff] %v321_v3  ;;  %v242_v9 = vadd.f32 %v241_v7, %v63_v45  ;;  %v260_v10 = vpop.f32.mrf.mxu1 }
  0xb2   :  { %v296_v11 = vadd.f32 %v295_v6, %v277_v5 }
  0xb3   :  { %v261_v13 = vadd.f32 %v260_v10, %v242_v9 }
  0xb4   :  { %v314_v14 = vadd.f32 %v306_v8, %v296_v11 }
  0xb5   :  { %v315_v15 = vadd.f32 %v307_v12, %v261_v13 }
  0xb6   :  { %v322_v16 = vmax.f32 %v314_v14, 0.0 }
  0xb7   :  { %v323_v17 = vmax.f32 %v315_v15, 0.0  ;;  %v279_v18 = vpop.f32.mrf.mxu2 }
  0xb8   :  { %330 = vst [vmem:[%s795_s4 + $0x18] sm:$0xff] %v322_v16  ;;  %v280_v19 = vadd.f32 %v279_v18, %v64_v51  ;;  %v298_v20 = vpop.f32.mrf.mxu3  ;;  %v243_v21 = vpop.f32.mrf.mxu0 }
  0xb9   :  { %331 = vst [vmem:[%s795_s4 + $0x20] sm:$0xff] %v323_v17  ;;  %v244_v23 = vadd.f32 %v243_v21, %v63_v45  ;;  %v262_v25 = vpop.f32.mrf.mxu1 }
  0xba   :  { %v299_v24 = vadd.f32 %v298_v20, %v280_v19 }
  0xbb   :  { %v263_v27 = vadd.f32 %v262_v25, %v244_v23 }
  0xbc   :  { %v316_v28 = vadd.f32 %v308_v22, %v299_v24 }
  0xbd   :  { %v317_v29 = vadd.f32 %v309_v26, %v263_v27 }
  0xbe   :  { %v324_v30 = vmax.f32 %v316_v28, 0.0 }
  0xbf   :  { %v325_v31 = vmax.f32 %v317_v29, 0.0  ;;  %v281_v32 = vpop.f32.mrf.mxu2 }
  0xc0   :  { %332 = vst [vmem:[%s795_s4 + $0x28] sm:$0xff] %v324_v30  ;;  %v282_v33 = vadd.f32 %v281_v32, %v64_v51  ;;  %v300_v34 = vpop.f32.mrf.mxu3 }
  0xc1   :  { %333 = vst [vmem:[%s795_s4 + $0x30] sm:$0xff] %v325_v31 }
  0xc2   :  { %v301_v36 = vadd.f32 %v300_v34, %v282_v33 }
  0xc4   :  { %v318_v37 = vadd.f32 %v310_v35, %v301_v36 }
  0xc6   :  { %v326_v38 = vmax.f32 %v318_v37, 0.0 }
  0xc8   :  { %334 = vst [vmem:[%s795_s4 + $0x38] sm:$0xff] %v326_v38 }

// kernel: fno_forward.11
= control target key start
LH: loop header
LB: loop body
LE: loop exit
PB: predicated region body
PF: predicated region fallthrough
CT: control target
= control target key end

     0   :  { %s6203_s1 = inlined_call_operand.vmem [shape: bf16[512,1024], index: 1, kind: input, shape index: {}]   ;;  %s6204_s0 = inlined_call_operand.vmem [shape: f32[16,512], index: 0, kind: input, shape index: {}]   ;;  %s6205_s3 = inlined_call_operand.vmem [shape: bf16[1024,128], index: 3, kind: input, shape index: {}]   ;;  %s6206_s2 = inlined_call_operand.vmem [shape: f32[1,1024], index: 2, kind: input, shape index: {}]   ;;  %s6207_s4 = inlined_call_operand.vmem [shape: f32[1,128], index: 4, kind: input, shape index: {}]   ;;  %s6208_s5 = inlined_call_operand.vmem [shape: f32[16,128], index: 5, kind: output, shape index: {}]  }
   0x1   :  { %v2918_v0 = vld [vmem:[%s6203_s1 + $0x1c0] sm:$0xf] }
   0x2   :  { %v4032_v1 = vld [vmem:[%s6203_s1 + $0x1dc] sm:$0xf0] }
   0x3   :  { %v3174_v2 = vld [vmem:[%s6203_s1 + $0x3c0] sm:$0xf]  ;;  %v2919_v3 = vor.u32 %v4032_v1, %v2918_v0 }
   0x4   :  { %v4096_v4 = vld [vmem:[%s6203_s1 + $0x3dc] sm:$0xf0] }
   0x5   :  { %v3430_v5 = vld [vmem:[%s6203_s1 + $0x5c0] sm:$0xf]  ;;  %v3175_v7 = vor.u32 %v4096_v4, %v3174_v2  ;;  %1586 = vmatpush.bf16.msra.mxu0 %v2919_v3 }
   0x6   :  { %v4160_v6 = vld [vmem:[%s6203_s1 + $0x5dc] sm:$0xf0] }
   0x7   :  { %v3431_v8 = vor.u32 %v4160_v6, %v3430_v5  ;;  %v3686_v9 = vld [vmem:[%s6203_s1 + $0x7c0] sm:$0xf]  ;;  %1600 = vmatpush.bf16.msra.mxu1 %v3175_v7 }
   0x8   :  { %v4224_v10 = vld [vmem:[%s6203_s1 + $0x7dc] sm:$0xf0] }
   0x9   :  { %v2886_v11 = vld [vmem:[%s6203_s1 + $0x180] sm:$0xf]  ;;  %v3687_v12 = vor.u32 %v4224_v10, %v3686_v9  ;;  %1614 = vmatpush.bf16.msra.mxu2 %v3431_v8 }
   0xa   :  { %v4024_v13 = vld [vmem:[%s6203_s1 + $0x19c] sm:$0xf0] }
   0xb   :  { %v3142_v14 = vld [vmem:[%s6203_s1 + $0x380] sm:$0xf]  ;;  %v2887_v16 = vor.u32 %v4024_v13, %v2886_v11  ;;  %1628 = vmatpush.bf16.msra.mxu3 %v3687_v12 }
   0xc   :  { %v4088_v15 = vld [vmem:[%s6203_s1 + $0x39c] sm:$0xf0] }
   0xd   :  { %v3143_v17 = vor.u32 %v4088_v15, %v3142_v14  ;;  %v3398_v18 = vld [vmem:[%s6203_s1 + $0x580] sm:$0xf]  ;;  %1587 = vmatpush.bf16.msra.mxu0 %v2887_v16 }
   0xe   :  { %v4152_v19 = vld [vmem:[%s6203_s1 + $0x59c] sm:$0xf0] }
   0xf   :  { %v3654_v20 = vld [vmem:[%s6203_s1 + $0x780] sm:$0xf]  ;;  %v3399_v21 = vor.u32 %v4152_v19, %v3398_v18  ;;  %1601 = vmatpush.bf16.msra.mxu1 %v3143_v17 }
  0x10   :  { %v4216_v22 = vld [vmem:[%s6203_s1 + $0x79c] sm:$0xf0] }
  0x11   :  { %v2854_v23 = vld [vmem:[%s6203_s1 + $0x140] sm:$0xf]  ;;  %v3655_v25 = vor.u32 %v4216_v22, %v3654_v20  ;;  %1615 = vmatpush.bf16.msra.mxu2 %v3399_v21 }
  0x12   :  { %v4016_v24 = vld [vmem:[%s6203_s1 + $0x15c] sm:$0xf0] }
  0x13   :  { %v3110_v26 = vld [vmem:[%s6203_s1 + $0x340] sm:$0xf]  ;;  %v2855_v29 = vor.u32 %v4016_v24, %v2854_v23  ;;  %1629 = vmatpush.bf16.msra.mxu3 %v3655_v25 }
  0x14   :  { %v4080_v27 = vld [vmem:[%s6203_s1 + $0x35c] sm:$0xf0] }
  0x15   :  { %v3366_v28 = vld [vmem:[%s6203_s1 + $0x540] sm:$0xf]  ;;  %v3111_v33 = vor.u32 %v4080_v27, %v3110_v26  ;;  %1588 = vmatpush.bf16.msra.mxu0 %v2855_v29  ;;  %v2920_v29 = vld [vmem:[%s6203_s1 + $0x1e0] sm:$0xf0] }
  0x16   :  { %v4144_v30 = vld [vmem:[%s6203_s1 + $0x55c] sm:$0xf0] }
  0x17   :  { %v3622_v31 = vld [vmem:[%s6203_s1 + $0x740] sm:$0xf]  ;;  %v3367_v34 = vor.u32 %v4144_v30, %v3366_v28  ;;  %1602 = vmatpush.bf16.msra.mxu1 %v3111_v33  ;;  %v4028_v28 = vld [vmem:[%s6203_s1 + $0x1c4] sm:$0xf] }
  0x18   :  { %v4208_v32 = vld [vmem:[%s6203_s1 + $0x75c] sm:$0xf0]  ;;  %v4092_v30 = vld [vmem:[%s6203_s1 + $0x3c4] sm:$0xf] }
  0x19   :  { %v2822_v35 = vld [vmem:[%s6203_s1 + $0x100] sm:$0xf]  ;;  %v3623_v38 = vor.u32 %v4208_v32, %v3622_v31  ;;  %1616 = vmatpush.bf16.msra.mxu2 %v3367_v34  ;;  %v3176_v32 = vld [vmem:[%s6203_s1 + $0x3e0] sm:$0xf0] }
  0x1a   :  { %v4008_v36 = vld [vmem:[%s6203_s1 + $0x11c] sm:$0xf0]  ;;  %v4156_v33 = vld [vmem:[%s6203_s1 + $0x5c4] sm:$0xf] }
  0x1b   :  { %v3078_v37 = vld [vmem:[%s6203_s1 + $0x300] sm:$0xf]  ;;  %v2823_v44 = vor.u32 %v4008_v36, %v2822_v35  ;;  %1630 = vmatpush.bf16.msra.mxu3 %v3623_v38  ;;  %v3432_v34 = vld [vmem:[%s6203_s1 + $0x5e0] sm:$0xf0] }
  0x1c   :  { %v4072_v39 = vld [vmem:[%s6203_s1 + $0x31c] sm:$0xf0]  ;;  %v3688_v38 = vld [vmem:[%s6203_s1 + $0x7e0] sm:$0xf0] }
  0x1d   :  { %v3334_v40 = vld [vmem:[%s6203_s1 + $0x500] sm:$0xf]  ;;  %v3079_v45 = vor.u32 %v4072_v39, %v3078_v37  ;;  %1589 = vmatpush.bf16.msra.mxu0 %v2823_v44  ;;  %v4220_v37 = vld [vmem:[%s6203_s1 + $0x7c4] sm:$0xf] }
  0x1e   :  { %v4136_v41 = vld [vmem:[%s6203_s1 + $0x51c] sm:$0xf0]  ;;  %v2888_v44 = vld [vmem:[%s6203_s1 + $0x1a0] sm:$0xf0] }
  0x1f   :  { %v3590_v42 = vld [vmem:[%s6203_s1 + $0x700] sm:$0xf]  ;;  %v3335_v46 = vor.u32 %v4136_v41, %v3334_v40  ;;  %1603 = vmatpush.bf16.msra.mxu1 %v3079_v45  ;;  %v2923_v40 = vor.u32 %v4028_v28, %v2920_v29  ;;  %v3179_v41 = vor.u32 %v4092_v30, %v3176_v32  ;;  %v4084_v45 = vld [vmem:[%s6203_s1 + $0x384] sm:$0xf]  ;;  %v25_v28 = vld [vmem:[%s6204_s0 + $0x28] sm:$0xff] }
  0x20   :  { %v4200_v43 = vld [vmem:[%s6203_s1 + $0x71c] sm:$0xf0]  ;;  %v3048_v30 = vld [vmem:[%s6203_s1 + $0x2e0] sm:$0xf0] }
  0x21   :  { %v2790_v47 = vld [vmem:[%s6203_s1 + $0xc0] sm:$0xf]  ;;  %v3591_v50 = vor.u32 %v4200_v43, %v3590_v42  ;;  %1617 = vmatpush.bf16.msra.mxu2 %v3335_v46  ;;  %v3435_v42 = vor.u32 %v4156_v33, %v3432_v34  ;;  %v4020_v43 = vld [vmem:[%s6203_s1 + $0x184] sm:$0xf]  ;;  %v3691_v46 = vor.u32 %v4220_v37, %v3688_v38 }
  0x22   :  { %v4000_v48 = vld [vmem:[%s6203_s1 + $0xdc] sm:$0xf0]  ;;  %v3304_v32 = vld [vmem:[%s6203_s1 + $0x4e0] sm:$0xf0] }
  0x23   :  { %v3046_v49 = vld [vmem:[%s6203_s1 + $0x2c0] sm:$0xf]  ;;  %v2791_v56 = vor.u32 %v4000_v48, %v2790_v47  ;;  %1631 = vmatpush.bf16.msra.mxu3 %v3591_v50  ;;  %v3144_v47 = vld [vmem:[%s6203_s1 + $0x3a0] sm:$0xf0] }
  0x24   :  { %v4064_v51 = vld [vmem:[%s6203_s1 + $0x2dc] sm:$0xf0]  ;;  %v4148_v48 = vld [vmem:[%s6203_s1 + $0x584] sm:$0xf] }
  0x25   :  { %v3302_v52 = vld [vmem:[%s6203_s1 + $0x4c0] sm:$0xf]  ;;  %v3047_v57 = vor.u32 %v4064_v51, %v3046_v49  ;;  %1590 = vmatpush.bf16.msra.mxu0 %v2791_v56  ;;  %v3400_v49 = vld [vmem:[%s6203_s1 + $0x5a0] sm:$0xf0] }
  0x26   :  { %v4128_v53 = vld [vmem:[%s6203_s1 + $0x4dc] sm:$0xf0]  ;;  %v4212_v50 = vld [vmem:[%s6203_s1 + $0x784] sm:$0xf] }
  0x27   :  { %v3558_v54 = vld [vmem:[%s6203_s1 + $0x6c0] sm:$0xf]  ;;  %v3303_v58 = vor.u32 %v4128_v53, %v3302_v52  ;;  %1604 = vmatpush.bf16.msra.mxu1 %v3047_v57  ;;  %v3656_v51 = vld [vmem:[%s6203_s1 + $0x7a0] sm:$0xf0]  ;;  %v2891_v52 = vor.u32 %v4020_v43, %v2888_v44 }
  0x28   :  { %v4192_v55 = vld [vmem:[%s6203_s1 + $0x6dc] sm:$0xf0]  ;;  %v4012_v53 = vld [vmem:[%s6203_s1 + $0x144] sm:$0xf] }
  0x29   :  { %v2758_v59 = vld [vmem:[%s6203_s1 + $0x80] sm:$0xf]  ;;  %v3559_v62 = vor.u32 %v4192_v55, %v3558_v54  ;;  %1618 = vmatpush.bf16.msra.mxu2 %v3303_v58  ;;  %v3147_v54 = vor.u32 %v4084_v45, %v3144_v47  ;;  %v3403_v55 = vor.u32 %v4148_v48, %v3400_v49  ;;  %v2856_v56 = vld [vmem:[%s6203_s1 + $0x160] sm:$0xf0] }
  0x2a   :  { %v3992_v60 = vld [vmem:[%s6203_s1 + $0x9c] sm:$0xf0]  ;;  %v4076_v57 = vld [vmem:[%s6203_s1 + $0x344] sm:$0xf] }
  0x2b   :  { %v3014_v61 = vld [vmem:[%s6203_s1 + $0x280] sm:$0xf]  ;;  %v2759_v4 = vor.u32 %v3992_v60, %v2758_v59  ;;  %1632 = vmatpush.bf16.msra.mxu3 %v3559_v62  ;;  %v3112_v58 = vld [vmem:[%s6203_s1 + $0x360] sm:$0xf0]  ;;  %v3659_v59 = vor.u32 %v4212_v50, %v3656_v51 }
  0x2c   :  { %v4056_v63 = vld [vmem:[%s6203_s1 + $0x29c] sm:$0xf0]  ;;  %v4140_v60 = vld [vmem:[%s6203_s1 + $0x544] sm:$0xf] }
  0x2d   :  { %v3270_v0 = vld [vmem:[%s6203_s1 + $0x480] sm:$0xf]  ;;  %v3015_v5 = vor.u32 %v4056_v63, %v3014_v61  ;;  %1591 = vmatpush.bf16.msra.mxu0 %v2759_v4  ;;  %v3368_v61 = vld [vmem:[%s6203_s1 + $0x560] sm:$0xf0] }
  0x2e   :  { %v4120_v1 = vld [vmem:[%s6203_s1 + $0x49c] sm:$0xf0]  ;;  %v4204_v62 = vld [vmem:[%s6203_s1 + $0x744] sm:$0xf] }
  0x2f   :  { %v3526_v2 = vld [vmem:[%s6203_s1 + $0x680] sm:$0xf]  ;;  %v3271_v6 = vor.u32 %v4120_v1, %v3270_v0  ;;  %1605 = vmatpush.bf16.msra.mxu1 %v3015_v5  ;;  %v3624_v63 = vld [vmem:[%s6203_s1 + $0x760] sm:$0xf0]  ;;  %v22_v5 = vld [vmem:[%s6204_s0 + $0x10] sm:$0xff] }
  0x30   :  { %v4184_v3 = vld [vmem:[%s6203_s1 + $0x69c] sm:$0xf0]  ;;  %v4004_v0 = vld [vmem:[%s6203_s1 + $0x104] sm:$0xf] }
  0x31   :  { %v2726_v7 = vld [vmem:[%s6203_s1 + $0x40] sm:$0xf]  ;;  %v3527_v10 = vor.u32 %v4184_v3, %v3526_v2  ;;  %1619 = vmatpush.bf16.msra.mxu2 %v3271_v6  ;;  %v2824_v1 = vld [vmem:[%s6203_s1 + $0x120] sm:$0xf0]  ;;  %v2859_v2 = vor.u32 %v4012_v53, %v2856_v56  ;;  %v26_v6 = vld [vmem:[%s6204_s0 + $0x30] sm:$0xff] }
  0x32   :  { %v3984_v8 = vld [vmem:[%s6203_s1 + $0x5c] sm:$0xf0]  ;;  %v4068_v3 = vld [vmem:[%s6203_s1 + $0x304] sm:$0xf] }
  0x33   :  { %v2982_v9 = vld [vmem:[%s6203_s1 + $0x240] sm:$0xf]  ;;  %v2727_v16 = vor.u32 %v3984_v8, %v2726_v7  ;;  %1633 = vmatpush.bf16.msra.mxu3 %v3527_v10  ;;  %v3080_v4 = vld [vmem:[%s6203_s1 + $0x320] sm:$0xf0]  ;;  %v3115_v7 = vor.u32 %v4076_v57, %v3112_v58  ;;  %v3371_v8 = vor.u32 %v4140_v60, %v3368_v61 }
  0x34   :  { %v4048_v11 = vld [vmem:[%s6203_s1 + $0x25c] sm:$0xf0]  ;;  %v4188_v34 = vld [vmem:[%s6203_s1 + $0x6c4] sm:$0xf] }
  0x35   :  { %v3238_v12 = vld [vmem:[%s6203_s1 + $0x440] sm:$0xf]  ;;  %v2983_v19 = vor.u32 %v4048_v11, %v2982_v9  ;;  %1592 = vmatpush.bf16.msra.mxu0 %v2727_v16  ;;  %v4605_v9 = vpack.c.bf16 %v26_v6, %v22_v5  ;;  %v3016_v43 = vld [vmem:[%s6203_s1 + $0x2a0] sm:$0xf0] }
  0x36   :  { %v4112_v13 = vld [vmem:[%s6203_s1 + $0x45c] sm:$0xf0]  ;;  %v4116_v44 = vld [vmem:[%s6203_s1 + $0x484] sm:$0xf] }
  0x37   :  { %v3494_v14 = vld [vmem:[%s6203_s1 + $0x640] sm:$0xf]  ;;  %v3239_v20 = vor.u32 %v4112_v13, %v3238_v12  ;;  %1606 = vmatpush.bf16.msra.mxu1 %v2983_v19  ;;  %v23_v12 = vld [vmem:[%s6204_s0 + $0x18] sm:$0xff]  ;;  %v3627_v13 = vor.u32 %v4204_v62, %v3624_v63  ;;  %v3592_v19 = vld [vmem:[%s6203_s1 + $0x720] sm:$0xf0] }
  0x38   :  { %v4176_v15 = vld [vmem:[%s6203_s1 + $0x65c] sm:$0xf0]  ;;  %v3272_v45 = vld [vmem:[%s6203_s1 + $0x4a0] sm:$0xf0] }
  0x39   :  { %v2694_v17 = vld [vmem:[%s6203_s1] sm:$0xf]  ;;  %v3495_v24 = vor.u32 %v4176_v15, %v3494_v14  ;;  %1620 = vmatpush.bf16.msra.mxu2 %v3239_v20  ;;  %v4132_v14 = vld [vmem:[%s6203_s1 + $0x504] sm:$0xf]  ;;  %v3275_v50 = vor.u32 %v4116_v44, %v3272_v45  ;;  %v3374_v44 = vld [vmem:[%s6203_s1 + $0x548] sm:$0xf] }
  0x3a   :  { %v3976_v18 = vld [vmem:[%s6203_s1 + $0x1c] sm:$0xf0]  ;;  %v3336_v15 = vld [vmem:[%s6203_s1 + $0x520] sm:$0xf0]  ;;  %v4145_v45 = vld [vmem:[%s6203_s1 + $0x564] sm:$0xf0] }
  0x3b   :  { %v2950_v21 = vld [vmem:[%s6203_s1 + $0x200] sm:$0xf]  ;;  %v2695_v31 = vor.u32 %v3976_v18, %v2694_v17  ;;  %1634 = vmatpush.bf16.msra.mxu3 %v3495_v24  ;;  %v27_v17 = vld [vmem:[%s6204_s0 + $0x38] sm:$0xff]  ;;  %v4196_v18 = vld [vmem:[%s6203_s1 + $0x704] sm:$0xf]  ;;  %v3083_v24 = vor.u32 %v4068_v3, %v3080_v4 }
  0x3c   :  { %v4040_v22 = vld [vmem:[%s6203_s1 + $0x21c] sm:$0xf0]  ;;  %v4634_v20 = vpack.c.bf16 %v27_v17, %v23_v12  ;;  %v3595_v29 = vor.u32 %v4196_v18, %v3592_v19  ;;  %v3528_v47 = vld [vmem:[%s6203_s1 + $0x6a0] sm:$0xf0]  ;;  %v3694_v19 = vld [vmem:[%s6203_s1 + $0x7c8] sm:$0xf] }
  0x3d   :  { %v3206_v23 = vld [vmem:[%s6203_s1 + $0x400] sm:$0xf]  ;;  %v2951_v35 = vor.u32 %v4040_v22, %v2950_v21  ;;  %1593 = vmatpush.bf16.msra.mxu0 %v2695_v31  ;;  %v2827_v21 = vor.u32 %v4004_v0, %v2824_v1  ;;  %v3996_v22 = vld [vmem:[%s6203_s1 + $0xc4] sm:$0xf] }
  0x3e   :  { %v4104_v25 = vld [vmem:[%s6203_s1 + $0x41c] sm:$0xf0]  ;;  %v4124_v31 = vld [vmem:[%s6203_s1 + $0x4c4] sm:$0xf] }
  0x3f   :  { %v3462_v26 = vld [vmem:[%s6203_s1 + $0x600] sm:$0xf]  ;;  %v3207_v36 = vor.u32 %v4104_v25, %v3206_v23  ;;  %1607 = vmatpush.bf16.msra.mxu1 %v2951_v35  ;;  %v2792_v23 = vld [vmem:[%s6203_s1 + $0xe0] sm:$0xf0]  ;;  %v3339_v25 = vor.u32 %v4132_v14, %v3336_v15  ;;  %v3307_v38 = vor.u32 %v4124_v31, %v3304_v32  ;;  %v3438_v14 = vld [vmem:[%s6203_s1 + $0x5c8] sm:$0xf] }
  0x40   :  { %v4168_v27 = vld [vmem:[%s6203_s1 + $0x61c] sm:$0xf0]  ;;  %v3560_v35 = vld [vmem:[%s6203_s1 + $0x6e0] sm:$0xf0]  ;;  %v4161_v15 = vld [vmem:[%s6203_s1 + $0x5e4] sm:$0xf0] }
  0x41   :  { %v3463_v39 = vor.u32 %v4168_v27, %v3462_v26  ;;  %1621 = vmatpush.bf16.msra.mxu2 %v3207_v36  ;;  %1642 = vmatpush.bf16.msrb.mxu0 %v2923_v40  ;;  %v20_v10 = vld [vmem:[%s6204_s0] sm:$0xff]  ;;  %v21_v27 = vld [vmem:[%s6204_s0 + $0x8] sm:$0xff]  ;;  %v2795_v36 = vor.u32 %v3996_v22, %v2792_v23 }
  0x42   :  { %v24_v11 = vld [vmem:[%s6204_s0 + $0x20] sm:$0xff]  ;;  %v4661_v33 = vpack.c.bf16 %v25_v28, %v21_v27  ;;  %v4025_v27 = vld [vmem:[%s6203_s1 + $0x1a4] sm:$0xf0] }
  0x43   :  { %1635 = vmatpush.bf16.msra.mxu3 %v3463_v39  ;;  %1656 = vmatpush.bf16.msrb.mxu1 %v3179_v41  ;;  %v4622_v16 = vpack.c.bf16 %v24_v11, %v20_v10  ;;  %v4060_v26 = vld [vmem:[%s6203_s1 + $0x2c4] sm:$0xf]  ;;  %v4033_v10 = vld [vmem:[%s6203_s1 + $0x1e4] sm:$0xf0] }
  0x44   :  { %1622 = vmatmul.bf16.vlgmr.msra.gmra.mxu2 %v4605_v9  ;;  %1608 = vmatmul.bf16.vlgmr.msra.gmra.mxu1 %v4661_v33  ;;  %v3051_v37 = vor.u32 %v4060_v26, %v3048_v30  ;;  %v3988_v39 = vld [vmem:[%s6203_s1 + $0x84] sm:$0xf]  ;;  %v3182_v11 = vld [vmem:[%s6203_s1 + $0x3c8] sm:$0xf] }
  0x45   :  { %1670 = vmatpush.bf16.msrb.mxu2 %v3435_v42  ;;  %1643 = vmatpush.bf16.msrb.mxu0 %v2891_v52  ;;  %v2760_v40 = vld [vmem:[%s6203_s1 + $0xa0] sm:$0xf0]  ;;  %v3563_v42 = vor.u32 %v4188_v34, %v3560_v35  ;;  %v2894_v26 = vld [vmem:[%s6203_s1 + $0x188] sm:$0xf] }
  0x46   :  { %1594 = vmatmul.bf16.vlgmr.msra.gmra.mxu0 %v4622_v16  ;;  %1636 = vmatmul.bf16.vlgmr.msra.gmra.mxu3 %v4634_v20  ;;  %v4052_v41 = vld [vmem:[%s6203_s1 + $0x284] sm:$0xf]  ;;  %v2763_v48 = vor.u32 %v3988_v39, %v2760_v40  ;;  %v3150_v28 = vld [vmem:[%s6203_s1 + $0x388] sm:$0xf] }
  0x47   :  { %1684 = vmatpush.bf16.msrb.mxu3 %v3691_v46  ;;  %1657 = vmatpush.bf16.msrb.mxu1 %v3147_v54  ;;  %v4180_v46 = vld [vmem:[%s6203_s1 + $0x684] sm:$0xf]  ;;  %v3019_v49 = vor.u32 %v4052_v41, %v3016_v43  ;;  %v4089_v30 = vld [vmem:[%s6203_s1 + $0x3a4] sm:$0xf0] }
  0x48   :  { %v3980_v51 = vld [vmem:[%s6203_s1 + $0x44] sm:$0xf]  ;;  %v3531_v54 = vor.u32 %v4180_v46, %v3528_v47  ;;  %v3406_v31 = vld [vmem:[%s6203_s1 + $0x588] sm:$0xf] }
  0x49   :  { %1671 = vmatpush.bf16.msrb.mxu2 %v3403_v55  ;;  %1644 = vmatpush.bf16.msrb.mxu0 %v2859_v2  ;;  %v2728_v52 = vld [vmem:[%s6203_s1 + $0x60] sm:$0xf0]  ;;  %v4153_v32 = vld [vmem:[%s6203_s1 + $0x5a4] sm:$0xf0] }
  0x4a   :  { %v4044_v53 = vld [vmem:[%s6203_s1 + $0x244] sm:$0xf]  ;;  %v2731_v60 = vor.u32 %v3980_v51, %v2728_v52  ;;  %v3662_v34 = vld [vmem:[%s6203_s1 + $0x788] sm:$0xf] }
  0x4b   :  { %1685 = vmatpush.bf16.msrb.mxu3 %v3659_v59  ;;  %1658 = vmatpush.bf16.msrb.mxu1 %v3115_v7  ;;  %v2984_v55 = vld [vmem:[%s6203_s1 + $0x260] sm:$0xf0]  ;;  %v4217_v35 = vld [vmem:[%s6203_s1 + $0x7a4] sm:$0xf0] }
  0x4c   :  { %v4108_v56 = vld [vmem:[%s6203_s1 + $0x444] sm:$0xf]  ;;  %v2987_v63 = vor.u32 %v4044_v53, %v2984_v55  ;;  %v2862_v39 = vld [vmem:[%s6203_s1 + $0x148] sm:$0xf] }
  0x4d   :  { %1672 = vmatpush.bf16.msrb.mxu2 %v3371_v8  ;;  %1645 = vmatpush.bf16.msrb.mxu0 %v2827_v21  ;;  %v3240_v57 = vld [vmem:[%s6203_s1 + $0x460] sm:$0xf0]  ;;  %v2926_v8 = vld [vmem:[%s6203_s1 + $0x1c8] sm:$0xf] }
  0x4e   :  { %v4172_v58 = vld [vmem:[%s6203_s1 + $0x644] sm:$0xf]  ;;  %v3243_v0 = vor.u32 %v4108_v56, %v3240_v57  ;;  %v4225_v21 = vld [vmem:[%s6203_s1 + $0x7e4] sm:$0xf0]  ;;  %v2927_v23 = vor.u32 %v4033_v10, %v2926_v8 }
  0x4f   :  { %1686 = vmatpush.bf16.msrb.mxu3 %v3627_v13  ;;  %1659 = vmatpush.bf16.msrb.mxu1 %v3083_v24  ;;  %v3496_v59 = vld [vmem:[%s6203_s1 + $0x660] sm:$0xf0]  ;;  %v4097_v13 = vld [vmem:[%s6203_s1 + $0x3e4] sm:$0xf0] }
  0x50   :  { %v3972_v61 = vld [vmem:[%s6203_s1 + $0x4] sm:$0xf]  ;;  %v3499_v4 = vor.u32 %v4172_v58, %v3496_v59  ;;  %v3183_v24 = vor.u32 %v4097_v13, %v3182_v11  ;;  %v4017_v40 = vld [vmem:[%s6203_s1 + $0x164] sm:$0xf0] }
  0x51   :  { %1673 = vmatpush.bf16.msrb.mxu2 %v3339_v25  ;;  %1646 = vmatpush.bf16.msrb.mxu0 %v2795_v36  ;;  %v2696_v62 = vld [vmem:[%s6203_s1 + $0x20] sm:$0xf0]  ;;  %v3439_v25 = vor.u32 %v4161_v15, %v3438_v14  ;;  %v2895_v36 = vor.u32 %v4025_v27, %v2894_v26  ;;  %v3118_v41 = vld [vmem:[%s6203_s1 + $0x348] sm:$0xf] }
  0x52   :  { %v4036_v1 = vld [vmem:[%s6203_s1 + $0x204] sm:$0xf]  ;;  %v2699_v12 = vor.u32 %v3972_v61, %v2696_v62  ;;  %v4081_v43 = vld [vmem:[%s6203_s1 + $0x364] sm:$0xf0] }
  0x53   :  { %1687 = vmatpush.bf16.msrb.mxu3 %v3595_v29  ;;  %1660 = vmatpush.bf16.msrb.mxu1 %v3051_v37  ;;  %v2952_v2 = vld [vmem:[%s6203_s1 + $0x220] sm:$0xf0]  ;;  %v3695_v29 = vor.u32 %v4225_v21, %v3694_v19  ;;  %v3151_v37 = vor.u32 %v4089_v30, %v3150_v28  ;;  %v3630_v46 = vld [vmem:[%s6203_s1 + $0x748] sm:$0xf] }
  0x54   :  { %v4100_v3 = vld [vmem:[%s6203_s1 + $0x404] sm:$0xf]  ;;  %v2955_v17 = vor.u32 %v4036_v1, %v2952_v2  ;;  %v4209_v47 = vld [vmem:[%s6203_s1 + $0x764] sm:$0xf0] }
  0x55   :  { %1674 = vmatpush.bf16.msrb.mxu2 %v3307_v38  ;;  %1647 = vmatpush.bf16.msrb.mxu0 %v2763_v48  ;;  %v3208_v5 = vld [vmem:[%s6203_s1 + $0x420] sm:$0xf0]  ;;  %v3407_v38 = vor.u32 %v4153_v32, %v3406_v31  ;;  %v2863_v48 = vor.u32 %v4017_v40, %v2862_v39  ;;  %v2830_v51 = vld [vmem:[%s6203_s1 + $0x108] sm:$0xf] }
  0x56   :  { %v4164_v6 = vld [vmem:[%s6203_s1 + $0x604] sm:$0xf]  ;;  %v3211_v18 = vor.u32 %v4100_v3, %v3208_v5  ;;  %v4009_v52 = vld [vmem:[%s6203_s1 + $0x124] sm:$0xf0] }
  0x57   :  { %1688 = vmatpush.bf16.msrb.mxu3 %v3563_v42  ;;  %1661 = vmatpush.bf16.msrb.mxu1 %v3019_v49  ;;  %v3464_v7 = vld [vmem:[%s6203_s1 + $0x620] sm:$0xf0]  ;;  %v3663_v42 = vor.u32 %v4217_v35, %v3662_v34  ;;  %v3119_v49 = vor.u32 %v4081_v43, %v3118_v41  ;;  %v3086_v53 = vld [vmem:[%s6203_s1 + $0x308] sm:$0xf] }
  0x58   :  { %v3467_v22 = vor.u32 %v4164_v6, %v3464_v7  ;;  %v4073_v55 = vld [vmem:[%s6203_s1 + $0x324] sm:$0xf0] }
  0x59   :  { %1675 = vmatpush.bf16.msrb.mxu2 %v3275_v50  ;;  %1648 = vmatpush.bf16.msrb.mxu0 %v2731_v60  ;;  %v3375_v50 = vor.u32 %v4145_v45, %v3374_v44  ;;  %v3342_v56 = vld [vmem:[%s6203_s1 + $0x508] sm:$0xf]  ;;  %v2831_v60 = vor.u32 %v4009_v52, %v2830_v51  ;;  %v3087_v61 = vor.u32 %v4073_v55, %v3086_v53  ;;  %v3184_v52 = vld [vmem:[%s6203_s1 + $0x3e8] sm:$0xf0] }
  0x5a   :  { %v4137_v57 = vld [vmem:[%s6203_s1 + $0x524] sm:$0xf0]  ;;  %v4157_v53 = vld [vmem:[%s6203_s1 + $0x5cc] sm:$0xf] }
  0x5b   :  { %1689 = vmatpush.bf16.msrb.mxu3 %v3531_v54  ;;  %1662 = vmatpush.bf16.msrb.mxu1 %v2987_v63  ;;  %v3631_v54 = vor.u32 %v4209_v47, %v3630_v46  ;;  %v3598_v58 = vld [vmem:[%s6203_s1 + $0x708] sm:$0xf]  ;;  %v3343_v62 = vor.u32 %v4137_v57, %v3342_v56  ;;  %v4221_v57 = vld [vmem:[%s6203_s1 + $0x7cc] sm:$0xf] }
  0x5c   :  { %v4201_v59 = vld [vmem:[%s6203_s1 + $0x724] sm:$0xf0] }
  0x5d   :  { %1676 = vmatpush.bf16.msrb.mxu2 %v3243_v0  ;;  %1649 = vmatpush.bf16.msrb.mxu0 %v2699_v12  ;;  %v2798_v63 = vld [vmem:[%s6203_s1 + $0xc8] sm:$0xf]  ;;  %v3599_v2 = vor.u32 %v4201_v59, %v3598_v58  ;;  %v3696_v58 = vld [vmem:[%s6203_s1 + $0x7e8] sm:$0xf0] }
  0x5e   :  { %v4001_v0 = vld [vmem:[%s6203_s1 + $0xe4] sm:$0xf0] }
  0x5f   :  { %1690 = vmatpush.bf16.msrb.mxu3 %v3499_v4  ;;  %1663 = vmatpush.bf16.msrb.mxu1 %v2955_v17  ;;  %v3054_v1 = vld [vmem:[%s6203_s1 + $0x2c8] sm:$0xf]  ;;  %v2799_v8 = vor.u32 %v4001_v0, %v2798_v63  ;;  %v4021_v63 = vld [vmem:[%s6203_s1 + $0x18c] sm:$0xf] }
  0x60   :  { %1650 = vmatmul.bf16.vlgmr.msrb.gmra.mxu0 %v4622_v16  ;;  %v4065_v3 = vld [vmem:[%s6203_s1 + $0x2e4] sm:$0xf0]  ;;  %v2896_v0 = vld [vmem:[%s6203_s1 + $0x1a8] sm:$0xf0] }
  0x61   :  { %1677 = vmatpush.bf16.msrb.mxu2 %v3211_v18  ;;  %1698 = vmatpush.bf16.msra.mxu0 %v2927_v23  ;;  %v3310_v4 = vld [vmem:[%s6203_s1 + $0x4c8] sm:$0xf]  ;;  %v3055_v10 = vor.u32 %v4065_v3, %v3054_v1  ;;  %v4085_v1 = vld [vmem:[%s6203_s1 + $0x38c] sm:$0xf] }
  0x62   :  { %1664 = vmatmul.bf16.vlgmr.msrb.gmra.mxu1 %v4661_v33  ;;  %v4129_v5 = vld [vmem:[%s6203_s1 + $0x4e4] sm:$0xf0]  ;;  %v3152_v3 = vld [vmem:[%s6203_s1 + $0x3a8] sm:$0xf0] }
  0x63   :  { %1691 = vmatpush.bf16.msrb.mxu3 %v3467_v22  ;;  %1712 = vmatpush.bf16.msra.mxu1 %v3183_v24  ;;  %v3566_v6 = vld [vmem:[%s6203_s1 + $0x6c8] sm:$0xf]  ;;  %v3311_v11 = vor.u32 %v4129_v5, %v3310_v4  ;;  %v4149_v4 = vld [vmem:[%s6203_s1 + $0x58c] sm:$0xf] }
  0x64   :  { %1678 = vmatmul.bf16.vlgmr.msrb.gmra.mxu2 %v4605_v9  ;;  %v4193_v7 = vld [vmem:[%s6203_s1 + $0x6e4] sm:$0xf0]  ;;  %v3408_v5 = vld [vmem:[%s6203_s1 + $0x5a8] sm:$0xf0] }
  0x65   :  { %1726 = vmatpush.bf16.msra.mxu2 %v3439_v25  ;;  %1699 = vmatpush.bf16.msra.mxu0 %v2895_v36  ;;  %v2766_v12 = vld [vmem:[%s6203_s1 + $0x88] sm:$0xf]  ;;  %v3567_v15 = vor.u32 %v4193_v7, %v3566_v6  ;;  %v4213_v6 = vld [vmem:[%s6203_s1 + $0x78c] sm:$0xf] }
  0x66   :  { %1692 = vmatmul.bf16.vlgmr.msrb.gmra.mxu3 %v4634_v20  ;;  %v3993_v13 = vld [vmem:[%s6203_s1 + $0xa4] sm:$0xf0]  ;;  %v3664_v7 = vld [vmem:[%s6203_s1 + $0x7a8] sm:$0xf0] }
  0x67   :  { %1740 = vmatpush.bf16.msra.mxu3 %v3695_v29  ;;  %1713 = vmatpush.bf16.msra.mxu1 %v3151_v37  ;;  %v3022_v14 = vld [vmem:[%s6203_s1 + $0x288] sm:$0xf]  ;;  %v2767_v23 = vor.u32 %v3993_v13, %v2766_v12  ;;  %v4013_v12 = vld [vmem:[%s6203_s1 + $0x14c] sm:$0xf] }
  0x68   :  { %v4057_v17 = vld [vmem:[%s6203_s1 + $0x2a4] sm:$0xf0]  ;;  %v2864_v13 = vld [vmem:[%s6203_s1 + $0x168] sm:$0xf0] }
  0x69   :  { %1727 = vmatpush.bf16.msra.mxu2 %v3407_v38  ;;  %1700 = vmatpush.bf16.msra.mxu0 %v2863_v48  ;;  %v3278_v18 = vld [vmem:[%s6203_s1 + $0x488] sm:$0xf]  ;;  %v3023_v24 = vor.u32 %v4057_v17, %v3022_v14  ;;  %v4029_v48 = vld [vmem:[%s6203_s1 + $0x1cc] sm:$0xf] }
  0x6a   :  { %v4121_v19 = vld [vmem:[%s6203_s1 + $0x4a4] sm:$0xf0]  ;;  %v4077_v14 = vld [vmem:[%s6203_s1 + $0x34c] sm:$0xf] }
  0x6b   :  { %1741 = vmatpush.bf16.msra.mxu3 %v3663_v42  ;;  %1714 = vmatpush.bf16.msra.mxu1 %v3119_v49  ;;  %v3534_v21 = vld [vmem:[%s6203_s1 + $0x688] sm:$0xf]  ;;  %v3279_v25 = vor.u32 %v4121_v19, %v3278_v18  ;;  %v2928_v49 = vld [vmem:[%s6203_s1 + $0x1e8] sm:$0xf0] }
  0x6c   :  { %v4185_v22 = vld [vmem:[%s6203_s1 + $0x6a4] sm:$0xf0]  ;;  %v3120_v17 = vld [vmem:[%s6203_s1 + $0x368] sm:$0xf0] }
  0x6d   :  { %1728 = vmatpush.bf16.msra.mxu2 %v3375_v50  ;;  %1701 = vmatpush.bf16.msra.mxu0 %v2831_v60  ;;  %v2734_v26 = vld [vmem:[%s6203_s1 + $0x48] sm:$0xf]  ;;  %v3535_v29 = vor.u32 %v4185_v22, %v3534_v21  ;;  %v4093_v50 = vld [vmem:[%s6203_s1 + $0x3cc] sm:$0xf]  ;;  %v2931_v60 = vor.u32 %v4029_v48, %v2928_v49 }
  0x6e   :  { %v3985_v27 = vld [vmem:[%s6203_s1 + $0x64] sm:$0xf0]  ;;  %v4141_v18 = vld [vmem:[%s6203_s1 + $0x54c] sm:$0xf] }
  0x6f   :  { %1742 = vmatpush.bf16.msra.mxu3 %v3631_v54  ;;  %1715 = vmatpush.bf16.msra.mxu1 %v3087_v61  ;;  %v2990_v28 = vld [vmem:[%s6203_s1 + $0x248] sm:$0xf]  ;;  %v2735_v36 = vor.u32 %v3985_v27, %v2734_v26  ;;  %v3440_v54 = vld [vmem:[%s6203_s1 + $0x5e8] sm:$0xf0]  ;;  %v3187_v61 = vor.u32 %v4093_v50, %v3184_v52 }
  0x70   :  { %v4049_v30 = vld [vmem:[%s6203_s1 + $0x264] sm:$0xf0]  ;;  %v3376_v19 = vld [vmem:[%s6203_s1 + $0x568] sm:$0xf0] }
  0x71   :  { %1729 = vmatpush.bf16.msra.mxu2 %v3343_v62  ;;  %1702 = vmatpush.bf16.msra.mxu0 %v2799_v8  ;;  %v3246_v31 = vld [vmem:[%s6203_s1 + $0x448] sm:$0xf]  ;;  %v2991_v39 = vor.u32 %v4049_v30, %v2990_v28  ;;  %v3443_v62 = vor.u32 %v4157_v53, %v3440_v54  ;;  %v2899_v8 = vor.u32 %v4021_v63, %v2896_v0  ;;  %v4205_v21 = vld [vmem:[%s6203_s1 + $0x74c] sm:$0xf] }
  0x72   :  { %v4113_v32 = vld [vmem:[%s6203_s1 + $0x464] sm:$0xf0]  ;;  %v3632_v22 = vld [vmem:[%s6203_s1 + $0x768] sm:$0xf0] }
  0x73   :  { %1743 = vmatpush.bf16.msra.mxu3 %v3599_v2  ;;  %1716 = vmatpush.bf16.msra.mxu1 %v3055_v10  ;;  %v3502_v34 = vld [vmem:[%s6203_s1 + $0x648] sm:$0xf]  ;;  %v3247_v40 = vor.u32 %v4113_v32, %v3246_v31  ;;  %v3699_v2 = vor.u32 %v4221_v57, %v3696_v58  ;;  %v3155_v10 = vor.u32 %v4085_v1, %v3152_v3  ;;  %v4005_v26 = vld [vmem:[%s6203_s1 + $0x10c] sm:$0xf] }
  0x74   :  { %v4177_v35 = vld [vmem:[%s6203_s1 + $0x664] sm:$0xf0]  ;;  %v2832_v27 = vld [vmem:[%s6203_s1 + $0x128] sm:$0xf0] }
  0x75   :  { %1730 = vmatpush.bf16.msra.mxu2 %v3311_v11  ;;  %1703 = vmatpush.bf16.msra.mxu0 %v2767_v23  ;;  %v2702_v37 = vld [vmem:[%s6203_s1 + $0x8] sm:$0xf]  ;;  %v3503_v44 = vor.u32 %v4177_v35, %v3502_v34  ;;  %v3411_v11 = vor.u32 %v4149_v4, %v3408_v5  ;;  %v2867_v23 = vor.u32 %v4013_v12, %v2864_v13  ;;  %v4069_v28 = vld [vmem:[%s6203_s1 + $0x30c] sm:$0xf] }
  0x76   :  { %v3977_v38 = vld [vmem:[%s6203_s1 + $0x24] sm:$0xf0]  ;;  %v3088_v30 = vld [vmem:[%s6203_s1 + $0x328] sm:$0xf0] }
  0x77   :  { %1744 = vmatpush.bf16.msra.mxu3 %v3567_v15  ;;  %1717 = vmatpush.bf16.msra.mxu1 %v3023_v24  ;;  %v2958_v41 = vld [vmem:[%s6203_s1 + $0x208] sm:$0xf]  ;;  %v2703_v51 = vor.u32 %v3977_v38, %v2702_v37  ;;  %v3667_v15 = vor.u32 %v4213_v6, %v3664_v7  ;;  %v3123_v24 = vor.u32 %v4077_v14, %v3120_v17  ;;  %v4133_v31 = vld [vmem:[%s6203_s1 + $0x50c] sm:$0xf] }
  0x78   :  { %v4041_v42 = vld [vmem:[%s6203_s1 + $0x224] sm:$0xf0]  ;;  %v3344_v32 = vld [vmem:[%s6203_s1 + $0x528] sm:$0xf0]  ;;  %v3091_v37 = vor.u32 %v4069_v28, %v3088_v30  ;;  %v3446_v28 = vld [vmem:[%s6203_s1 + $0x5d0] sm:$0xf] }
  0x79   :  { %1731 = vmatpush.bf16.msra.mxu2 %v3279_v25  ;;  %v3214_v43 = vld [vmem:[%s6203_s1 + $0x408] sm:$0xf]  ;;  %1704 = vmatpush.bf16.msra.mxu0 %v2735_v36  ;;  %v2959_v55 = vor.u32 %v4041_v42, %v2958_v41  ;;  %v3379_v25 = vor.u32 %v4141_v18, %v3376_v19  ;;  %v4197_v34 = vld [vmem:[%s6203_s1 + $0x70c] sm:$0xf]  ;;  %v2835_v36 = vor.u32 %v4005_v26, %v2832_v27  ;;  %v4098_v27 = vld [vmem:[%s6203_s1 + $0x3ec] sm:$0xf0] }
  0x7a   :  { %v4105_v45 = vld [vmem:[%s6203_s1 + $0x424] sm:$0xf0]  ;;  %v3600_v35 = vld [vmem:[%s6203_s1 + $0x728] sm:$0xf0]  ;;  %v3347_v38 = vor.u32 %v4133_v31, %v3344_v32  ;;  %v3702_v32 = vld [vmem:[%s6203_s1 + $0x7d0] sm:$0xf] }
  0x7b   :  { %1745 = vmatpush.bf16.msra.mxu3 %v3535_v29  ;;  %v3470_v46 = vld [vmem:[%s6203_s1 + $0x608] sm:$0xf]  ;;  %1718 = vmatpush.bf16.msra.mxu1 %v2991_v39  ;;  %v3215_v56 = vor.u32 %v4105_v45, %v3214_v43  ;;  %v3635_v29 = vor.u32 %v4205_v21, %v3632_v22  ;;  %v3997_v39 = vld [vmem:[%s6203_s1 + $0xcc] sm:$0xf]  ;;  %v3603_v42 = vor.u32 %v4197_v34, %v3600_v35  ;;  %v4226_v34 = vld [vmem:[%s6203_s1 + $0x7ec] sm:$0xf0] }
  0x7c   :  { %v4169_v47 = vld [vmem:[%s6203_s1 + $0x624] sm:$0xf0]  ;;  %v4061_v41 = vld [vmem:[%s6203_s1 + $0x2cc] sm:$0xf] }
  0x7d   :  { %1732 = vmatpush.bf16.msra.mxu2 %v3247_v40  ;;  %v3471_v59 = vor.u32 %v4169_v47, %v3470_v46  ;;  %1705 = vmatpush.bf16.msra.mxu0 %v2703_v51  ;;  %v2800_v40 = vld [vmem:[%s6203_s1 + $0xe8] sm:$0xf0] }
  0x7e   :  { %v3056_v43 = vld [vmem:[%s6203_s1 + $0x2e8] sm:$0xf0]  ;;  %v2803_v48 = vor.u32 %v3997_v39, %v2800_v40  ;;  %v2902_v39 = vld [vmem:[%s6203_s1 + $0x190] sm:$0xf] }
  0x7f   :  { %1746 = vmatpush.bf16.msra.mxu3 %v3503_v44  ;;  %1719 = vmatpush.bf16.msra.mxu1 %v2959_v55  ;;  %v4125_v44 = vld [vmem:[%s6203_s1 + $0x4cc] sm:$0xf]  ;;  %v3059_v49 = vor.u32 %v4061_v41, %v3056_v43  ;;  %v4026_v40 = vld [vmem:[%s6203_s1 + $0x1ac] sm:$0xf0] }
  0x80   :  { %1706 = vmatmul.bf16.vlgmr.msra.gmra.mxu0 %v4622_v16  ;;  %v3312_v45 = vld [vmem:[%s6203_s1 + $0x4e8] sm:$0xf0]  ;;  %v3158_v41 = vld [vmem:[%s6203_s1 + $0x390] sm:$0xf] }
  0x81   :  { %1733 = vmatpush.bf16.msra.mxu2 %v3215_v56  ;;  %1754 = vmatpush.bf16.msrb.mxu0 %v2931_v60  ;;  %v4189_v46 = vld [vmem:[%s6203_s1 + $0x6cc] sm:$0xf]  ;;  %v3315_v50 = vor.u32 %v4125_v44, %v3312_v45  ;;  %v4090_v43 = vld [vmem:[%s6203_s1 + $0x3ac] sm:$0xf0] }
  0x82   :  { %1720 = vmatmul.bf16.vlgmr.msra.gmra.mxu1 %v4661_v33  ;;  %v3568_v47 = vld [vmem:[%s6203_s1 + $0x6e8] sm:$0xf0]  ;;  %v3414_v44 = vld [vmem:[%s6203_s1 + $0x590] sm:$0xf] }
  0x83   :  { %1747 = vmatpush.bf16.msra.mxu3 %v3471_v59  ;;  %1768 = vmatpush.bf16.msrb.mxu1 %v3187_v61  ;;  %v3989_v51 = vld [vmem:[%s6203_s1 + $0x8c] sm:$0xf]  ;;  %v3571_v54 = vor.u32 %v4189_v46, %v3568_v47  ;;  %v4154_v45 = vld [vmem:[%s6203_s1 + $0x5ac] sm:$0xf0] }
  0x84   :  { %1734 = vmatmul.bf16.vlgmr.msra.gmra.mxu2 %v4605_v9  ;;  %v2768_v52 = vld [vmem:[%s6203_s1 + $0xa8] sm:$0xf0]  ;;  %v3670_v46 = vld [vmem:[%s6203_s1 + $0x790] sm:$0xf] }
  0x85   :  { %1782 = vmatpush.bf16.msrb.mxu2 %v3443_v62  ;;  %1755 = vmatpush.bf16.msrb.mxu0 %v2899_v8  ;;  %v4053_v53 = vld [vmem:[%s6203_s1 + $0x28c] sm:$0xf]  ;;  %v2771_v60 = vor.u32 %v3989_v51, %v2768_v52  ;;  %v4218_v47 = vld [vmem:[%s6203_s1 + $0x7ac] sm:$0xf0] }
  0x86   :  { %1748 = vmatmul.bf16.vlgmr.msra.gmra.mxu3 %v4634_v20  ;;  %v3024_v55 = vld [vmem:[%s6203_s1 + $0x2a8] sm:$0xf0]  ;;  %v2870_v51 = vld [vmem:[%s6203_s1 + $0x150] sm:$0xf] }
  0x87   :  { %1796 = vmatpush.bf16.msrb.mxu3 %v3699_v2  ;;  %1769 = vmatpush.bf16.msrb.mxu1 %v3155_v10  ;;  %v4117_v56 = vld [vmem:[%s6203_s1 + $0x48c] sm:$0xf]  ;;  %v3027_v61 = vor.u32 %v4053_v53, %v3024_v55  ;;  %v4018_v52 = vld [vmem:[%s6203_s1 + $0x16c] sm:$0xf0] }
  0x88   :  { %v3280_v57 = vld [vmem:[%s6203_s1 + $0x4a8] sm:$0xf0]  ;;  %v3126_v53 = vld [vmem:[%s6203_s1 + $0x350] sm:$0xf] }
  0x89   :  { %1783 = vmatpush.bf16.msrb.mxu2 %v3411_v11  ;;  %1756 = vmatpush.bf16.msrb.mxu0 %v2867_v23  ;;  %v4181_v58 = vld [vmem:[%s6203_s1 + $0x68c] sm:$0xf]  ;;  %v3283_v62 = vor.u32 %v4117_v56, %v3280_v57  ;;  %v2934_v23 = vld [vmem:[%s6203_s1 + $0x1d0] sm:$0xf] }
  0x8a   :  { %v3536_v59 = vld [vmem:[%s6203_s1 + $0x6a8] sm:$0xf0]  ;;  %v4082_v55 = vld [vmem:[%s6203_s1 + $0x36c] sm:$0xf0] }
  0x8b   :  { %1797 = vmatpush.bf16.msrb.mxu3 %v3667_v15  ;;  %1770 = vmatpush.bf16.msrb.mxu1 %v3123_v24  ;;  %v3981_v63 = vld [vmem:[%s6203_s1 + $0x4c] sm:$0xf]  ;;  %v3539_v2 = vor.u32 %v4181_v58, %v3536_v59  ;;  %v4034_v24 = vld [vmem:[%s6203_s1 + $0x1ec] sm:$0xf0] }
  0x8c   :  { %v2736_v0 = vld [vmem:[%s6203_s1 + $0x68] sm:$0xf0]  ;;  %v3382_v56 = vld [vmem:[%s6203_s1 + $0x550] sm:$0xf] }
  0x8d   :  { %1784 = vmatpush.bf16.msrb.mxu2 %v3379_v25  ;;  %1757 = vmatpush.bf16.msrb.mxu0 %v2835_v36  ;;  %v4045_v1 = vld [vmem:[%s6203_s1 + $0x24c] sm:$0xf]  ;;  %v2739_v8 = vor.u32 %v3981_v63, %v2736_v0  ;;  %v3190_v25 = vld [vmem:[%s6203_s1 + $0x3d0] sm:$0xf]  ;;  %v2935_v36 = vor.u32 %v4034_v24, %v2934_v23 }
  0x8e   :  { %v2992_v3 = vld [vmem:[%s6203_s1 + $0x268] sm:$0xf0]  ;;  %v4146_v57 = vld [vmem:[%s6203_s1 + $0x56c] sm:$0xf0] }
  0x8f   :  { %1798 = vmatpush.bf16.msrb.mxu3 %v3635_v29  ;;  %1771 = vmatpush.bf16.msrb.mxu1 %v3091_v37  ;;  %v4109_v4 = vld [vmem:[%s6203_s1 + $0x44c] sm:$0xf]  ;;  %v2995_v12 = vor.u32 %v4045_v1, %v2992_v3  ;;  %v4162_v29 = vld [vmem:[%s6203_s1 + $0x5ec] sm:$0xf0]  ;;  %v3191_v37 = vor.u32 %v4098_v27, %v3190_v25 }
  0x90   :  { %v3248_v5 = vld [vmem:[%s6203_s1 + $0x468] sm:$0xf0]  ;;  %v3638_v58 = vld [vmem:[%s6203_s1 + $0x750] sm:$0xf] }
  0x91   :  { %1785 = vmatpush.bf16.msrb.mxu2 %v3347_v38  ;;  %1758 = vmatpush.bf16.msrb.mxu0 %v2803_v48  ;;  %v4173_v6 = vld [vmem:[%s6203_s1 + $0x64c] sm:$0xf]  ;;  %v3251_v13 = vor.u32 %v4109_v4, %v3248_v5  ;;  %v3447_v38 = vor.u32 %v4162_v29, %v3446_v28  ;;  %v2903_v48 = vor.u32 %v4026_v40, %v2902_v39  ;;  %v4210_v59 = vld [vmem:[%s6203_s1 + $0x76c] sm:$0xf0] }
  0x92   :  { %v3504_v7 = vld [vmem:[%s6203_s1 + $0x668] sm:$0xf0]  ;;  %v2838_v63 = vld [vmem:[%s6203_s1 + $0x110] sm:$0xf] }
  0x93   :  { %1799 = vmatpush.bf16.msrb.mxu3 %v3603_v42  ;;  %1772 = vmatpush.bf16.msrb.mxu1 %v3059_v49  ;;  %v3973_v10 = vld [vmem:[%s6203_s1 + $0xc] sm:$0xf]  ;;  %v3507_v18 = vor.u32 %v4173_v6, %v3504_v7  ;;  %v3703_v42 = vor.u32 %v4226_v34, %v3702_v32  ;;  %v3159_v49 = vor.u32 %v4090_v43, %v3158_v41  ;;  %v4010_v0 = vld [vmem:[%s6203_s1 + $0x12c] sm:$0xf0] }
  0x94   :  { %v2704_v11 = vld [vmem:[%s6203_s1 + $0x28] sm:$0xf0]  ;;  %v3094_v1 = vld [vmem:[%s6203_s1 + $0x310] sm:$0xf] }
  0x95   :  { %1786 = vmatpush.bf16.msrb.mxu2 %v3315_v50  ;;  %1759 = vmatpush.bf16.msrb.mxu0 %v2771_v60  ;;  %v4037_v14 = vld [vmem:[%s6203_s1 + $0x20c] sm:$0xf]  ;;  %v2707_v26 = vor.u32 %v3973_v10, %v2704_v11  ;;  %v3415_v50 = vor.u32 %v4154_v45, %v3414_v44  ;;  %v2871_v60 = vor.u32 %v4018_v52, %v2870_v51  ;;  %v4074_v3 = vld [vmem:[%s6203_s1 + $0x32c] sm:$0xf0] }
  0x96   :  { %v2960_v15 = vld [vmem:[%s6203_s1 + $0x228] sm:$0xf0]  ;;  %v3350_v4 = vld [vmem:[%s6203_s1 + $0x510] sm:$0xf]  ;;  %v3095_v10 = vor.u32 %v4074_v3, %v3094_v1  ;;  %v4158_v1 = vld [vmem:[%s6203_s1 + $0x5d4] sm:$0xf] }
  0x97   :  { %1800 = vmatpush.bf16.msrb.mxu3 %v3571_v54  ;;  %1773 = vmatpush.bf16.msrb.mxu1 %v3027_v61  ;;  %v4101_v17 = vld [vmem:[%s6203_s1 + $0x40c] sm:$0xf]  ;;  %v2963_v30 = vor.u32 %v4037_v14, %v2960_v15  ;;  %v3671_v54 = vor.u32 %v4218_v47, %v3670_v46  ;;  %v3127_v61 = vor.u32 %v4082_v55, %v3126_v53  ;;  %v4138_v5 = vld [vmem:[%s6203_s1 + $0x52c] sm:$0xf0] }
  0x98   :  { %v3216_v19 = vld [vmem:[%s6203_s1 + $0x428] sm:$0xf0]  ;;  %v3606_v6 = vld [vmem:[%s6203_s1 + $0x710] sm:$0xf]  ;;  %v3351_v11 = vor.u32 %v4138_v5, %v3350_v4  ;;  %v4222_v5 = vld [vmem:[%s6203_s1 + $0x7d4] sm:$0xf] }
  0x99   :  { %1787 = vmatpush.bf16.msrb.mxu2 %v3283_v62  ;;  %v4165_v21 = vld [vmem:[%s6203_s1 + $0x60c] sm:$0xf]  ;;  %1760 = vmatpush.bf16.msrb.mxu0 %v2739_v8  ;;  %v3219_v31 = vor.u32 %v4101_v17, %v3216_v19  ;;  %v3383_v62 = vor.u32 %v4146_v57, %v3382_v56  ;;  %v4202_v7 = vld [vmem:[%s6203_s1 + $0x72c] sm:$0xf0]  ;;  %v2839_v8 = vor.u32 %v4010_v0, %v2838_v63  ;;  %v3192_v0 = vld [vmem:[%s6203_s1 + $0x3f0] sm:$0xf0] }
  0x9a   :  { %v3472_v22 = vld [vmem:[%s6203_s1 + $0x628] sm:$0xf0]  ;;  %v3062_v14 = vld [vmem:[%s6203_s1 + $0x2d0] sm:$0xf]  ;;  %v3607_v15 = vor.u32 %v4202_v7, %v3606_v6  ;;  %v3704_v6 = vld [vmem:[%s6203_s1 + $0x7f0] sm:$0xf0] }
  0x9b   :  { %1801 = vmatpush.bf16.msrb.mxu3 %v3539_v2  ;;  %1774 = vmatpush.bf16.msrb.mxu1 %v2995_v12  ;;  %v3475_v35 = vor.u32 %v4165_v21, %v3472_v22  ;;  %v3639_v2 = vor.u32 %v4210_v59, %v3638_v58  ;;  %v2806_v12 = vld [vmem:[%s6203_s1 + $0xd0] sm:$0xf] }
  0x9c   :  { %v4066_v17 = vld [vmem:[%s6203_s1 + $0x2ec] sm:$0xf0] }
  0x9d   :  { %1788 = vmatpush.bf16.msrb.mxu2 %v3251_v13  ;;  %1761 = vmatpush.bf16.msrb.mxu0 %v2707_v26  ;;  %v4002_v13 = vld [vmem:[%s6203_s1 + $0xec] sm:$0xf0]  ;;  %v3063_v24 = vor.u32 %v4066_v17, %v3062_v14  ;;  %v4086_v14 = vld [vmem:[%s6203_s1 + $0x394] sm:$0xf] }
  0x9e   :  { %v4130_v19 = vld [vmem:[%s6203_s1 + $0x4ec] sm:$0xf0]  ;;  %v2807_v23 = vor.u32 %v4002_v13, %v2806_v12  ;;  %v4022_v12 = vld [vmem:[%s6203_s1 + $0x194] sm:$0xf] }
  0x9f   :  { %1802 = vmatpush.bf16.msrb.mxu3 %v3507_v18  ;;  %1775 = vmatpush.bf16.msrb.mxu1 %v2963_v30  ;;  %v3318_v18 = vld [vmem:[%s6203_s1 + $0x4d0] sm:$0xf]  ;;  %v2904_v13 = vld [vmem:[%s6203_s1 + $0x1b0] sm:$0xf0] }
  0xa0   :  { %1762 = vmatmul.bf16.vlgmr.msrb.gmra.mxu0 %v4622_v16  ;;  %v3574_v21 = vld [vmem:[%s6203_s1 + $0x6d0] sm:$0xf]  ;;  %v3319_v25 = vor.u32 %v4130_v19, %v3318_v18  ;;  %v3160_v17 = vld [vmem:[%s6203_s1 + $0x3b0] sm:$0xf0] }
  0xa1   :  { %1789 = vmatpush.bf16.msrb.mxu2 %v3219_v31  ;;  %1810 = vmatpush.bf16.msra.mxu0 %v2935_v36  ;;  %v4194_v22 = vld [vmem:[%s6203_s1 + $0x6ec] sm:$0xf0]  ;;  %v4150_v18 = vld [vmem:[%s6203_s1 + $0x594] sm:$0xf] }
  0xa2   :  { %1776 = vmatmul.bf16.vlgmr.msrb.gmra.mxu1 %v4661_v33  ;;  %v2774_v26 = vld [vmem:[%s6203_s1 + $0x90] sm:$0xf]  ;;  %v3575_v29 = vor.u32 %v4194_v22, %v3574_v21  ;;  %v3416_v19 = vld [vmem:[%s6203_s1 + $0x5b0] sm:$0xf0] }
  0xa3   :  { %1803 = vmatpush.bf16.msrb.mxu3 %v3475_v35  ;;  %1824 = vmatpush.bf16.msra.mxu1 %v3191_v37  ;;  %v3994_v27 = vld [vmem:[%s6203_s1 + $0xac] sm:$0xf0]  ;;  %v4214_v21 = vld [vmem:[%s6203_s1 + $0x794] sm:$0xf] }
  0xa4   :  { %1790 = vmatmul.bf16.vlgmr.msrb.gmra.mxu2 %v4605_v9  ;;  %v3030_v28 = vld [vmem:[%s6203_s1 + $0x290] sm:$0xf]  ;;  %v2775_v36 = vor.u32 %v3994_v27, %v2774_v26  ;;  %v3672_v22 = vld [vmem:[%s6203_s1 + $0x7b0] sm:$0xf0] }
  0xa5   :  { %1838 = vmatpush.bf16.msra.mxu2 %v3447_v38  ;;  %1811 = vmatpush.bf16.msra.mxu0 %v2903_v48  ;;  %v4058_v30 = vld [vmem:[%s6203_s1 + $0x2ac] sm:$0xf0]  ;;  %v4014_v26 = vld [vmem:[%s6203_s1 + $0x154] sm:$0xf] }
  0xa6   :  { %1804 = vmatmul.bf16.vlgmr.msrb.gmra.mxu3 %v4634_v20  ;;  %v3286_v31 = vld [vmem:[%s6203_s1 + $0x490] sm:$0xf]  ;;  %v3031_v37 = vor.u32 %v4058_v30, %v3030_v28  ;;  %v2872_v27 = vld [vmem:[%s6203_s1 + $0x170] sm:$0xf0] }
  0xa7   :  { %1852 = vmatpush.bf16.msra.mxu3 %v3703_v42  ;;  %1825 = vmatpush.bf16.msra.mxu1 %v3159_v49  ;;  %v4122_v32 = vld [vmem:[%s6203_s1 + $0x4ac] sm:$0xf0]  ;;  %v4078_v28 = vld [vmem:[%s6203_s1 + $0x354] sm:$0xf] }
  0xa8   :  { %v3542_v34 = vld [vmem:[%s6203_s1 + $0x690] sm:$0xf]  ;;  %v3287_v38 = vor.u32 %v4122_v32, %v3286_v31  ;;  %v3128_v30 = vld [vmem:[%s6203_s1 + $0x370] sm:$0xf0] }
  0xa9   :  { %1839 = vmatpush.bf16.msra.mxu2 %v3415_v50  ;;  %1812 = vmatpush.bf16.msra.mxu0 %v2871_v60  ;;  %v4186_v35 = vld [vmem:[%s6203_s1 + $0x6ac] sm:$0xf0]  ;;  %v4030_v60 = vld [vmem:[%s6203_s1 + $0x1d4] sm:$0xf] }
  0xaa   :  { %v2742_v39 = vld [vmem:[%s6203_s1 + $0x50] sm:$0xf]  ;;  %v3543_v42 = vor.u32 %v4186_v35, %v3542_v34  ;;  %v4142_v31 = vld [vmem:[%s6203_s1 + $0x554] sm:$0xf] }
  0xab   :  { %1853 = vmatpush.bf16.msra.mxu3 %v3671_v54  ;;  %1826 = vmatpush.bf16.msra.mxu1 %v3127_v61  ;;  %v3986_v40 = vld [vmem:[%s6203_s1 + $0x6c] sm:$0xf0]  ;;  %v2936_v61 = vld [vmem:[%s6203_s1 + $0x1f0] sm:$0xf0] }
  0xac   :  { %v2998_v41 = vld [vmem:[%s6203_s1 + $0x250] sm:$0xf]  ;;  %v2743_v48 = vor.u32 %v3986_v40, %v2742_v39  ;;  %v3384_v32 = vld [vmem:[%s6203_s1 + $0x570] sm:$0xf0] }
  0xad   :  { %1840 = vmatpush.bf16.msra.mxu2 %v3383_v62  ;;  %1813 = vmatpush.bf16.msra.mxu0 %v2839_v8  ;;  %v4050_v43 = vld [vmem:[%s6203_s1 + $0x26c] sm:$0xf0]  ;;  %v4094_v62 = vld [vmem:[%s6203_s1 + $0x3d4] sm:$0xf]  ;;  %v2939_v8 = vor.u32 %v4030_v60, %v2936_v61 }
  0xae   :  { %v3254_v44 = vld [vmem:[%s6203_s1 + $0x450] sm:$0xf]  ;;  %v2999_v51 = vor.u32 %v4050_v43, %v2998_v41  ;;  %v4206_v34 = vld [vmem:[%s6203_s1 + $0x754] sm:$0xf] }
  0xaf   :  { %1854 = vmatpush.bf16.msra.mxu3 %v3639_v2  ;;  %1827 = vmatpush.bf16.msra.mxu1 %v3095_v10  ;;  %v4114_v45 = vld [vmem:[%s6203_s1 + $0x46c] sm:$0xf0]  ;;  %v3448_v2 = vld [vmem:[%s6203_s1 + $0x5f0] sm:$0xf0]  ;;  %v3195_v10 = vor.u32 %v4094_v62, %v3192_v0 }
  0xb0   :  { %v3510_v46 = vld [vmem:[%s6203_s1 + $0x650] sm:$0xf]  ;;  %v3255_v52 = vor.u32 %v4114_v45, %v3254_v44  ;;  %v3640_v35 = vld [vmem:[%s6203_s1 + $0x770] sm:$0xf0] }
  0xb1   :  { %1841 = vmatpush.bf16.msra.mxu2 %v3351_v11  ;;  %1814 = vmatpush.bf16.msra.mxu0 %v2807_v23  ;;  %v4178_v47 = vld [vmem:[%s6203_s1 + $0x66c] sm:$0xf0]  ;;  %v3451_v11 = vor.u32 %v4158_v1, %v3448_v2  ;;  %v2907_v23 = vor.u32 %v4022_v12, %v2904_v13  ;;  %v4006_v39 = vld [vmem:[%s6203_s1 + $0x114] sm:$0xf] }
  0xb2   :  { %v2710_v49 = vld [vmem:[%s6203_s1 + $0x10] sm:$0xf]  ;;  %v3511_v56 = vor.u32 %v4178_v47, %v3510_v46  ;;  %v2840_v40 = vld [vmem:[%s6203_s1 + $0x130] sm:$0xf0] }
  0xb3   :  { %1855 = vmatpush.bf16.msra.mxu3 %v3607_v15  ;;  %1828 = vmatpush.bf16.msra.mxu1 %v3063_v24  ;;  %v3978_v50 = vld [vmem:[%s6203_s1 + $0x2c] sm:$0xf0]  ;;  %v3707_v15 = vor.u32 %v4222_v5, %v3704_v6  ;;  %v3163_v24 = vor.u32 %v4086_v14, %v3160_v17  ;;  %v4070_v41 = vld [vmem:[%s6203_s1 + $0x314] sm:$0xf] }
  0xb4   :  { %v2966_v53 = vld [vmem:[%s6203_s1 + $0x210] sm:$0xf]  ;;  %v2711_v63 = vor.u32 %v3978_v50, %v2710_v49  ;;  %v3096_v43 = vld [vmem:[%s6203_s1 + $0x330] sm:$0xf0] }
  0xb5   :  { %1842 = vmatpush.bf16.msra.mxu2 %v3319_v25  ;;  %1815 = vmatpush.bf16.msra.mxu0 %v2775_v36  ;;  %v4042_v54 = vld [vmem:[%s6203_s1 + $0x22c] sm:$0xf0]  ;;  %v3419_v25 = vor.u32 %v4150_v18, %v3416_v19  ;;  %v2875_v36 = vor.u32 %v4014_v26, %v2872_v27  ;;  %v4134_v44 = vld [vmem:[%s6203_s1 + $0x514] sm:$0xf]  ;;  %v3099_v49 = vor.u32 %v4070_v41, %v3096_v43  ;;  %v3454_v41 = vld [vmem:[%s6203_s1 + $0x5d8] sm:$0xf] }
  0xb6   :  { %v3222_v55 = vld [vmem:[%s6203_s1 + $0x410] sm:$0xf]  ;;  %v2967_v3 = vor.u32 %v4042_v54, %v2966_v53  ;;  %v3352_v45 = vld [vmem:[%s6203_s1 + $0x530] sm:$0xf0] }
  0xb7   :  { %1856 = vmatpush.bf16.msra.mxu3 %v3575_v29  ;;  %1829 = vmatpush.bf16.msra.mxu1 %v3031_v37  ;;  %v4106_v57 = vld [vmem:[%s6203_s1 + $0x42c] sm:$0xf0]  ;;  %v3675_v29 = vor.u32 %v4214_v21, %v3672_v22  ;;  %v3131_v37 = vor.u32 %v4078_v28, %v3128_v30  ;;  %v4198_v46 = vld [vmem:[%s6203_s1 + $0x714] sm:$0xf]  ;;  %v3355_v50 = vor.u32 %v4134_v44, %v3352_v45  ;;  %v3710_v45 = vld [vmem:[%s6203_s1 + $0x7d8] sm:$0xf] }
  0xb8   :  { %v3478_v58 = vld [vmem:[%s6203_s1 + $0x610] sm:$0xf]  ;;  %v3223_v4 = vor.u32 %v4106_v57, %v3222_v55  ;;  %v3608_v47 = vld [vmem:[%s6203_s1 + $0x730] sm:$0xf0] }
  0xb9   :  { %1843 = vmatpush.bf16.msra.mxu2 %v3287_v38  ;;  %v4170_v59 = vld [vmem:[%s6203_s1 + $0x62c] sm:$0xf0]  ;;  %1816 = vmatpush.bf16.msra.mxu0 %v2743_v48  ;;  %v3387_v38 = vor.u32 %v4142_v31, %v3384_v32  ;;  %v2843_v48 = vor.u32 %v4006_v39, %v2840_v40  ;;  %v4062_v53 = vld [vmem:[%s6203_s1 + $0x2d4] sm:$0xf]  ;;  %v3611_v54 = vor.u32 %v4198_v46, %v3608_v47  ;;  %v4099_v40 = vld [vmem:[%s6203_s1 + $0x3f4] sm:$0xf0] }
  0xba   :  { %v3479_v7 = vor.u32 %v4170_v59, %v3478_v58  ;;  %v3064_v55 = vld [vmem:[%s6203_s1 + $0x2f0] sm:$0xf0]  ;;  %v4227_v46 = vld [vmem:[%s6203_s1 + $0x7f4] sm:$0xf0] }
  0xbb   :  { %1857 = vmatpush.bf16.msra.mxu3 %v3543_v42  ;;  %1830 = vmatpush.bf16.msra.mxu1 %v2999_v51  ;;  %v3643_v42 = vor.u32 %v4206_v34, %v3640_v35  ;;  %v3998_v51 = vld [vmem:[%s6203_s1 + $0xd4] sm:$0xf]  ;;  %v3067_v61 = vor.u32 %v4062_v53, %v3064_v55  ;;  %v3166_v53 = vld [vmem:[%s6203_s1 + $0x398] sm:$0xf] }
  0xbc   :  { %v3320_v57 = vld [vmem:[%s6203_s1 + $0x4f0] sm:$0xf0]  ;;  %v4091_v55 = vld [vmem:[%s6203_s1 + $0x3b4] sm:$0xf0] }
  0xbd   :  { %1844 = vmatpush.bf16.msra.mxu2 %v3255_v52  ;;  %1817 = vmatpush.bf16.msra.mxu0 %v2711_v63  ;;  %v2808_v52 = vld [vmem:[%s6203_s1 + $0xf0] sm:$0xf0] }
  0xbe   :  { %v4190_v58 = vld [vmem:[%s6203_s1 + $0x6d4] sm:$0xf]  ;;  %v2811_v60 = vor.u32 %v3998_v51, %v2808_v52  ;;  %v2910_v51 = vld [vmem:[%s6203_s1 + $0x198] sm:$0xf] }
  0xbf   :  { %1858 = vmatpush.bf16.msra.mxu3 %v3511_v56  ;;  %1831 = vmatpush.bf16.msra.mxu1 %v2967_v3  ;;  %v4126_v56 = vld [vmem:[%s6203_s1 + $0x4d4] sm:$0xf]  ;;  %v4027_v52 = vld [vmem:[%s6203_s1 + $0x1b4] sm:$0xf0] }
  0xc0   :  { %1818 = vmatmul.bf16.vlgmr.msra.gmra.mxu0 %v4622_v16  ;;  %v3576_v59 = vld [vmem:[%s6203_s1 + $0x6f0] sm:$0xf0]  ;;  %v3323_v62 = vor.u32 %v4126_v56, %v3320_v57  ;;  %v3422_v56 = vld [vmem:[%s6203_s1 + $0x598] sm:$0xf] }
  0xc1   :  { %1845 = vmatpush.bf16.msra.mxu2 %v3223_v4  ;;  %1866 = vmatpush.bf16.msrb.mxu0 %v2939_v8  ;;  %v3990_v63 = vld [vmem:[%s6203_s1 + $0x94] sm:$0xf]  ;;  %v3579_v2 = vor.u32 %v4190_v58, %v3576_v59  ;;  %v4155_v57 = vld [vmem:[%s6203_s1 + $0x5b4] sm:$0xf0] }
  0xc2   :  { %1832 = vmatmul.bf16.vlgmr.msra.gmra.mxu1 %v4661_v33  ;;  %v2776_v0 = vld [vmem:[%s6203_s1 + $0xb0] sm:$0xf0]  ;;  %v3678_v58 = vld [vmem:[%s6203_s1 + $0x798] sm:$0xf] }
  0xc3   :  { %1859 = vmatpush.bf16.msra.mxu3 %v3479_v7  ;;  %1880 = vmatpush.bf16.msrb.mxu1 %v3195_v10  ;;  %v4054_v1 = vld [vmem:[%s6203_s1 + $0x294] sm:$0xf]  ;;  %v2779_v8 = vor.u32 %v3990_v63, %v2776_v0  ;;  %v4219_v59 = vld [vmem:[%s6203_s1 + $0x7b4] sm:$0xf0] }
  0xc4   :  { %1846 = vmatmul.bf16.vlgmr.msra.gmra.mxu2 %v4605_v9  ;;  %v3032_v3 = vld [vmem:[%s6203_s1 + $0x2b0] sm:$0xf0]  ;;  %v2878_v63 = vld [vmem:[%s6203_s1 + $0x158] sm:$0xf] }
  0xc5   :  { %1894 = vmatpush.bf16.msrb.mxu2 %v3451_v11  ;;  %1867 = vmatpush.bf16.msrb.mxu0 %v2907_v23  ;;  %v4118_v4 = vld [vmem:[%s6203_s1 + $0x494] sm:$0xf]  ;;  %v3035_v10 = vor.u32 %v4054_v1, %v3032_v3  ;;  %v4019_v0 = vld [vmem:[%s6203_s1 + $0x174] sm:$0xf0] }
  0xc6   :  { %1860 = vmatmul.bf16.vlgmr.msra.gmra.mxu3 %v4634_v20  ;;  %v3288_v5 = vld [vmem:[%s6203_s1 + $0x4b0] sm:$0xf0]  ;;  %v3134_v1 = vld [vmem:[%s6203_s1 + $0x358] sm:$0xf] }
  0xc7   :  { %1908 = vmatpush.bf16.msrb.mxu3 %v3707_v15  ;;  %1881 = vmatpush.bf16.msrb.mxu1 %v3163_v24  ;;  %v4182_v6 = vld [vmem:[%s6203_s1 + $0x694] sm:$0xf]  ;;  %v3291_v11 = vor.u32 %v4118_v4, %v3288_v5  ;;  %v4083_v3 = vld [vmem:[%s6203_s1 + $0x374] sm:$0xf0] }
  0xc8   :  { %v3544_v7 = vld [vmem:[%s6203_s1 + $0x6b0] sm:$0xf0]  ;;  %v3390_v4 = vld [vmem:[%s6203_s1 + $0x558] sm:$0xf] }
  0xc9   :  { %1895 = vmatpush.bf16.msrb.mxu2 %v3419_v25  ;;  %1868 = vmatpush.bf16.msrb.mxu0 %v2875_v36  ;;  %v3982_v12 = vld [vmem:[%s6203_s1 + $0x54] sm:$0xf]  ;;  %v3547_v15 = vor.u32 %v4182_v6, %v3544_v7  ;;  %v2942_v36 = vld [vmem:[%s6203_s1 + $0x1d8] sm:$0xf] }
  0xca   :  { %v2744_v13 = vld [vmem:[%s6203_s1 + $0x70] sm:$0xf0]  ;;  %v4147_v5 = vld [vmem:[%s6203_s1 + $0x574] sm:$0xf0] }
  0xcb   :  { %1909 = vmatpush.bf16.msrb.mxu3 %v3675_v29  ;;  %1882 = vmatpush.bf16.msrb.mxu1 %v3131_v37  ;;  %v4046_v14 = vld [vmem:[%s6203_s1 + $0x254] sm:$0xf]  ;;  %v2747_v23 = vor.u32 %v3982_v12, %v2744_v13  ;;  %v4035_v37 = vld [vmem:[%s6203_s1 + $0x1f4] sm:$0xf0] }
  0xcc   :  { %v3000_v17 = vld [vmem:[%s6203_s1 + $0x270] sm:$0xf0]  ;;  %v3646_v6 = vld [vmem:[%s6203_s1 + $0x758] sm:$0xf] }
  0xcd   :  { %1896 = vmatpush.bf16.msrb.mxu2 %v3387_v38  ;;  %1869 = vmatpush.bf16.msrb.mxu0 %v2843_v48  ;;  %v4110_v18 = vld [vmem:[%s6203_s1 + $0x454] sm:$0xf]  ;;  %v3003_v26 = vor.u32 %v4046_v14, %v3000_v17  ;;  %v3198_v38 = vld [vmem:[%s6203_s1 + $0x3d8] sm:$0xf]  ;;  %v2943_v48 = vor.u32 %v4035_v37, %v2942_v36  ;;  %v5651_v36 = vpop.f32.mrf.mxu0 }
  0xce   :  { %v3256_v19 = vld [vmem:[%s6203_s1 + $0x470] sm:$0xf0]  ;;  %v4211_v7 = vld [vmem:[%s6203_s1 + $0x774] sm:$0xf0] }
  0xcf   :  { %1910 = vmatpush.bf16.msrb.mxu3 %v3643_v42  ;;  %1883 = vmatpush.bf16.msrb.mxu1 %v3099_v49  ;;  %v4174_v21 = vld [vmem:[%s6203_s1 + $0x654] sm:$0xf]  ;;  %v3259_v27 = vor.u32 %v4110_v18, %v3256_v19  ;;  %v4163_v42 = vld [vmem:[%s6203_s1 + $0x5f4] sm:$0xf0]  ;;  %v3199_v49 = vor.u32 %v4099_v40, %v3198_v38  ;;  %v5653_v38 = vpop.f32.mrf.mxu1 }
  0xd0   :  { %v3512_v22 = vld [vmem:[%s6203_s1 + $0x670] sm:$0xf0]  ;;  %v2846_v12 = vld [vmem:[%s6203_s1 + $0x118] sm:$0xf] }
  0xd1   :  { %1897 = vmatpush.bf16.msrb.mxu2 %v3355_v50  ;;  %1870 = vmatpush.bf16.msrb.mxu0 %v2811_v60  ;;  %v3974_v24 = vld [vmem:[%s6203_s1 + $0x14] sm:$0xf]  ;;  %v3515_v31 = vor.u32 %v4174_v21, %v3512_v22  ;;  %v3455_v50 = vor.u32 %v4163_v42, %v3454_v41  ;;  %v2911_v60 = vor.u32 %v4027_v52, %v2910_v51  ;;  %v4011_v13 = vld [vmem:[%s6203_s1 + $0x134] sm:$0xf0]  ;;  %v5679_v51 = vpop.f32.mrf.mxu2 }
  0xd2   :  { %v2712_v25 = vld [vmem:[%s6203_s1 + $0x30] sm:$0xf0]  ;;  %v3102_v14 = vld [vmem:[%s6203_s1 + $0x318] sm:$0xf] }
  0xd3   :  { %1911 = vmatpush.bf16.msrb.mxu3 %v3611_v54  ;;  %1884 = vmatpush.bf16.msrb.mxu1 %v3067_v61  ;;  %v4038_v28 = vld [vmem:[%s6203_s1 + $0x214] sm:$0xf]  ;;  %v2715_v39 = vor.u32 %v3974_v24, %v2712_v25  ;;  %v3711_v54 = vor.u32 %v4227_v46, %v3710_v45  ;;  %v3167_v61 = vor.u32 %v4091_v55, %v3166_v53  ;;  %v4075_v17 = vld [vmem:[%s6203_s1 + $0x334] sm:$0xf0] }
  0xd4   :  { %v2968_v29 = vld [vmem:[%s6203_s1 + $0x230] sm:$0xf0]  ;;  %v3358_v18 = vld [vmem:[%s6203_s1 + $0x518] sm:$0xf]  ;;  %v3103_v24 = vor.u32 %v4075_v17, %v3102_v14  ;;  %v2944_v17 = vld [vmem:[%s6203_s1 + $0x1f8] sm:$0xf0] }
  0xd5   :  { %1898 = vmatpush.bf16.msrb.mxu2 %v3323_v62  ;;  %1871 = vmatpush.bf16.msrb.mxu0 %v2779_v8  ;;  %v4102_v30 = vld [vmem:[%s6203_s1 + $0x414] sm:$0xf]  ;;  %v2971_v43 = vor.u32 %v4038_v28, %v2968_v29  ;;  %v3423_v62 = vor.u32 %v4155_v57, %v3422_v56  ;;  %v2879_v8 = vor.u32 %v4019_v0, %v2878_v63  ;;  %v4139_v19 = vld [vmem:[%s6203_s1 + $0x534] sm:$0xf0]  ;;  %v5690_v57 = vpop.f32.mrf.mxu3 }
  0xd6   :  { %v3224_v32 = vld [vmem:[%s6203_s1 + $0x430] sm:$0xf0]  ;;  %v3614_v21 = vld [vmem:[%s6203_s1 + $0x718] sm:$0xf]  ;;  %v3359_v25 = vor.u32 %v4139_v19, %v3358_v18  ;;  %v4095_v18 = vld [vmem:[%s6203_s1 + $0x3dc] sm:$0xf] }
  0xd7   :  { %1912 = vmatpush.bf16.msrb.mxu3 %v3579_v2  ;;  %1885 = vmatpush.bf16.msrb.mxu1 %v3035_v10  ;;  %v4166_v34 = vld [vmem:[%s6203_s1 + $0x614] sm:$0xf]  ;;  %v3227_v44 = vor.u32 %v4102_v30, %v3224_v32  ;;  %v3679_v2 = vor.u32 %v4219_v59, %v3678_v58  ;;  %v3135_v10 = vor.u32 %v4083_v3, %v3134_v1  ;;  %v4203_v22 = vld [vmem:[%s6203_s1 + $0x734] sm:$0xf0]  ;;  %v5733_v14 = vpop.f32.mrf.mxu1 }
  0xd8   :  { %v3480_v35 = vld [vmem:[%s6203_s1 + $0x630] sm:$0xf0]  ;;  %v3070_v28 = vld [vmem:[%s6203_s1 + $0x2d8] sm:$0xf]  ;;  %v3615_v29 = vor.u32 %v4203_v22, %v3614_v21  ;;  %v3200_v21 = vld [vmem:[%s6203_s1 + $0x3f8] sm:$0xf0] }
  0xd9   :  { %1899 = vmatpush.bf16.msrb.mxu2 %v3291_v11  ;;  %1872 = vmatpush.bf16.msrb.mxu0 %v2747_v23  ;;  %v3483_v47 = vor.u32 %v4166_v34, %v3480_v35  ;;  %v3391_v11 = vor.u32 %v4147_v5, %v3390_v4  ;;  %v2847_v23 = vor.u32 %v4011_v13, %v2846_v12  ;;  %v4067_v30 = vld [vmem:[%s6203_s1 + $0x2f4] sm:$0xf0]  ;;  %v4159_v22 = vld [vmem:[%s6203_s1 + $0x5dc] sm:$0xf] }
  0xda   :  { %v4131_v32 = vld [vmem:[%s6203_s1 + $0x4f4] sm:$0xf0] }
  0xdb   :  { %1913 = vmatpush.bf16.msrb.mxu3 %v3547_v15  ;;  %1886 = vmatpush.bf16.msrb.mxu1 %v3003_v26  ;;  %v3647_v15 = vor.u32 %v4211_v7, %v3646_v6  ;;  %v2814_v26 = vld [vmem:[%s6203_s1 + $0xd8] sm:$0xf] }
  0xdc   :  { %v3582_v34 = vld [vmem:[%s6203_s1 + $0x6d8] sm:$0xf] }
  0xdd   :  { %1900 = vmatpush.bf16.msrb.mxu2 %v3259_v27  ;;  %1873 = vmatpush.bf16.msrb.mxu0 %v2715_v39  ;;  %v4003_v27 = vld [vmem:[%s6203_s1 + $0xf4] sm:$0xf0]  ;;  %v3071_v39 = vor.u32 %v4067_v30, %v3070_v28  ;;  %v5759_v30 = vpop.f32.mrf.mxu2 }
  0xde   :  { %v4195_v35 = vld [vmem:[%s6203_s1 + $0x6f4] sm:$0xf0]  ;;  %v2815_v37 = vor.u32 %v4003_v27, %v2814_v26  ;;  %v4223_v26 = vld [vmem:[%s6203_s1 + $0x7dc] sm:$0xf] }
  0xdf   :  { %1914 = vmatpush.bf16.msrb.mxu3 %v3515_v31  ;;  %1887 = vmatpush.bf16.msrb.mxu1 %v2971_v43  ;;  %v3326_v31 = vld [vmem:[%s6203_s1 + $0x4d8] sm:$0xf]  ;;  %v3712_v27 = vld [vmem:[%s6203_s1 + $0x7f8] sm:$0xf0] }
  0xe0   :  { %1874 = vmatmul.bf16.vlgmr.msrb.gmra.mxu0 %v4622_v16  ;;  %v3327_v40 = vor.u32 %v4131_v32, %v3326_v31  ;;  %v2782_v41 = vld [vmem:[%s6203_s1 + $0x98] sm:$0xf]  ;;  %v3203_v31 = vor.u32 %v4095_v18, %v3200_v21  ;;  %v2816_v21 = vld [vmem:[%s6203_s1 + $0xf8] sm:$0xf0] }
  0xe1   :  { %1901 = vmatpush.bf16.msrb.mxu2 %v3227_v44  ;;  %1922 = vmatpush.bf16.msra.mxu0 %v2943_v48  ;;  %v3995_v42 = vld [vmem:[%s6203_s1 + $0xb4] sm:$0xf0]  ;;  %v3583_v44 = vor.u32 %v4195_v35, %v3582_v34  ;;  %v4023_v34 = vld [vmem:[%s6203_s1 + $0x19c] sm:$0xf] }
  0xe2   :  { %1888 = vmatmul.bf16.vlgmr.msrb.gmra.mxu1 %v4661_v33  ;;  %v3038_v43 = vld [vmem:[%s6203_s1 + $0x298] sm:$0xf]  ;;  %v2912_v35 = vld [vmem:[%s6203_s1 + $0x1b8] sm:$0xf0] }
  0xe3   :  { %1915 = vmatpush.bf16.msrb.mxu3 %v3483_v47  ;;  %1936 = vmatpush.bf16.msra.mxu1 %v3199_v49  ;;  %v4059_v45 = vld [vmem:[%s6203_s1 + $0x2b4] sm:$0xf0] }
  0xe4   :  { %1902 = vmatmul.bf16.vlgmr.msrb.gmra.mxu2 %v4605_v9  ;;  %v3294_v46 = vld [vmem:[%s6203_s1 + $0x498] sm:$0xf]  ;;  %v3039_v52 = vor.u32 %v4059_v45, %v3038_v43  ;;  %v3424_v43 = vld [vmem:[%s6203_s1 + $0x5b8] sm:$0xf0] }
  0xe5   :  { %1950 = vmatpush.bf16.msra.mxu2 %v3455_v50  ;;  %1923 = vmatpush.bf16.msra.mxu0 %v2911_v60  ;;  %v4123_v47 = vld [vmem:[%s6203_s1 + $0x4b4] sm:$0xf0]  ;;  %v2783_v50 = vor.u32 %v3995_v42, %v2782_v41  ;;  %v3168_v41 = vld [vmem:[%s6203_s1 + $0x3b8] sm:$0xf0] }
  0xe6   :  { %1916 = vmatmul.bf16.vlgmr.msrb.gmra.mxu3 %v4634_v20  ;;  %v3550_v48 = vld [vmem:[%s6203_s1 + $0x698] sm:$0xf]  ;;  %v3295_v53 = vor.u32 %v4123_v47, %v3294_v46  ;;  %v4151_v42 = vld [vmem:[%s6203_s1 + $0x59c] sm:$0xf]  ;;  %v2915_v47 = vor.u32 %v4023_v34, %v2912_v35 }
  0xe7   :  { %1964 = vmatpush.bf16.msra.mxu3 %v3711_v54  ;;  %1937 = vmatpush.bf16.msra.mxu1 %v3167_v61  ;;  %v4187_v49 = vld [vmem:[%s6203_s1 + $0x6b4] sm:$0xf0]  ;;  %v3680_v45 = vld [vmem:[%s6203_s1 + $0x7b8] sm:$0xf0] }
  0xe8   :  { %v2750_v54 = vld [vmem:[%s6203_s1 + $0x58] sm:$0xf]  ;;  %v3551_v58 = vor.u32 %v4187_v49, %v3550_v48  ;;  %v3427_v49 = vor.u32 %v4151_v42, %v3424_v43  ;;  %v3040_v43 = vld [vmem:[%s6203_s1 + $0x2b8] sm:$0xf0] }
  0xe9   :  { %1951 = vmatpush.bf16.msra.mxu2 %v3423_v62  ;;  %1924 = vmatpush.bf16.msra.mxu0 %v2879_v8  ;;  %v3987_v55 = vld [vmem:[%s6203_s1 + $0x74] sm:$0xf0]  ;;  %v5722_v8 = vpop.f32.mrf.mxu0 }
  0xea   :  { %v3006_v56 = vld [vmem:[%s6203_s1 + $0x258] sm:$0xf]  ;;  %v2751_v0 = vor.u32 %v3987_v55, %v2750_v54  ;;  %v4079_v54 = vld [vmem:[%s6203_s1 + $0x35c] sm:$0xf] }
  0xeb   :  { %1965 = vmatpush.bf16.msra.mxu3 %v3679_v2  ;;  %1938 = vmatpush.bf16.msra.mxu1 %v3135_v10  ;;  %v4051_v59 = vld [vmem:[%s6203_s1 + $0x274] sm:$0xf0] }
  0xec   :  { %v3262_v60 = vld [vmem:[%s6203_s1 + $0x458] sm:$0xf]  ;;  %v3007_v3 = vor.u32 %v4051_v59, %v3006_v56  ;;  %v3136_v56 = vld [vmem:[%s6203_s1 + $0x378] sm:$0xf0] }
  0xed   :  { %1952 = vmatpush.bf16.msra.mxu2 %v3391_v11  ;;  %1925 = vmatpush.bf16.msra.mxu0 %v2847_v23  ;;  %v4115_v61 = vld [vmem:[%s6203_s1 + $0x474] sm:$0xf0]  ;;  %v3456_v23 = vld [vmem:[%s6203_s1 + $0x5f8] sm:$0xf0] }
  0xee   :  { %v3518_v62 = vld [vmem:[%s6203_s1 + $0x658] sm:$0xf]  ;;  %v3263_v4 = vor.u32 %v4115_v61, %v3262_v60  ;;  %v3459_v32 = vor.u32 %v4159_v22, %v3456_v23  ;;  %v3392_v59 = vld [vmem:[%s6203_s1 + $0x578] sm:$0xf0] }
  0xef   :  { %1966 = vmatpush.bf16.msra.mxu3 %v3647_v15  ;;  %1939 = vmatpush.bf16.msra.mxu1 %v3103_v24  ;;  %v4179_v63 = vld [vmem:[%s6203_s1 + $0x674] sm:$0xf0]  ;;  %v4031_v15 = vld [vmem:[%s6203_s1 + $0x1dc] sm:$0xf] }
  0xf0   :  { %v2718_v1 = vld [vmem:[%s6203_s1 + $0x18] sm:$0xf]  ;;  %v3519_v10 = vor.u32 %v4179_v63, %v3518_v62  ;;  %v4207_v60 = vld [vmem:[%s6203_s1 + $0x75c] sm:$0xf]  ;;  %v5819_v63 = vpop.f32.mrf.mxu2 }
  0xf1   :  { %1953 = vmatpush.bf16.msra.mxu2 %v3359_v25  ;;  %1926 = vmatpush.bf16.msra.mxu0 %v2815_v37  ;;  %v3979_v2 = vld [vmem:[%s6203_s1 + $0x34] sm:$0xf0]  ;;  %v4087_v37 = vld [vmem:[%s6203_s1 + $0x39c] sm:$0xf]  ;;  %v5787_v46 = vpop.f32.mrf.mxu0 }
  0xf2   :  { %v2974_v5 = vld [vmem:[%s6203_s1 + $0x218] sm:$0xf]  ;;  %v2719_v19 = vor.u32 %v3979_v2, %v2718_v1  ;;  %v3171_v48 = vor.u32 %v4087_v37, %v3168_v41  ;;  %v3648_v61 = vld [vmem:[%s6203_s1 + $0x778] sm:$0xf0] }
  0xf3   :  { %1967 = vmatpush.bf16.msra.mxu3 %v3615_v29  ;;  %1940 = vmatpush.bf16.msra.mxu1 %v3071_v39  ;;  %v4043_v6 = vld [vmem:[%s6203_s1 + $0x234] sm:$0xf0]  ;;  %v2947_v29 = vor.u32 %v4031_v15, %v2944_v17  ;;  %v5770_v39 = vpop.f32.mrf.mxu3  ;;  %v4007_v2 = vld [vmem:[%s6203_s1 + $0x11c] sm:$0xf] }
  0xf4   :  { %v3230_v7 = vld [vmem:[%s6203_s1 + $0x418] sm:$0xf]  ;;  %v2975_v24 = vor.u32 %v4043_v6, %v2974_v5  ;;  %v3651_v5 = vor.u32 %v4207_v60, %v3648_v61  ;;  %v4063_v22 = vld [vmem:[%s6203_s1 + $0x2dc] sm:$0xf] }
  0xf5   :  { %1954 = vmatpush.bf16.msra.mxu2 %v3327_v40  ;;  %1927 = vmatpush.bf16.msra.mxu0 %v2783_v50  ;;  %v4107_v11 = vld [vmem:[%s6203_s1 + $0x434] sm:$0xf0]  ;;  %v3715_v40 = vor.u32 %v4223_v26, %v3712_v27  ;;  %v5789_v50 = vpop.f32.mrf.mxu1  ;;  %v4127_v26 = vld [vmem:[%s6203_s1 + $0x4dc] sm:$0xf] }
  0xf6   :  { %v3486_v12 = vld [vmem:[%s6203_s1 + $0x618] sm:$0xf]  ;;  %v3231_v25 = vor.u32 %v4107_v11, %v3230_v7  ;;  %v3104_v7 = vld [vmem:[%s6203_s1 + $0x338] sm:$0xf0] }
  0xf7   :  { %1968 = vmatpush.bf16.msra.mxu3 %v3583_v44  ;;  %1941 = vmatpush.bf16.msra.mxu1 %v3039_v52  ;;  %v4171_v13 = vld [vmem:[%s6203_s1 + $0x634] sm:$0xf0]  ;;  %v4215_v44 = vld [vmem:[%s6203_s1 + $0x79c] sm:$0xf] }
  0xf8   :  { %v3487_v28 = vor.u32 %v4171_v13, %v3486_v12  ;;  %v4015_v52 = vld [vmem:[%s6203_s1 + $0x15c] sm:$0xf]  ;;  %v3683_v55 = vor.u32 %v4215_v44, %v3680_v45 }
  0xf9   :  { %1955 = vmatpush.bf16.msra.mxu2 %v3295_v53  ;;  %1928 = vmatpush.bf16.msra.mxu0 %v2751_v0  ;;  %v2880_v53 = vld [vmem:[%s6203_s1 + $0x178] sm:$0xf0]  ;;  %v3139_v0 = vor.u32 %v4079_v54, %v3136_v56  ;;  %v5856_v23 = vpop.f32.mrf.mxu0 }
  0xfa   :  { %v2883_v62 = vor.u32 %v4015_v52, %v2880_v53  ;;  %v3360_v11 = vld [vmem:[%s6203_s1 + $0x538] sm:$0xf0] }
  0xfb   :  { %1969 = vmatpush.bf16.msra.mxu3 %v3551_v58  ;;  %1942 = vmatpush.bf16.msra.mxu1 %v3007_v3  ;;  %v4143_v58 = vld [vmem:[%s6203_s1 + $0x55c] sm:$0xf]  ;;  %v5830_v6 = vpop.f32.mrf.mxu3 }
  0xfc   :  { %v3395_v1 = vor.u32 %v4143_v58, %v3392_v59  ;;  %v2848_v3 = vld [vmem:[%s6203_s1 + $0x138] sm:$0xf0] }
  0xfd   :  { %1956 = vmatpush.bf16.msra.mxu2 %v3263_v4  ;;  %1929 = vmatpush.bf16.msra.mxu0 %v2719_v19  ;;  %v4071_v4 = vld [vmem:[%s6203_s1 + $0x31c] sm:$0xf]  ;;  %v2851_v15 = vor.u32 %v4007_v2, %v2848_v3 }
  0xfe   :  { %v4199_v12 = vld [vmem:[%s6203_s1 + $0x71c] sm:$0xf]  ;;  %v3107_v17 = vor.u32 %v4071_v4, %v3104_v7 }
  0xff   :  { %1970 = vmatpush.bf16.msra.mxu3 %v3519_v10  ;;  %1943 = vmatpush.bf16.msra.mxu1 %v2975_v24  ;;  %v4135_v10 = vld [vmem:[%s6203_s1 + $0x51c] sm:$0xf] }
 0x100   :  { %1930 = vmatmul.bf16.vlgmr.msra.gmra.mxu0 %v4622_v16  ;;  %v3616_v13 = vld [vmem:[%s6203_s1 + $0x738] sm:$0xf0]  ;;  %v3363_v18 = vor.u32 %v4135_v10, %v3360_v11 }
 0x101   :  { %1957 = vmatpush.bf16.msra.mxu2 %v3231_v25  ;;  %1978 = vmatpush.bf16.msrb.mxu0 %v2947_v29  ;;  %v3999_v19 = vld [vmem:[%s6203_s1 + $0xdc] sm:$0xf]  ;;  %v3619_v24 = vor.u32 %v4199_v12, %v3616_v13 }
 0x102   :  { %1944 = vmatmul.bf16.vlgmr.msra.gmra.mxu1 %v4661_v33  ;;  %v3072_v25 = vld [vmem:[%s6203_s1 + $0x2f8] sm:$0xf0] }
 0x103   :  { %1971 = vmatpush.bf16.msra.mxu3 %v3487_v28  ;;  %1992 = vmatpush.bf16.msrb.mxu1 %v3203_v31  ;;  %v3328_v27 = vld [vmem:[%s6203_s1 + $0x4f8] sm:$0xf0]  ;;  %v5867_v28 = vpop.f32.mrf.mxu1  ;;  %v3075_v34 = vor.u32 %v4063_v22, %v3072_v25  ;;  %v5901_v52 = vpop.f32.mrf.mxu3 }
 0x104   :  { %1958 = vmatmul.bf16.vlgmr.msra.gmra.mxu2 %v4605_v9  ;;  %v4191_v29 = vld [vmem:[%s6203_s1 + $0x6dc] sm:$0xf]  ;;  %v3331_v35 = vor.u32 %v4127_v26, %v3328_v27 }
 0x105   :  { %2006 = vmatpush.bf16.msrb.mxu2 %v3459_v32  ;;  %1979 = vmatpush.bf16.msrb.mxu0 %v2915_v47  ;;  %v3584_v31 = vld [vmem:[%s6203_s1 + $0x6f8] sm:$0xf0]  ;;  %v2819_v32 = vor.u32 %v3999_v19, %v2816_v21  ;;  %v5893_v47 = vpop.f32.mrf.mxu2 }
 0x106   :  { %1972 = vmatmul.bf16.vlgmr.msra.gmra.mxu3 %v4634_v20  ;;  %v3991_v37 = vld [vmem:[%s6203_s1 + $0x9c] sm:$0xf]  ;;  %v3587_v42 = vor.u32 %v4191_v29, %v3584_v31 }
 0x107   :  { %2020 = vmatpush.bf16.msrb.mxu3 %v3715_v40  ;;  %1993 = vmatpush.bf16.msrb.mxu1 %v3171_v48  ;;  %v2784_v40 = vld [vmem:[%s6203_s1 + $0xb8] sm:$0xf0] }
 0x108   :  { %v4055_v41 = vld [vmem:[%s6203_s1 + $0x29c] sm:$0xf]  ;;  %v2787_v53 = vor.u32 %v3991_v37, %v2784_v40 }
 0x109   :  { %2007 = vmatpush.bf16.msrb.mxu2 %v3427_v49  ;;  %1980 = vmatpush.bf16.msrb.mxu0 %v2883_v62  ;;  %v4119_v44 = vld [vmem:[%s6203_s1 + $0x49c] sm:$0xf]  ;;  %v3043_v54 = vor.u32 %v4055_v41, %v3040_v43  ;;  %v5977_v43 = vld [vmem:[%s6206_s2] sm:$0xff] }
 0x10a   :  { %v3296_v45 = vld [vmem:[%s6203_s1 + $0x4b8] sm:$0xf0] }
 0x10b   :  { %2021 = vmatpush.bf16.msrb.mxu3 %v3683_v55  ;;  %1994 = vmatpush.bf16.msrb.mxu1 %v3139_v0  ;;  %v4183_v48 = vld [vmem:[%s6203_s1 + $0x69c] sm:$0xf]  ;;  %v3299_v55 = vor.u32 %v4119_v44, %v3296_v45  ;;  %v5929_v4 = vpop.f32.mrf.mxu1  ;;  %v5957_v26 = vpop.f32.mrf.mxu3  ;;  %v4242_v44 = vld [vmem:[%s6205_s3 + $0x70] sm:$0xff] }
 0x10c   :  { %v3552_v49 = vld [vmem:[%s6203_s1 + $0x6b8] sm:$0xf0]  ;;  %v4250_v45 = vld [vmem:[%s6205_s3 + $0xb0] sm:$0xff] }
 0x10d   :  { %2008 = vmatpush.bf16.msrb.mxu2 %v3395_v1  ;;  %1981 = vmatpush.bf16.msrb.mxu0 %v2851_v15  ;;  %v3983_v56 = vld [vmem:[%s6203_s1 + $0x5c] sm:$0xf]  ;;  %v3555_v60 = vor.u32 %v4183_v48, %v3552_v49  ;;  %v5921_v1 = vpop.f32.mrf.mxu0  ;;  %v290_v49 = vperm.slane %v5977_v43, 0 }
 0x10e   :  { %v2752_v58 = vld [vmem:[%s6203_s1 + $0x78] sm:$0xf0] }
 0x10f   :  { %2022 = vmatpush.bf16.msrb.mxu3 %v3651_v5  ;;  %1995 = vmatpush.bf16.msrb.mxu1 %v3107_v17  ;;  %v4047_v59 = vld [vmem:[%s6203_s1 + $0x25c] sm:$0xf]  ;;  %v2755_v5 = vor.u32 %v3983_v56, %v2752_v58  ;;  %v1596_v56 = vadd.f32 %v5651_v36, %v290_v49  ;;  %v4257_v58 = vld [vmem:[%s6205_s3 + $0xe8] sm:$0xff]  ;;  %v4240_v36 = vld [vmem:[%s6205_s3 + $0x60] sm:$0xff] }
 0x110   :  { %v3008_v61 = vld [vmem:[%s6203_s1 + $0x278] sm:$0xf0] }
 0x111   :  { %2009 = vmatpush.bf16.msrb.mxu2 %v3363_v18  ;;  %1982 = vmatpush.bf16.msrb.mxu0 %v2819_v32  ;;  %v4111_v62 = vld [vmem:[%s6203_s1 + $0x45c] sm:$0xf]  ;;  %v3011_v7 = vor.u32 %v4047_v59, %v3008_v61  ;;  %v4232_v59 = vld [vmem:[%s6205_s3 + $0x20] sm:$0xff] }
 0x112   :  { %v3264_v0 = vld [vmem:[%s6203_s1 + $0x478] sm:$0xf0] }
 0x113   :  { %2023 = vmatpush.bf16.msrb.mxu3 %v3619_v24  ;;  %1996 = vmatpush.bf16.msrb.mxu1 %v3075_v34  ;;  %v4175_v2 = vld [vmem:[%s6203_s1 + $0x65c] sm:$0xf]  ;;  %v3267_v10 = vor.u32 %v4111_v62, %v3264_v0  ;;  %v5955_v24 = vpop.f32.mrf.mxu2  ;;  %v1723_v40 = vpop.f32.mrf.mxu1  ;;  %v1598_v62 = vadd.f32 %v5722_v8, %v290_v49  ;;  %v1610_v8 = vadd.f32 %v5653_v38, %v1596_v56 }
 0x114   :  { %v3520_v3 = vld [vmem:[%s6203_s1 + $0x678] sm:$0xf0] }
 0x115   :  { %2010 = vmatpush.bf16.msrb.mxu2 %v3331_v35  ;;  %1983 = vmatpush.bf16.msrb.mxu0 %v2787_v53  ;;  %v3975_v11 = vld [vmem:[%s6203_s1 + $0x1c] sm:$0xf]  ;;  %v3523_v15 = vor.u32 %v4175_v2, %v3520_v3  ;;  %v1709_v37 = vpop.f32.mrf.mxu0  ;;  %v4258_v53 = vld [vmem:[%s6205_s3 + $0xf0] sm:$0xff]  ;;  %v4248_v2 = vld [vmem:[%s6205_s3 + $0xa0] sm:$0xff] }
 0x116   :  { %v2720_v12 = vld [vmem:[%s6203_s1 + $0x38] sm:$0xf0] }
 0x117   :  { %2024 = vmatpush.bf16.msrb.mxu3 %v3587_v42  ;;  %1997 = vmatpush.bf16.msrb.mxu1 %v3043_v54  ;;  %v4039_v13 = vld [vmem:[%s6203_s1 + $0x21c] sm:$0xf]  ;;  %v2723_v25 = vor.u32 %v3975_v11, %v2720_v12  ;;  %v4234_v42 = vld [vmem:[%s6205_s3 + $0x30] sm:$0xff]  ;;  %v5998_v54 = vpop.f32.mrf.mxu3  ;;  %v4256_v11 = vld [vmem:[%s6205_s3 + $0xe0] sm:$0xff] }
 0x118   :  { %v2976_v17 = vld [vmem:[%s6203_s1 + $0x238] sm:$0xf0] }
 0x119   :  { %2011 = vmatpush.bf16.msrb.mxu2 %v3299_v55  ;;  %v4103_v18 = vld [vmem:[%s6203_s1 + $0x41c] sm:$0xf]  ;;  %1984 = vmatpush.bf16.msrb.mxu0 %v2755_v5  ;;  %v2979_v27 = vor.u32 %v4039_v13, %v2976_v17  ;;  %v292_v55 = vperm.slane %v5977_v43, 2  ;;  %v1612_v13 = vadd.f32 %v5733_v14, %v1598_v62  ;;  %v1624_v14 = vadd.f32 %v5679_v51, %v1610_v8  ;;  %v4238_v51 = vld [vmem:[%s6205_s3 + $0x50] sm:$0xff] }
 0x11a   :  { %v3232_v19 = vld [vmem:[%s6203_s1 + $0x438] sm:$0xf0]  ;;  %v4274_v8 = vld [vmem:[%s6205_s3 + $0x170] sm:$0xff] }
 0x11b   :  { %2025 = vmatpush.bf16.msrb.mxu3 %v3555_v60  ;;  %v4167_v21 = vld [vmem:[%s6203_s1 + $0x61c] sm:$0xf]  ;;  %1998 = vmatpush.bf16.msrb.mxu1 %v3011_v7  ;;  %v3235_v29 = vor.u32 %v4103_v18, %v3232_v19  ;;  %v5989_v48 = vpop.f32.mrf.mxu2  ;;  %v293_v60 = vperm.slane %v5977_v43, 3  ;;  %v1708_v7 = vadd.f32 %v5921_v1, %v292_v55 }
 0x11c   :  { %v3488_v22 = vld [vmem:[%s6203_s1 + $0x638] sm:$0xf0] }
 0x11d   :  { %2012 = vmatpush.bf16.msrb.mxu2 %v3267_v10  ;;  %v3491_v31 = vor.u32 %v4167_v21, %v3488_v22  ;;  %v4235_v32 = vld [vmem:[%s6205_s3 + $0x38] sm:$0xff]  ;;  %1985 = vmatpush.bf16.msrb.mxu0 %v2723_v25  ;;  %v1763_v61 = vpop.f32.mrf.mxu0  ;;  %v1710_v10 = vadd.f32 %v1709_v37, %v292_v55  ;;  %v1722_v18 = vadd.f32 %v5929_v4, %v1708_v7  ;;  %v4230_v25 = vld [vmem:[%s6205_s3 + $0x10] sm:$0xff] }
 0x11e   :  { %v4243_v34 = vld [vmem:[%s6205_s3 + $0x78] sm:$0xff] }
 0x11f   :  { %2026 = vmatpush.bf16.msrb.mxu3 %v3523_v15  ;;  %v4251_v35 = vld [vmem:[%s6205_s3 + $0xb8] sm:$0xff]  ;;  %1999 = vmatpush.bf16.msrb.mxu1 %v2979_v27  ;;  %v1777_v3 = vpop.f32.mrf.mxu1  ;;  %v1724_v19 = vadd.f32 %v1723_v40, %v1710_v10  ;;  %v4254_v40 = vld [vmem:[%s6205_s3 + $0xd0] sm:$0xff] }
 0x120   :  { %v4259_v41 = vld [vmem:[%s6205_s3 + $0xf8] sm:$0xff]  ;;  %1986 = vmatmul.bf16.vlgmr.msrb.gmra.mxu0 %v4622_v16  ;;  %v4233_v16 = vld [vmem:[%s6205_s3 + $0x28] sm:$0xff]  ;;  %v4266_v10 = vld [vmem:[%s6205_s3 + $0x130] sm:$0xff] }
 0x121   :  { %2013 = vmatpush.bf16.msrb.mxu2 %v3235_v29  ;;  %2574 = vmatpush.bf16.msra.mxu0 %v4235_v32  ;;  %v4231_v12 = vld [vmem:[%s6205_s3 + $0x18] sm:$0xff]  ;;  %v4246_v29 = vld [vmem:[%s6205_s3 + $0x90] sm:$0xff] }
 0x122   :  { %2000 = vmatmul.bf16.vlgmr.msrb.gmra.mxu1 %v4661_v33  ;;  %v4249_v33 = vld [vmem:[%s6205_s3 + $0xa8] sm:$0xff]  ;;  %v4239_v38 = vld [vmem:[%s6205_s3 + $0x58] sm:$0xff] }
 0x123   :  { %2027 = vmatpush.bf16.msrb.mxu3 %v3491_v31  ;;  %2588 = vmatpush.bf16.msra.mxu1 %v4243_v34  ;;  %v4247_v1 = vld [vmem:[%s6205_s3 + $0x98] sm:$0xff] }
 0x124   :  { %2014 = vmatmul.bf16.vlgmr.msrb.gmra.mxu2 %v4605_v9  ;;  %v291_v9 = vperm.slane %v5977_v43, 1  ;;  %v4255_v22 = vld [vmem:[%s6205_s3 + $0xd8] sm:$0xff] }
 0x125   :  { %2602 = vmatpush.bf16.msra.mxu2 %v4251_v35  ;;  %2575 = vmatpush.bf16.msra.mxu0 %v4234_v42  ;;  %v1765_v27 = vpop.f32.mrf.mxu0  ;;  %v1736_v35 = vadd.f32 %v5955_v24, %v1722_v18  ;;  %v1638_v42 = vadd.f32 %v5690_v57, %v1624_v14  ;;  %v4275_v62 = vld [vmem:[%s6205_s3 + $0x178] sm:$0xff] }
 0x126   :  { %2028 = vmatmul.bf16.vlgmr.msrb.gmra.mxu3 %v4634_v20  ;;  %v4241_v20 = vld [vmem:[%s6205_s3 + $0x68] sm:$0xff]  ;;  %v1652_v0 = vadd.f32 %v5787_v46, %v291_v9  ;;  %v1654_v5 = vadd.f32 %v5856_v23, %v291_v9  ;;  %v1764_v46 = vadd.f32 %v1763_v61, %v293_v60  ;;  %v1766_v31 = vadd.f32 %v1765_v27, %v293_v60  ;;  %v4267_v61 = vld [vmem:[%s6205_s3 + $0x138] sm:$0xff]  ;;  %v4262_v27 = vld [vmem:[%s6205_s3 + $0x110] sm:$0xff] }
 0x127   :  { %2616 = vmatpush.bf16.msra.mxu3 %v4259_v41  ;;  %2589 = vmatpush.bf16.msra.mxu1 %v4242_v44  ;;  %v1791_v15 = vpop.f32.mrf.mxu2  ;;  %v1779_v32 = vpop.f32.mrf.mxu1  ;;  %v4229_v41 = vld [vmem:[%s6205_s3 + $0x8] sm:$0xff]  ;;  %v2034_v55 = vmax.f32 %v1638_v42, 0.0 }
 0x128   :  { %v1666_v23 = vadd.f32 %v5789_v50, %v1652_v0  ;;  %v1668_v17 = vadd.f32 %v5867_v28, %v1654_v5  ;;  %v1778_v50 = vadd.f32 %v1777_v3, %v1764_v46  ;;  %v1626_v28 = vadd.f32 %v5759_v30, %v1612_v13  ;;  %v4237_v44 = vld [vmem:[%s6205_s3 + $0x48] sm:$0xff]  ;;  %v4252_v3 = vld [vmem:[%s6205_s3 + $0xc0] sm:$0xff] }
 0x129   :  { %2603 = vmatpush.bf16.msra.mxu2 %v4250_v45  ;;  %2576 = vmatpush.bf16.msra.mxu0 %v4233_v16  ;;  %v1805_v21 = vpop.f32.mrf.mxu3  ;;  %v1738_v30 = vadd.f32 %v5989_v48, %v1724_v19  ;;  %v1780_v37 = vadd.f32 %v1779_v32, %v1766_v31  ;;  %v4245_v45 = vld [vmem:[%s6205_s3 + $0x88] sm:$0xff]  ;;  %v294_v13 = vperm.slane %v5977_v43, 4  ;;  %v4263_v19 = vld [vmem:[%s6205_s3 + $0x118] sm:$0xff] }
 0x12a   :  { %v1680_v4 = vadd.f32 %v5819_v63, %v1666_v23  ;;  %v1682_v34 = vadd.f32 %v5893_v47, %v1668_v17  ;;  %v1792_v63 = vadd.f32 %v1791_v15, %v1778_v50  ;;  %v1640_v47 = vadd.f32 %v5770_v39, %v1626_v28  ;;  %v4272_v17 = vld [vmem:[%s6205_s3 + $0x160] sm:$0xff]  ;;  %v4271_v50 = vld [vmem:[%s6205_s3 + $0x158] sm:$0xff]  ;;  %v4261_v32 = vld [vmem:[%s6205_s3 + $0x108] sm:$0xff] }
 0x12b   :  { %2617 = vmatpush.bf16.msra.mxu3 %v4258_v53  ;;  %2590 = vmatpush.bf16.msra.mxu1 %v4241_v20  ;;  %v1750_v53 = vadd.f32 %v5957_v26, %v1736_v35  ;;  %v1752_v57 = vadd.f32 %v5998_v54, %v1738_v30  ;;  %v4253_v20 = vld [vmem:[%s6205_s3 + $0xc8] sm:$0xff]  ;;  %v4236_v26 = vld [vmem:[%s6205_s3 + $0x40] sm:$0xff] }
 0x12c   :  { %v1694_v24 = vadd.f32 %v5830_v6, %v1680_v4  ;;  %v1696_v49 = vadd.f32 %v5901_v52, %v1682_v34  ;;  %v1806_v6 = vadd.f32 %v1805_v21, %v1792_v63  ;;  %v2042_v52 = vmax.f32 %v1640_v47, 0.0  ;;  %v4244_v54 = vld [vmem:[%s6205_s3 + $0x80] sm:$0xff] }
 0x12d   :  { %2604 = vmatpush.bf16.msra.mxu2 %v4249_v33  ;;  %2577 = vmatpush.bf16.msra.mxu0 %v4232_v59  ;;  %v4228_v33 = vld [vmem:[%s6205_s3] sm:$0xff]  ;;  %v2036_v59 = vmax.f32 %v1750_v53, 0.0  ;;  %v2044_v60 = vmax.f32 %v1752_v57, 0.0 }
 0x12e   :  { %v2035_v56 = vmax.f32 %v1694_v24, 0.0  ;;  %v2037_v0 = vmax.f32 %v1806_v6, 0.0  ;;  %v4268_v47 = vld [vmem:[%s6205_s3 + $0x140] sm:$0xff]  ;;  %v4283_v24 = vld [vmem:[%s6205_s3 + $0x1b8] sm:$0xff] }
 0x12f   :  { %2618 = vmatpush.bf16.msra.mxu3 %v4257_v58  ;;  %2591 = vmatpush.bf16.msra.mxu1 %v4240_v36  ;;  %v1793_v48 = vpop.f32.mrf.mxu2  ;;  %v2043_v58 = vmax.f32 %v1696_v49, 0.0  ;;  %v2052_v7 = vpack.c.bf16 %v2044_v60, %v2036_v59  ;;  %v295_v49 = vperm.slane %v5977_v43, 5 }
 0x130   :  { %v1794_v39 = vadd.f32 %v1793_v48, %v1780_v37  ;;  %v4269_v37 = vld [vmem:[%s6205_s3 + $0x148] sm:$0xff] }
 0x131   :  { %2605 = vmatpush.bf16.msra.mxu2 %v4248_v2  ;;  %2578 = vmatpush.bf16.msra.mxu0 %v4231_v12  ;;  %v1807_v16 = vpop.f32.mrf.mxu3  ;;  %v2050_v2 = vpack.c.bf16 %v2042_v52, %v2034_v55  ;;  %v2051_v5 = vpack.c.bf16 %v2043_v58, %v2035_v56  ;;  %v4273_v12 = vld [vmem:[%s6205_s3 + $0x168] sm:$0xff]  ;;  %v4278_v56 = vld [vmem:[%s6205_s3 + $0x190] sm:$0xff] }
 0x132   :  { %v1808_v9 = vadd.f32 %v1807_v16, %v1794_v39  ;;  %v4281_v48 = vld [vmem:[%s6205_s3 + $0x1a8] sm:$0xff]  ;;  %v4280_v16 = vld [vmem:[%s6205_s3 + $0x1a0] sm:$0xff] }
 0x133   :  { %2619 = vmatpush.bf16.msra.mxu3 %v4256_v11  ;;  %2592 = vmatpush.bf16.msra.mxu1 %v4239_v38  ;;  %v4265_v11 = vld [vmem:[%s6205_s3 + $0x128] sm:$0xff]  ;;  %v4264_v38 = vld [vmem:[%s6205_s3 + $0x120] sm:$0xff] }
 0x134   :  { %v2045_v36 = vmax.f32 %v1808_v9, 0.0 }
 0x135   :  { %2606 = vmatpush.bf16.msra.mxu2 %v4247_v1  ;;  %2579 = vmatpush.bf16.msra.mxu0 %v4230_v25 }
 0x136   :  { %v2053_v46 = vpack.c.bf16 %v2045_v36, %v2037_v0  ;;  %v4277_v0 = vld [vmem:[%s6205_s3 + $0x188] sm:$0xff] }
 0x137   :  { %2620 = vmatpush.bf16.msra.mxu3 %v4255_v22  ;;  %2593 = vmatpush.bf16.msra.mxu1 %v4238_v51  ;;  %v4270_v51 = vld [vmem:[%s6205_s3 + $0x150] sm:$0xff] }
 0x139   :  { %2607 = vmatpush.bf16.msra.mxu2 %v4246_v29  ;;  %2580 = vmatpush.bf16.msra.mxu0 %v4229_v41  ;;  %v4260_v41 = vld [vmem:[%s6205_s3 + $0x100] sm:$0xff] }
 0x13b   :  { %2621 = vmatpush.bf16.msra.mxu3 %v4254_v40  ;;  %2594 = vmatpush.bf16.msra.mxu1 %v4237_v44 }
 0x13d   :  { %2608 = vmatpush.bf16.msra.mxu2 %v4245_v45  ;;  %2581 = vmatpush.bf16.msra.mxu0 %v4228_v33  ;;  %v1819_v23 = vpop.f32.mrf.mxu0  ;;  %v4282_v45 = vld [vmem:[%s6205_s3 + $0x1b0] sm:$0xff]  ;;  %v4279_v33 = vld [vmem:[%s6205_s3 + $0x198] sm:$0xff] }
 0x13e   :  { %v1820_v1 = vadd.f32 %v1819_v23, %v294_v13 }
 0x13f   :  { %2622 = vmatpush.bf16.msra.mxu3 %v4253_v20  ;;  %2595 = vmatpush.bf16.msra.mxu1 %v4236_v26  ;;  %v1833_v15 = vpop.f32.mrf.mxu1 }
 0x140   :  { %2582 = vmatmul.bf16.vlgmr.msra.gmra.mxu0 %v2050_v2  ;;  %v1834_v18 = vadd.f32 %v1833_v15, %v1820_v1 }
 0x141   :  { %2609 = vmatpush.bf16.msra.mxu2 %v4244_v54  ;;  %2630 = vmatpush.bf16.msrb.mxu0 %v4267_v61 }
 0x142   :  { %2596 = vmatmul.bf16.vlgmr.msra.gmra.mxu1 %v2051_v5  ;;  %v4276_v5 = vld [vmem:[%s6205_s3 + $0x180] sm:$0xff] }
 0x143   :  { %2644 = vmatpush.bf16.msrb.mxu1 %v4275_v62  ;;  %2623 = vmatpush.bf16.msra.mxu3 %v4252_v3 }
 0x144   :  { %2610 = vmatmul.bf16.vlgmr.msra.gmra.mxu2 %v2052_v7  ;;  %v4291_v7 = vld [vmem:[%s6205_s3 + $0x1f8] sm:$0xff] }
 0x145   :  { %2631 = vmatpush.bf16.msrb.mxu0 %v4266_v10  ;;  %v1821_v25 = vpop.f32.mrf.mxu0  ;;  %2658 = vmatpush.bf16.msrb.mxu2 %v4283_v24 }
 0x146   :  { %2624 = vmatmul.bf16.vlgmr.msra.gmra.mxu3 %v2053_v46  ;;  %v1822_v28 = vadd.f32 %v1821_v25, %v294_v13  ;;  %v296_v46 = vperm.slane %v5977_v43, 6  ;;  %v4288_v13 = vld [vmem:[%s6205_s3 + $0x1e0] sm:$0xff] }
 0x147   :  { %2645 = vmatpush.bf16.msrb.mxu1 %v4274_v8  ;;  %v1847_v21 = vpop.f32.mrf.mxu2  ;;  %v1835_v4 = vpop.f32.mrf.mxu1  ;;  %2672 = vmatpush.bf16.msrb.mxu3 %v4291_v7  ;;  %v4290_v8 = vld [vmem:[%s6205_s3 + $0x1f0] sm:$0xff] }
 0x148   :  { %v1848_v22 = vadd.f32 %v1847_v21, %v1834_v18  ;;  %v1836_v29 = vadd.f32 %v1835_v4, %v1822_v28  ;;  %v4285_v4 = vld [vmem:[%s6205_s3 + $0x1c8] sm:$0xff] }
 0x149   :  { %2632 = vmatpush.bf16.msrb.mxu0 %v4265_v11  ;;  %v1861_v14 = vpop.f32.mrf.mxu3  ;;  %2659 = vmatpush.bf16.msrb.mxu2 %v4282_v45  ;;  %v4289_v11 = vld [vmem:[%s6205_s3 + $0x1e8] sm:$0xff] }
 0x14a   :  { %v1862_v31 = vadd.f32 %v1861_v14, %v1848_v22  ;;  %v4286_v22 = vld [vmem:[%s6205_s3 + $0x1d0] sm:$0xff] }
 0x14b   :  { %2646 = vmatpush.bf16.msrb.mxu1 %v4273_v12  ;;  %2673 = vmatpush.bf16.msrb.mxu3 %v4290_v8 }
 0x14c   :  { %v2038_v63 = vmax.f32 %v1862_v31, 0.0 }
 0x14d   :  { %2633 = vmatpush.bf16.msrb.mxu0 %v4264_v38  ;;  %2660 = vmatpush.bf16.msrb.mxu2 %v4281_v48 }
 0x14f   :  { %2647 = vmatpush.bf16.msrb.mxu1 %v4272_v17  ;;  %v1849_v34 = vpop.f32.mrf.mxu2  ;;  %2674 = vmatpush.bf16.msrb.mxu3 %v4289_v11  ;;  %v4287_v17 = vld [vmem:[%s6205_s3 + $0x1d8] sm:$0xff] }
 0x150   :  { %v1850_v35 = vadd.f32 %v1849_v34, %v1836_v29  ;;  %v4284_v34 = vld [vmem:[%s6205_s3 + $0x1c0] sm:$0xff] }
 0x151   :  { %2634 = vmatpush.bf16.msrb.mxu0 %v4263_v19  ;;  %v1863_v30 = vpop.f32.mrf.mxu3  ;;  %2661 = vmatpush.bf16.msrb.mxu2 %v4280_v16 }
 0x152   :  { %v1864_v40 = vadd.f32 %v1863_v30, %v1850_v35 }
 0x153   :  { %2648 = vmatpush.bf16.msrb.mxu1 %v4271_v50  ;;  %2675 = vmatpush.bf16.msrb.mxu3 %v4288_v13 }
 0x154   :  { %v2046_v42 = vmax.f32 %v1864_v40, 0.0 }
 0x155   :  { %2635 = vmatpush.bf16.msrb.mxu0 %v4262_v27  ;;  %2662 = vmatpush.bf16.msrb.mxu2 %v4279_v33 }
 0x156   :  { %v2054_v44 = vpack.c.bf16 %v2046_v42, %v2038_v63 }
 0x157   :  { %2649 = vmatpush.bf16.msrb.mxu1 %v4270_v51  ;;  %2676 = vmatpush.bf16.msrb.mxu3 %v4287_v17 }
 0x159   :  { %2636 = vmatpush.bf16.msrb.mxu0 %v4261_v32  ;;  %2663 = vmatpush.bf16.msrb.mxu2 %v4278_v56 }
 0x15b   :  { %2650 = vmatpush.bf16.msrb.mxu1 %v4269_v37  ;;  %2677 = vmatpush.bf16.msrb.mxu3 %v4286_v22  ;;  %v297_v37 = vperm.slane %v5977_v43, 7 }
 0x15d   :  { %2637 = vmatpush.bf16.msrb.mxu0 %v4260_v41  ;;  %v1875_v53 = vpop.f32.mrf.mxu0  ;;  %2664 = vmatpush.bf16.msrb.mxu2 %v4277_v0 }
 0x15e   :  { %v1876_v57 = vadd.f32 %v1875_v53, %v295_v49 }
 0x15f   :  { %2651 = vmatpush.bf16.msrb.mxu1 %v4268_v47  ;;  %v1889_v39 = vpop.f32.mrf.mxu1  ;;  %2678 = vmatpush.bf16.msrb.mxu3 %v4285_v4 }
 0x160   :  { %2638 = vmatmul.bf16.vlgmr.msrb.gmra.mxu0 %v2054_v44  ;;  %v1890_v6 = vadd.f32 %v1889_v39, %v1876_v57 }
 0x161   :  { %2665 = vmatpush.bf16.msrb.mxu2 %v4276_v5 }
 0x163   :  { %2679 = vmatpush.bf16.msrb.mxu3 %v4284_v34 }
 0x165   :  { %v1877_v52 = vpop.f32.mrf.mxu0 }
 0x166   :  { %v1878_v26 = vadd.f32 %v1877_v52, %v295_v49 }
 0x167   :  { %v1903_v9 = vpop.f32.mrf.mxu2  ;;  %v1891_v54 = vpop.f32.mrf.mxu1 }
 0x168   :  { %v1904_v55 = vadd.f32 %v1903_v9, %v1890_v6  ;;  %v1892_v58 = vadd.f32 %v1891_v54, %v1878_v26  ;;  %v4292_v54 = vld [vmem:[%s6207_s4] ss:$0 sm:$0xff] }
 0x169   :  { %v1917_v20 = vpop.f32.mrf.mxu3 }
 0x16a   :  { %v1918_v59 = vadd.f32 %v1917_v20, %v1904_v55 }
 0x16c   :  { %v2039_v36 = vmax.f32 %v1918_v59, 0.0 }
 0x16f   :  { %v1905_v60 = vpop.f32.mrf.mxu2 }
 0x170   :  { %v1906_v61 = vadd.f32 %v1905_v60, %v1892_v58 }
 0x171   :  { %v1919_v62 = vpop.f32.mrf.mxu3 }
 0x172   :  { %v1920_v2 = vadd.f32 %v1919_v62, %v1906_v61 }
 0x174   :  { %v2047_v3 = vmax.f32 %v1920_v2, 0.0 }
 0x176   :  { %v2055_v10 = vpack.c.bf16 %v2047_v3, %v2039_v36 }
 0x178   :  { %2652 = vmatmul.bf16.vlgmr.msrb.gmra.mxu1 %v2055_v10 }
 0x17d   :  { %v1931_v12 = vpop.f32.mrf.mxu0 }
 0x17e   :  { %v1932_v23 = vadd.f32 %v1931_v12, %v296_v46 }
 0x17f   :  { %v1945_v38 = vpop.f32.mrf.mxu1 }
 0x180   :  { %v1946_v1 = vadd.f32 %v1945_v38, %v1932_v23 }
 0x185   :  { %v1933_v21 = vpop.f32.mrf.mxu0 }
 0x186   :  { %v1934_v14 = vadd.f32 %v1933_v21, %v296_v46 }
 0x187   :  { %v1959_v15 = vpop.f32.mrf.mxu2  ;;  %v1947_v50 = vpop.f32.mrf.mxu1 }
 0x188   :  { %v1960_v19 = vadd.f32 %v1959_v15, %v1946_v1  ;;  %v1948_v25 = vadd.f32 %v1947_v50, %v1934_v14 }
 0x189   :  { %v1973_v18 = vpop.f32.mrf.mxu3 }
 0x18a   :  { %v1974_v27 = vadd.f32 %v1973_v18, %v1960_v19 }
 0x18c   :  { %v2040_v31 = vmax.f32 %v1974_v27, 0.0 }
 0x18f   :  { %v1961_v28 = vpop.f32.mrf.mxu2 }
 0x190   :  { %v1962_v51 = vadd.f32 %v1961_v28, %v1948_v25 }
 0x191   :  { %v1975_v29 = vpop.f32.mrf.mxu3 }
 0x192   :  { %v1976_v32 = vadd.f32 %v1975_v29, %v1962_v51 }
 0x194   :  { %v2048_v35 = vmax.f32 %v1976_v32, 0.0 }
 0x196   :  { %v2056_v30 = vpack.c.bf16 %v2048_v35, %v2040_v31 }
 0x198   :  { %2666 = vmatmul.bf16.vlgmr.msrb.gmra.mxu2 %v2056_v30 }
 0x19d   :  { %v1987_v63 = vpop.f32.mrf.mxu0 }
 0x19e   :  { %v1988_v41 = vadd.f32 %v1987_v63, %v297_v37 }
 0x19f   :  { %v2001_v40 = vpop.f32.mrf.mxu1 }
 0x1a0   :  { %v2002_v24 = vadd.f32 %v2001_v40, %v1988_v41 }
 0x1a5   :  { %v1989_v44 = vpop.f32.mrf.mxu0 }
 0x1a6   :  { %v1990_v45 = vadd.f32 %v1989_v44, %v297_v37 }
 0x1a7   :  { %v2015_v42 = vpop.f32.mrf.mxu2  ;;  %v2003_v49 = vpop.f32.mrf.mxu1 }
 0x1a8   :  { %v2016_v48 = vadd.f32 %v2015_v42, %v2002_v24  ;;  %v2004_v53 = vadd.f32 %v2003_v49, %v1990_v45 }
 0x1a9   :  { %v2029_v47 = vpop.f32.mrf.mxu3 }
 0x1aa   :  { %v2030_v39 = vadd.f32 %v2029_v47, %v2016_v48 }
 0x1ac   :  { %v2041_v20 = vmax.f32 %v2030_v39, 0.0 }
 0x1af   :  { %v2017_v57 = vpop.f32.mrf.mxu2 }
 0x1b0   :  { %v2018_v16 = vadd.f32 %v2017_v57, %v2004_v53 }
 0x1b1   :  { %v2031_v6 = vpop.f32.mrf.mxu3 }
 0x1b2   :  { %v2032_v9 = vadd.f32 %v2031_v6, %v2018_v16 }
 0x1b4   :  { %v2049_v33 = vmax.f32 %v2032_v9, 0.0 }
 0x1b6   :  { %v2057_v55 = vpack.c.bf16 %v2049_v33, %v2041_v20 }
 0x1b8   :  { %2680 = vmatmul.bf16.vlgmr.msrb.gmra.mxu3 %v2057_v55 }
 0x1bd   :  { %v2583_v43 = vpop.f32.mrf.mxu0 }
 0x1be   :  { %v2584_v59 = vadd.f32 %v4292_v54, %v2583_v43 }
 0x1bf   :  { %v2597_v52 = vpop.f32.mrf.mxu1 }
 0x1c0   :  { %v2598_v62 = vadd.f32 %v2597_v52, %v2584_v59 }
 0x1c5   :  { %v2585_v56 = vpop.f32.mrf.mxu0 }
 0x1c6   :  { %v2586_v2 = vadd.f32 %v4292_v54, %v2585_v56 }
 0x1c7   :  { %v2611_v26 = vpop.f32.mrf.mxu2  ;;  %v2599_v60 = vpop.f32.mrf.mxu1 }
 0x1c8   :  { %v2612_v0 = vadd.f32 %v2611_v26, %v2598_v62  ;;  %v2600_v8 = vadd.f32 %v2599_v60, %v2586_v2 }
 0x1c9   :  { %v2625_v58 = vpop.f32.mrf.mxu3 }
 0x1ca   :  { %v2626_v7 = vadd.f32 %v2625_v58, %v2612_v0 }
 0x1cf   :  { %v2613_v61 = vpop.f32.mrf.mxu2 }
 0x1d0   :  { %v2614_v11 = vadd.f32 %v2613_v61, %v2600_v8 }
 0x1d1   :  { %v2627_v3 = vpop.f32.mrf.mxu3 }
 0x1d2   :  { %v2628_v1 = vadd.f32 %v2627_v3, %v2614_v11 }
 0x1dd   :  { %v2639_v36 = vpop.f32.mrf.mxu0 }
 0x1de   :  { %v2640_v46 = vadd.f32 %v2639_v36, %v2626_v7 }
 0x1e5   :  { %v2641_v23 = vpop.f32.mrf.mxu0 }
 0x1e6   :  { %v2642_v18 = vadd.f32 %v2641_v23, %v2628_v1 }
 0x1f5   :  { %v2653_v5 = vpop.f32.mrf.mxu1 }
 0x1f6   :  { %v2654_v12 = vadd.f32 %v2653_v5, %v2640_v46 }
 0x1fd   :  { %v2655_v17 = vpop.f32.mrf.mxu1 }
 0x1fe   :  { %v2656_v21 = vadd.f32 %v2655_v17, %v2642_v18 }
 0x21b   :  { %v2667_v10 = vpop.f32.mrf.mxu2 }
 0x21c   :  { %v2668_v13 = vadd.f32 %v2667_v10, %v2654_v12 }
 0x223   :  { %v2669_v19 = vpop.f32.mrf.mxu2 }
 0x224   :  { %v2670_v14 = vadd.f32 %v2669_v19, %v2656_v21 }
 0x23b   :  { %v2681_v38 = vpop.f32.mrf.mxu3 }
 0x23c   :  { %v2682_v15 = vadd.f32 %v2681_v38, %v2668_v13 }
 0x23e   :  { %2686 = vst [vmem:[%s6208_s5] sm:$0xff] %v2682_v15 }
 0x243   :  { %v2683_v50 = vpop.f32.mrf.mxu3 }
 0x244   :  { %v2684_v22 = vadd.f32 %v2683_v50, %v2670_v14 }
 0x246   :  { %2687 = vst [vmem:[%s6208_s5 + $0x8] sm:$0xff] %v2684_v22 }

</bundles_post_ra>
